<compile_context>
chip_gen: v5e
topology: v5e:2x2
jax: 0.10.0
libtpu: 0.0.40
codegen_flags: <defaults>
</compile_context>

<pallas_src>
import math

import numpy as np
import jax
import jax.numpy as jnp
from jax import lax
from jax.experimental import pallas as pl
from jax.experimental.pallas import tpu as pltpu

# ----------------------------- config (small, consistent with the module) -----------------------
B = 2                # batch
C = 4                # configs.enc_in  (nvars)
L = 32               # configs.seq_len
T = 16               # configs.pred_len
N_LAYERS = 2         # configs.e_layers
D = 32               # configs.d_model
F = 64               # configs.d_ff
PATCH_LEN = 8        # configs.patch_ks
STRIDE = 4           # configs.patch_sd
DW_KS = (7, 13)      # configs.dw_ks (one per encoder layer)
RE_PARAM_KERNEL = 3  # configs.re_param_kernel
REVIN_EPS = 1e-5
BN_EPS = 1e-5

LP = L + STRIDE                          # length after ReplicationPad1d((0, stride))
P = (LP - PATCH_LEN) // STRIDE + 1       # patch_num
N = B * C                                # channel-independent batch (rows per patch block)
NP = N * P                               # total tokens
Q = P * PATCH_LEN
MAX_OFF = STRIDE // 2                    # |offset| bound (tanh * stride/2)
NUM_SHIFTS = 2 * MAX_OFF + 1             # integer shifts covering the tent support
OUT_LANES = 128                          # lane-dense output slab

_SQRT_2_OVER_PI = math.sqrt(2.0 / math.pi)

N_FIXED_IN = 11
N_PER_LAYER = 14


def _gelu(x):
    return 0.5 * x * (1.0 + jnp.tanh(_SQRT_2_OVER_PI * (x + 0.044715 * x * x * x)))


def _bn2(x, gamma, beta):
    # BatchNorm1d (training-mode batch stats), channels on the lane axis.
    # Single-pass stats: var = E[x^2] - mean^2 (two independent reductions, no serial dependency).
    mean = jnp.mean(x, axis=0, keepdims=True)
    mean_sq = jnp.mean(x * x, axis=0, keepdims=True)
    var = mean_sq - mean * mean
    return (x - mean) * lax.rsqrt(var + BN_EPS) * gamma + beta


# ----------------------------------------- fused kernel ------------------------------------------
def convtimenet_kernel(*refs):
    (x_ref, rw_ref, rb_ref, rinv_ref, offw_ref, bo_ref, ga5_ref,
     wp_ref, bp_ref, hw_ref, hb_ref) = refs[:N_FIXED_IN]
    o_ref = refs[-1]
    layer_refs = refs[N_FIXED_IN:-1]

    # ---- RevIN 'norm' (subtract_last=False, affine=True) ----
    x = x_ref[...]                                                # [N, L]
    mean = jnp.mean(x, axis=1, keepdims=True)                     # [N, 1]
    var = jnp.mean(x * x, axis=1, keepdims=True) - mean * mean
    inv_std = lax.rsqrt(var + REVIN_EPS)                          # EUP rsqrt, no divide
    std = (var + REVIN_EPS) * inv_std                             # == sqrt(var + eps)
    z = (x - mean) * inv_std * rw_ref[...] + rb_ref[...]          # [N, L]

    # ---- deformable patch embedding (5-shift clamped-gather formulation) ----
    # per-patch scalar offset (tanh-bounded), already expanded to Q lanes host-side
    off_q = jnp.tanh(jnp.dot(z, offw_ref[...], preferred_element_type=jnp.float32)
                     + bo_ref[...]) * float(MAX_OFF)               # [N, Q]
    # one lane-dense matmul gives all 5 clamped anchor gathers at once
    ga5 = ga5_ref[...].astype(jnp.float32)                         # [L, 5*Q]
    anchors5 = jnp.dot(z, ga5, preferred_element_type=jnp.float32)  # [N, 5*Q]
    sampled = jnp.zeros((N, Q), jnp.float32)
    for si in range(NUM_SHIFTS):
        s = float(si - MAX_OFF)
        w = jnp.maximum(0.0, 1.0 - jnp.abs(off_q - s))             # tent weight, [N, Q]
        sampled = sampled + w * anchors5[:, si * Q:(si + 1) * Q]

    # rearrange to P-major token rows [P*N, PATCH_LEN] (contiguous 8-row blocks) and project
    rows = jnp.concatenate(
        [sampled[:, p * PATCH_LEN:(p + 1) * PATCH_LEN] for p in range(P)], axis=0)
    h = jnp.dot(rows, wp_ref[...], preferred_element_type=jnp.float32) + bp_ref[...]  # [NP, D]

    # ---- ConvTimeNet encoder layers (tokens kept P-major as [P*N, D], D on lanes) ----
    for li_ in range(N_LAYERS):
        (dww_ref, dwb_ref, a1_ref, g1_ref, be1_ref, w1_ref, b1_ref,
         gf_ref, bef_ref, w2_ref, b2_ref, a2_ref, g2_ref, be2_ref) = \
            layer_refs[li_ * N_PER_LAYER:(li_ + 1) * N_PER_LAYER]
        K = DW_KS[li_]
        pad = K // 2

        # depthwise conv along the patch axis: zero-pad by `pad` patches (pad*N rows) and take
        # K aligned sublane slices (each shift of one patch == shift of N=8 rows).
        dww = dww_ref[...]                                          # [K, D] (hoisted load)
        zp = jnp.zeros((pad * N, D), jnp.float32)
        hp = jnp.concatenate([zp, h, zp], axis=0)                   # [(P + 2*pad)*N, D]
        conv = hp[0:NP, :] * dww[0:1, :]
        for k in range(1, K):
            conv = conv + hp[k * N:k * N + NP, :] * dww[k:k + 1, :]
        conv = conv + dwb_ref[...]

        # SublayerConnection 1 (dropout=0) + BatchNorm1d(d_model)
        src = _bn2(h + a1_ref[...] * _gelu(conv), g1_ref[...], be1_ref[...])

        # position-wise FFN (1x1 convs == lane-dense matmuls) + BatchNorm1d(d_ff)
        w1 = w1_ref[...].astype(jnp.float32)
        w2 = w2_ref[...].astype(jnp.float32)
        ff = _gelu(jnp.dot(src, w1, preferred_element_type=jnp.float32) + b1_ref[...])
        ff = _bn2(ff, gf_ref[...], bef_ref[...])
        ff = _gelu(jnp.dot(ff, w2, preferred_element_type=jnp.float32) + b2_ref[...])

        # SublayerConnection 2 + final BatchNorm1d(d_model)
        h = _bn2(src + a2_ref[...] * ff, g2_ref[...], be2_ref[...])

    # ---- Flatten_Head: per-patch weight slabs; P-major layout -> contiguous [N, D] blocks ----
    out = jnp.zeros((N, T), jnp.float32) + hb_ref[...]
    for p in range(P):
        out = out + jnp.dot(h[p * N:(p + 1) * N, :], hw_ref[p],
                            preferred_element_type=jnp.float32)     # [N, T]

    # ---- RevIN 'denorm' (reciprocal precomputed host-side -> multiply) ----
    out = (out - rb_ref[...]) * rinv_ref[...]
    out = out * std + mean

    # lane-dense output slab [N, 128] (real data in the first T lanes)
    o_ref[...] = jnp.concatenate(
        [out, jnp.zeros((N, OUT_LANES - T), jnp.float32)], axis=1)


# --------------------------------- host-side constant builders -----------------------------------
def _offset_weight_q(wo):
    # off_w_q[l, p*PL + j'] = sum_j 1[l == min(p*STRIDE+j, L-1)] * wo[j]
    # (anchor gather with replication pad folded in, offset head folded in, expanded to Q lanes)
    m = np.zeros((L, Q), np.float32)
    for p in range(P):
        col = np.zeros(L, np.float32)
        for j in range(PATCH_LEN):
            col[min(p * STRIDE + j, L - 1)] += float(wo[j])
        for j2 in range(PATCH_LEN):
            m[:, p * PATCH_LEN + j2] = col
    return jnp.asarray(m)


def _shift_anchor_gather():
    # ga5[l, si*Q + p*PL + j] == 1 iff l == clamp(p*STRIDE + j + (si - MAX_OFF), 0, L-1).
    # Combined with the tent weights max(0, 1-|off - s|) this is exactly the original
    # clip-then-linear-interp resample (0/1 values are exact in bf16).
    g = np.zeros((L, NUM_SHIFTS * Q), np.float32)
    for si in range(NUM_SHIFTS):
        s = si - MAX_OFF
        for p in range(P):
            for j in range(PATCH_LEN):
                l = min(max(p * STRIDE + j + s, 0), L - 1)
                g[l, si * Q + p * PATCH_LEN + j] = 1.0
    return jnp.asarray(g).astype(jnp.bfloat16)


# --------------------------------------- parameters ----------------------------------------------
def init_inputs(key):
    keys = iter(jax.random.split(key, 64))

    def nrm(shape, scale):
        return (scale * jax.random.normal(next(keys), shape)).astype(jnp.float32)

    def ones_ish(shape):
        return (1.0 + 0.1 * jax.random.normal(next(keys), shape)).astype(jnp.float32)

    # RevIN affine, pre-broadcast per channel-independent row n = b*C + c
    revin_w = ones_ish((1, C))
    revin_b = nrm((1, C), 0.1)
    rw_n = jnp.tile(revin_w, (B, 1)).reshape(N, 1)
    rb_n = jnp.tile(revin_b, (B, 1)).reshape(N, 1)
    rinv_n = 1.0 / (rw_n + REVIN_EPS * REVIN_EPS)       # denorm reciprocal (host-side)

    # DePatch offset head (folded with anchor gather host-side) + patch projection
    wo = nrm((PATCH_LEN,), 1.0 / math.sqrt(PATCH_LEN))
    offw_q = _offset_weight_q(np.asarray(wo))           # [L, Q]
    bo = nrm((1, 1), 0.1)
    wp = nrm((PATCH_LEN, D), 1.0 / math.sqrt(PATCH_LEN))
    bp = nrm((1, D), 0.05)

    # Flatten_Head weight stored per-patch [P, D, T] (if porting torch weights, permute the
    # d_model*patch_num feature axis accordingly).
    hw3 = nrm((P, D, T), 1.0 / math.sqrt(D * P))
    hb = nrm((1, T), 0.05)

    inputs = [rw_n, rb_n, rinv_n, offw_q, bo, _shift_anchor_gather(), wp, bp, hw3, hb]

    for li in range(N_LAYERS):
        K = DW_KS[li]
        dw_large = nrm((K, D), 1.0 / math.sqrt(K))
        dwb_large = nrm((1, D), 0.05)
        dw_small = nrm((RE_PARAM_KERNEL, D), 1.0 / math.sqrt(RE_PARAM_KERNEL))
        dwb_small = nrm((1, D), 0.05)
        # structural re-parameterization: merge small depthwise kernel into the large one
        left = (K - RE_PARAM_KERNEL) // 2
        dww = dw_large.at[left:left + RE_PARAM_KERNEL, :].add(dw_small)
        dwb = dwb_large + dwb_small
        inputs += [
            dww, dwb,
            jnp.full((1, 1), 1e-8, jnp.float32),                          # a1 (module default)
            ones_ish((1, D)), nrm((1, D), 0.05),                          # BN1 gamma/beta
            nrm((D, F), 1.0 / math.sqrt(D)).astype(jnp.bfloat16),         # FFN conv1 (bf16)
            nrm((1, F), 0.05),
            ones_ish((1, F)), nrm((1, F), 0.05),                          # BN(d_ff) gamma/beta
            nrm((F, D), 1.0 / math.sqrt(F)).astype(jnp.bfloat16),         # FFN conv2 (bf16)
            nrm((1, D), 0.05),
            jnp.full((1, 1), 1e-8, jnp.float32),                          # a2 (module default)
            ones_ish((1, D)), nrm((1, D), 0.05),                          # BN2 gamma/beta
        ]
    return inputs


# --------------------------------- pallas_call plumbing / forward --------------------------------
def _full_spec(shape):
    nd = len(shape)
    return pl.BlockSpec(shape, lambda *_, _nd=nd: (0,) * _nd)


def convtimenet_forward(x, inputs):
    # x: [B, L, C]. The two remaining XLA-side ops are tiny layout plumbing on <=1 KiB arrays.
    x_nl = jnp.transpose(x, (0, 2, 1)).reshape(N, L)
    args = (x_nl,) + tuple(inputs)
    out_slab = pl.pallas_call(
        convtimenet_kernel,
        grid=(1,),
        in_specs=[_full_spec(a.shape) for a in args],
        out_specs=_full_spec((N, OUT_LANES)),
        out_shape=jax.ShapeDtypeStruct((N, OUT_LANES), jnp.float32),
        compiler_params=pltpu.CompilerParams(dimension_semantics=("arbitrary",)),
    )(*args)
    out = out_slab[:, :T].reshape(B, C, T)
    return jnp.transpose(out, (0, 2, 1))                          # [B, T, C]


if __name__ == "__main__":
    key = jax.random.PRNGKey(0)
    pkey, xkey = jax.random.split(key)
    inputs = init_inputs(pkey)
    x = jax.random.normal(xkey, (B, L, C), dtype=jnp.float32)

    out = jax.jit(convtimenet_forward)(x, inputs)
    out = jax.block_until_ready(out)
    assert out.shape == (B, T, C), out.shape
    assert bool(jnp.all(jnp.isfinite(out)))
    print("KERNEL_OK")
</pallas_src>

<mosaic_0001>
module attributes {stable_mosaic.version = 11 : i64} {
  func.func @convtimenet_kernel(%arg0: i32, %arg1: memref<8x32xf32, #tpu.memory_space<vmem>>, %arg2: memref<8x1xf32, #tpu.memory_space<vmem>>, %arg3: memref<8x1xf32, #tpu.memory_space<vmem>>, %arg4: memref<8x1xf32, #tpu.memory_space<vmem>>, %arg5: memref<32x64xf32, #tpu.memory_space<vmem>>, %arg6: memref<1x1xf32, #tpu.memory_space<vmem>>, %arg7: memref<32x320xbf16, #tpu.memory_space<vmem>>, %arg8: memref<8x32xf32, #tpu.memory_space<vmem>>, %arg9: memref<1x32xf32, #tpu.memory_space<vmem>>, %arg10: memref<8x32x16xf32, #tpu.memory_space<vmem>>, %arg11: memref<1x16xf32, #tpu.memory_space<vmem>>, %arg12: memref<7x32xf32, #tpu.memory_space<vmem>>, %arg13: memref<1x32xf32, #tpu.memory_space<vmem>>, %arg14: memref<1x1xf32, #tpu.memory_space<vmem>>, %arg15: memref<1x32xf32, #tpu.memory_space<vmem>>, %arg16: memref<1x32xf32, #tpu.memory_space<vmem>>, %arg17: memref<32x64xbf16, #tpu.memory_space<vmem>>, %arg18: memref<1x64xf32, #tpu.memory_space<vmem>>, %arg19: memref<1x64xf32, #tpu.memory_space<vmem>>, %arg20: memref<1x64xf32, #tpu.memory_space<vmem>>, %arg21: memref<64x32xbf16, #tpu.memory_space<vmem>>, %arg22: memref<1x32xf32, #tpu.memory_space<vmem>>, %arg23: memref<1x1xf32, #tpu.memory_space<vmem>>, %arg24: memref<1x32xf32, #tpu.memory_space<vmem>>, %arg25: memref<1x32xf32, #tpu.memory_space<vmem>>, %arg26: memref<13x32xf32, #tpu.memory_space<vmem>>, %arg27: memref<1x32xf32, #tpu.memory_space<vmem>>, %arg28: memref<1x1xf32, #tpu.memory_space<vmem>>, %arg29: memref<1x32xf32, #tpu.memory_space<vmem>>, %arg30: memref<1x32xf32, #tpu.memory_space<vmem>>, %arg31: memref<32x64xbf16, #tpu.memory_space<vmem>>, %arg32: memref<1x64xf32, #tpu.memory_space<vmem>>, %arg33: memref<1x64xf32, #tpu.memory_space<vmem>>, %arg34: memref<1x64xf32, #tpu.memory_space<vmem>>, %arg35: memref<64x32xbf16, #tpu.memory_space<vmem>>, %arg36: memref<1x32xf32, #tpu.memory_space<vmem>>, %arg37: memref<1x1xf32, #tpu.memory_space<vmem>>, %arg38: memref<1x32xf32, #tpu.memory_space<vmem>>, %arg39: memref<1x32xf32, #tpu.memory_space<vmem>>, %arg40: memref<8x128xf32, #tpu.memory_space<vmem>>) attributes {dimension_semantics = [#tpu.dimension_semantics<arbitrary>], iteration_bounds = array<i64: 1>, scalar_prefetch = 0 : i64, scratch_operands = 0 : i64, tpu.core_type = #tpu.core_type<tc>, window_params = [{pipeline_mode = #tpu.pipeline_mode<synchronous>, transform_indices = @transform_0, window_bounds = array<i64: 8, 32>}, {pipeline_mode = #tpu.pipeline_mode<synchronous>, transform_indices = @transform_1, window_bounds = array<i64: 8, 1>}, {pipeline_mode = #tpu.pipeline_mode<synchronous>, transform_indices = @transform_2, window_bounds = array<i64: 8, 1>}, {pipeline_mode = #tpu.pipeline_mode<synchronous>, transform_indices = @transform_3, window_bounds = array<i64: 8, 1>}, {pipeline_mode = #tpu.pipeline_mode<synchronous>, transform_indices = @transform_4, window_bounds = array<i64: 32, 64>}, {pipeline_mode = #tpu.pipeline_mode<synchronous>, transform_indices = @transform_5, window_bounds = array<i64: 1, 1>}, {pipeline_mode = #tpu.pipeline_mode<synchronous>, transform_indices = @transform_6, window_bounds = array<i64: 32, 320>}, {pipeline_mode = #tpu.pipeline_mode<synchronous>, transform_indices = @transform_7, window_bounds = array<i64: 8, 32>}, {pipeline_mode = #tpu.pipeline_mode<synchronous>, transform_indices = @transform_8, window_bounds = array<i64: 1, 32>}, {pipeline_mode = #tpu.pipeline_mode<synchronous>, transform_indices = @transform_9, window_bounds = array<i64: 8, 32, 16>}, {pipeline_mode = #tpu.pipeline_mode<synchronous>, transform_indices = @transform_10, window_bounds = array<i64: 1, 16>}, {pipeline_mode = #tpu.pipeline_mode<synchronous>, transform_indices = @transform_11, window_bounds = array<i64: 7, 32>}, {pipeline_mode = #tpu.pipeline_mode<synchronous>, transform_indices = @transform_12, window_bounds = array<i64: 1, 32>}, {pipeline_mode = #tpu.pipeline_mode<synchronous>, transform_indices = @transform_13, window_bounds = array<i64: 1, 1>}, {pipeline_mode = #tpu.pipeline_mode<synchronous>, transform_indices = @transform_14, window_bounds = array<i64: 1, 32>}, {pipeline_mode = #tpu.pipeline_mode<synchronous>, transform_indices = @transform_15, window_bounds = array<i64: 1, 32>}, {pipeline_mode = #tpu.pipeline_mode<synchronous>, transform_indices = @transform_16, window_bounds = array<i64: 32, 64>}, {pipeline_mode = #tpu.pipeline_mode<synchronous>, transform_indices = @transform_17, window_bounds = array<i64: 1, 64>}, {pipeline_mode = #tpu.pipeline_mode<synchronous>, transform_indices = @transform_18, window_bounds = array<i64: 1, 64>}, {pipeline_mode = #tpu.pipeline_mode<synchronous>, transform_indices = @transform_19, window_bounds = array<i64: 1, 64>}, {pipeline_mode = #tpu.pipeline_mode<synchronous>, transform_indices = @transform_20, window_bounds = array<i64: 64, 32>}, {pipeline_mode = #tpu.pipeline_mode<synchronous>, transform_indices = @transform_21, window_bounds = array<i64: 1, 32>}, {pipeline_mode = #tpu.pipeline_mode<synchronous>, transform_indices = @transform_22, window_bounds = array<i64: 1, 1>}, {pipeline_mode = #tpu.pipeline_mode<synchronous>, transform_indices = @transform_23, window_bounds = array<i64: 1, 32>}, {pipeline_mode = #tpu.pipeline_mode<synchronous>, transform_indices = @transform_24, window_bounds = array<i64: 1, 32>}, {pipeline_mode = #tpu.pipeline_mode<synchronous>, transform_indices = @transform_25, window_bounds = array<i64: 13, 32>}, {pipeline_mode = #tpu.pipeline_mode<synchronous>, transform_indices = @transform_26, window_bounds = array<i64: 1, 32>}, {pipeline_mode = #tpu.pipeline_mode<synchronous>, transform_indices = @transform_27, window_bounds = array<i64: 1, 1>}, {pipeline_mode = #tpu.pipeline_mode<synchronous>, transform_indices = @transform_28, window_bounds = array<i64: 1, 32>}, {pipeline_mode = #tpu.pipeline_mode<synchronous>, transform_indices = @transform_29, window_bounds = array<i64: 1, 32>}, {pipeline_mode = #tpu.pipeline_mode<synchronous>, transform_indices = @transform_30, window_bounds = array<i64: 32, 64>}, {pipeline_mode = #tpu.pipeline_mode<synchronous>, transform_indices = @transform_31, window_bounds = array<i64: 1, 64>}, {pipeline_mode = #tpu.pipeline_mode<synchronous>, transform_indices = @transform_32, window_bounds = array<i64: 1, 64>}, {pipeline_mode = #tpu.pipeline_mode<synchronous>, transform_indices = @transform_33, window_bounds = array<i64: 1, 64>}, {pipeline_mode = #tpu.pipeline_mode<synchronous>, transform_indices = @transform_34, window_bounds = array<i64: 64, 32>}, {pipeline_mode = #tpu.pipeline_mode<synchronous>, transform_indices = @transform_35, window_bounds = array<i64: 1, 32>}, {pipeline_mode = #tpu.pipeline_mode<synchronous>, transform_indices = @transform_36, window_bounds = array<i64: 1, 1>}, {pipeline_mode = #tpu.pipeline_mode<synchronous>, transform_indices = @transform_37, window_bounds = array<i64: 1, 32>}, {pipeline_mode = #tpu.pipeline_mode<synchronous>, transform_indices = @transform_38, window_bounds = array<i64: 1, 32>}, {pipeline_mode = #tpu.pipeline_mode<synchronous>, transform_indices = @transform_39, window_bounds = array<i64: 8, 128>}]} {
    %c0 = arith.constant 0 : index
    %c0_0 = arith.constant 0 : index
    %0 = vector.load %arg1[%c0, %c0_0] : memref<8x32xf32, #tpu.memory_space<vmem>>, vector<8x32xf32>
    %cst = arith.constant dense<0.000000e+00> : vector<8xf32>
    %1 = vector.multi_reduction <add>, %0, %cst [1] : vector<8x32xf32> to vector<8xf32>
    %2 = vector.shape_cast %1 : vector<8xf32> to vector<8x1xf32>
    %cst_1 = arith.constant 3.200000e+01 : f32
    %3 = vector.broadcast %cst_1 : f32 to vector<8x1xf32>
    %4 = arith.divf %2, %3 : vector<8x1xf32>
    %5 = arith.mulf %0, %0 : vector<8x32xf32>
    %cst_2 = arith.constant dense<0.000000e+00> : vector<8xf32>
    %6 = vector.multi_reduction <add>, %5, %cst_2 [1] : vector<8x32xf32> to vector<8xf32>
    %7 = vector.shape_cast %6 : vector<8xf32> to vector<8x1xf32>
    %cst_3 = arith.constant 3.200000e+01 : f32
    %8 = vector.broadcast %cst_3 : f32 to vector<8x1xf32>
    %9 = arith.divf %7, %8 : vector<8x1xf32>
    %10 = arith.mulf %4, %4 : vector<8x1xf32>
    %11 = arith.subf %9, %10 : vector<8x1xf32>
    %cst_4 = arith.constant 9.99999974E-6 : f32
    %12 = vector.broadcast %cst_4 : f32 to vector<8x1xf32>
    %13 = arith.addf %11, %12 : vector<8x1xf32>
    %14 = math.rsqrt %13 : vector<8x1xf32>
    %cst_5 = arith.constant 9.99999974E-6 : f32
    %15 = vector.broadcast %cst_5 : f32 to vector<8x1xf32>
    %16 = arith.addf %11, %15 : vector<8x1xf32>
    %17 = arith.mulf %16, %14 : vector<8x1xf32>
    %18 = vector.broadcast %4 : vector<8x1xf32> to vector<8x32xf32>
    %19 = arith.subf %0, %18 : vector<8x32xf32>
    %20 = vector.broadcast %14 : vector<8x1xf32> to vector<8x32xf32>
    %21 = arith.mulf %19, %20 : vector<8x32xf32>
    %c0_6 = arith.constant 0 : index
    %c0_7 = arith.constant 0 : index
    %22 = vector.load %arg2[%c0_6, %c0_7] : memref<8x1xf32, #tpu.memory_space<vmem>>, vector<8x1xf32>
    %23 = vector.broadcast %22 : vector<8x1xf32> to vector<8x32xf32>
    %24 = arith.mulf %21, %23 : vector<8x32xf32>
    %c0_8 = arith.constant 0 : index
    %c0_9 = arith.constant 0 : index
    %25 = vector.load %arg3[%c0_8, %c0_9] : memref<8x1xf32, #tpu.memory_space<vmem>>, vector<8x1xf32>
    %26 = vector.broadcast %25 : vector<8x1xf32> to vector<8x32xf32>
    %27 = arith.addf %24, %26 : vector<8x32xf32>
    %c0_10 = arith.constant 0 : index
    %c0_11 = arith.constant 0 : index
    %28 = vector.load %arg5[%c0_10, %c0_11] : memref<32x64xf32, #tpu.memory_space<vmem>>, vector<32x64xf32>
    %cst_12 = arith.constant dense<0.000000e+00> : vector<8x64xf32>
    %29 = tpu.matmul %27, %28, %cst_12 {dimension_numbers = #tpu.dot_dimension_numbers<[1], [0], [0], [1], [0, 0, 1, 1], [], []>} : vector<8x32xf32>, vector<32x64xf32>, vector<8x64xf32> -> vector<8x64xf32>
    %c0_13 = arith.constant 0 : index
    %c0_14 = arith.constant 0 : index
    %30 = vector.load %arg6[%c0_13, %c0_14] : memref<1x1xf32, #tpu.memory_space<vmem>>, vector<1x1xf32>
    %31 = vector.broadcast %30 : vector<1x1xf32> to vector<8x64xf32>
    %32 = arith.addf %29, %31 : vector<8x64xf32>
    %33 = math.tanh %32 : vector<8x64xf32>
    %cst_15 = arith.constant 2.000000e+00 : f32
    %34 = vector.broadcast %cst_15 : f32 to vector<8x64xf32>
    %35 = arith.mulf %33, %34 : vector<8x64xf32>
    %c0_16 = arith.constant 0 : index
    %c0_17 = arith.constant 0 : index
    %36 = vector.load %arg7[%c0_16, %c0_17] : memref<32x320xbf16, #tpu.memory_space<vmem>>, vector<32x320xbf16>
    %37 = arith.extf %36 : vector<32x320xbf16> to vector<32x320xf32>
    %cst_18 = arith.constant dense<0.000000e+00> : vector<8x320xf32>
    %38 = tpu.matmul %27, %37, %cst_18 {dimension_numbers = #tpu.dot_dimension_numbers<[1], [0], [0], [1], [0, 0, 1, 1], [], []>} : vector<8x32xf32>, vector<32x320xf32>, vector<8x320xf32> -> vector<8x320xf32>
    %cst_19 = arith.constant 0.000000e+00 : f32
    %39 = vector.broadcast %cst_19 : f32 to vector<8x64xf32>
    %cst_20 = arith.constant -2.000000e+00 : f32
    %40 = vector.broadcast %cst_20 : f32 to vector<8x64xf32>
    %41 = arith.subf %35, %40 : vector<8x64xf32>
    %42 = math.absf %41 : vector<8x64xf32>
    %cst_21 = arith.constant 1.000000e+00 : f32
    %43 = vector.broadcast %cst_21 : f32 to vector<8x64xf32>
    %44 = arith.subf %43, %42 : vector<8x64xf32>
    %cst_22 = arith.constant 0.000000e+00 : f32
    %45 = vector.broadcast %cst_22 : f32 to vector<8x64xf32>
    %46 = arith.maximumf %45, %44 : vector<8x64xf32>
    %47 = vector.extract_strided_slice %38 {offsets = [0, 0], sizes = [8, 64], strides = [1, 1]} : vector<8x320xf32> to vector<8x64xf32>
    %48 = arith.mulf %46, %47 : vector<8x64xf32>
    %49 = arith.addf %39, %48 : vector<8x64xf32>
    %cst_23 = arith.constant -1.000000e+00 : f32
    %50 = vector.broadcast %cst_23 : f32 to vector<8x64xf32>
    %51 = arith.subf %35, %50 : vector<8x64xf32>
    %52 = math.absf %51 : vector<8x64xf32>
    %cst_24 = arith.constant 1.000000e+00 : f32
    %53 = vector.broadcast %cst_24 : f32 to vector<8x64xf32>
    %54 = arith.subf %53, %52 : vector<8x64xf32>
    %cst_25 = arith.constant 0.000000e+00 : f32
    %55 = vector.broadcast %cst_25 : f32 to vector<8x64xf32>
    %56 = arith.maximumf %55, %54 : vector<8x64xf32>
    %57 = vector.extract_strided_slice %38 {offsets = [0, 64], sizes = [8, 64], strides = [1, 1]} : vector<8x320xf32> to vector<8x64xf32>
    %58 = arith.mulf %56, %57 : vector<8x64xf32>
    %59 = arith.addf %49, %58 : vector<8x64xf32>
    %cst_26 = arith.constant 0.000000e+00 : f32
    %60 = vector.broadcast %cst_26 : f32 to vector<8x64xf32>
    %61 = arith.subf %35, %60 : vector<8x64xf32>
    %62 = math.absf %61 : vector<8x64xf32>
    %cst_27 = arith.constant 1.000000e+00 : f32
    %63 = vector.broadcast %cst_27 : f32 to vector<8x64xf32>
    %64 = arith.subf %63, %62 : vector<8x64xf32>
    %cst_28 = arith.constant 0.000000e+00 : f32
    %65 = vector.broadcast %cst_28 : f32 to vector<8x64xf32>
    %66 = arith.maximumf %65, %64 : vector<8x64xf32>
    %67 = vector.extract_strided_slice %38 {offsets = [0, 128], sizes = [8, 64], strides = [1, 1]} : vector<8x320xf32> to vector<8x64xf32>
    %68 = arith.mulf %66, %67 : vector<8x64xf32>
    %69 = arith.addf %59, %68 : vector<8x64xf32>
    %cst_29 = arith.constant 1.000000e+00 : f32
    %70 = vector.broadcast %cst_29 : f32 to vector<8x64xf32>
    %71 = arith.subf %35, %70 : vector<8x64xf32>
    %72 = math.absf %71 : vector<8x64xf32>
    %cst_30 = arith.constant 1.000000e+00 : f32
    %73 = vector.broadcast %cst_30 : f32 to vector<8x64xf32>
    %74 = arith.subf %73, %72 : vector<8x64xf32>
    %cst_31 = arith.constant 0.000000e+00 : f32
    %75 = vector.broadcast %cst_31 : f32 to vector<8x64xf32>
    %76 = arith.maximumf %75, %74 : vector<8x64xf32>
    %77 = vector.extract_strided_slice %38 {offsets = [0, 192], sizes = [8, 64], strides = [1, 1]} : vector<8x320xf32> to vector<8x64xf32>
    %78 = arith.mulf %76, %77 : vector<8x64xf32>
    %79 = arith.addf %69, %78 : vector<8x64xf32>
    %cst_32 = arith.constant 2.000000e+00 : f32
    %80 = vector.broadcast %cst_32 : f32 to vector<8x64xf32>
    %81 = arith.subf %35, %80 : vector<8x64xf32>
    %82 = math.absf %81 : vector<8x64xf32>
    %cst_33 = arith.constant 1.000000e+00 : f32
    %83 = vector.broadcast %cst_33 : f32 to vector<8x64xf32>
    %84 = arith.subf %83, %82 : vector<8x64xf32>
    %cst_34 = arith.constant 0.000000e+00 : f32
    %85 = vector.broadcast %cst_34 : f32 to vector<8x64xf32>
    %86 = arith.maximumf %85, %84 : vector<8x64xf32>
    %87 = vector.extract_strided_slice %38 {offsets = [0, 256], sizes = [8, 64], strides = [1, 1]} : vector<8x320xf32> to vector<8x64xf32>
    %88 = arith.mulf %86, %87 : vector<8x64xf32>
    %89 = arith.addf %79, %88 : vector<8x64xf32>
    %90 = vector.extract_strided_slice %89 {offsets = [0, 0], sizes = [8, 8], strides = [1, 1]} : vector<8x64xf32> to vector<8x8xf32>
    %91 = vector.extract_strided_slice %89 {offsets = [0, 8], sizes = [8, 8], strides = [1, 1]} : vector<8x64xf32> to vector<8x8xf32>
    %92 = vector.extract_strided_slice %89 {offsets = [0, 16], sizes = [8, 8], strides = [1, 1]} : vector<8x64xf32> to vector<8x8xf32>
    %93 = vector.extract_strided_slice %89 {offsets = [0, 24], sizes = [8, 8], strides = [1, 1]} : vector<8x64xf32> to vector<8x8xf32>
    %94 = vector.extract_strided_slice %89 {offsets = [0, 32], sizes = [8, 8], strides = [1, 1]} : vector<8x64xf32> to vector<8x8xf32>
    %95 = vector.extract_strided_slice %89 {offsets = [0, 40], sizes = [8, 8], strides = [1, 1]} : vector<8x64xf32> to vector<8x8xf32>
    %96 = vector.extract_strided_slice %89 {offsets = [0, 48], sizes = [8, 8], strides = [1, 1]} : vector<8x64xf32> to vector<8x8xf32>
    %97 = vector.extract_strided_slice %89 {offsets = [0, 56], sizes = [8, 8], strides = [1, 1]} : vector<8x64xf32> to vector<8x8xf32>
    %98 = tpu.concatenate %90, %91, %92, %93, %94, %95, %96, %97 in 0 : vector<8x8xf32>, vector<8x8xf32>, vector<8x8xf32>, vector<8x8xf32>, vector<8x8xf32>, vector<8x8xf32>, vector<8x8xf32>, vector<8x8xf32> -> vector<64x8xf32>
    %c0_35 = arith.constant 0 : index
    %c0_36 = arith.constant 0 : index
    %99 = vector.load %arg8[%c0_35, %c0_36] : memref<8x32xf32, #tpu.memory_space<vmem>>, vector<8x32xf32>
    %cst_37 = arith.constant dense<0.000000e+00> : vector<64x32xf32>
    %100 = tpu.matmul %98, %99, %cst_37 {dimension_numbers = #tpu.dot_dimension_numbers<[1], [0], [0], [1], [0, 0, 1, 1], [], []>} : vector<64x8xf32>, vector<8x32xf32>, vector<64x32xf32> -> vector<64x32xf32>
    %c0_38 = arith.constant 0 : index
    %c0_39 = arith.constant 0 : index
    %101 = vector.load %arg9[%c0_38, %c0_39] : memref<1x32xf32, #tpu.memory_space<vmem>>, vector<1x32xf32>
    %102 = vector.broadcast %101 : vector<1x32xf32> to vector<64x32xf32>
    %103 = arith.addf %100, %102 : vector<64x32xf32>
    %c0_40 = arith.constant 0 : index
    %c0_41 = arith.constant 0 : index
    %104 = vector.load %arg12[%c0_40, %c0_41] : memref<7x32xf32, #tpu.memory_space<vmem>>, vector<7x32xf32>
    %cst_42 = arith.constant 0.000000e+00 : f32
    %105 = vector.broadcast %cst_42 : f32 to vector<24x32xf32>
    %106 = tpu.concatenate %105, %103, %105 in 0 : vector<24x32xf32>, vector<64x32xf32>, vector<24x32xf32> -> vector<112x32xf32>
    %107 = vector.extract_strided_slice %106 {offsets = [0, 0], sizes = [64, 32], strides = [1, 1]} : vector<112x32xf32> to vector<64x32xf32>
    %108 = vector.extract_strided_slice %104 {offsets = [0, 0], sizes = [1, 32], strides = [1, 1]} : vector<7x32xf32> to vector<1x32xf32>
    %109 = vector.broadcast %108 : vector<1x32xf32> to vector<64x32xf32>
    %110 = arith.mulf %107, %109 : vector<64x32xf32>
    %111 = vector.extract_strided_slice %106 {offsets = [8, 0], sizes = [64, 32], strides = [1, 1]} : vector<112x32xf32> to vector<64x32xf32>
    %112 = vector.extract_strided_slice %104 {offsets = [1, 0], sizes = [1, 32], strides = [1, 1]} : vector<7x32xf32> to vector<1x32xf32>
    %113 = vector.broadcast %112 : vector<1x32xf32> to vector<64x32xf32>
    %114 = arith.mulf %111, %113 : vector<64x32xf32>
    %115 = arith.addf %110, %114 : vector<64x32xf32>
    %116 = vector.extract_strided_slice %106 {offsets = [16, 0], sizes = [64, 32], strides = [1, 1]} : vector<112x32xf32> to vector<64x32xf32>
    %117 = vector.extract_strided_slice %104 {offsets = [2, 0], sizes = [1, 32], strides = [1, 1]} : vector<7x32xf32> to vector<1x32xf32>
    %118 = vector.broadcast %117 : vector<1x32xf32> to vector<64x32xf32>
    %119 = arith.mulf %116, %118 : vector<64x32xf32>
    %120 = arith.addf %115, %119 : vector<64x32xf32>
    %121 = vector.extract_strided_slice %106 {offsets = [24, 0], sizes = [64, 32], strides = [1, 1]} : vector<112x32xf32> to vector<64x32xf32>
    %122 = vector.extract_strided_slice %104 {offsets = [3, 0], sizes = [1, 32], strides = [1, 1]} : vector<7x32xf32> to vector<1x32xf32>
    %123 = vector.broadcast %122 : vector<1x32xf32> to vector<64x32xf32>
    %124 = arith.mulf %121, %123 : vector<64x32xf32>
    %125 = arith.addf %120, %124 : vector<64x32xf32>
    %126 = vector.extract_strided_slice %106 {offsets = [32, 0], sizes = [64, 32], strides = [1, 1]} : vector<112x32xf32> to vector<64x32xf32>
    %127 = vector.extract_strided_slice %104 {offsets = [4, 0], sizes = [1, 32], strides = [1, 1]} : vector<7x32xf32> to vector<1x32xf32>
    %128 = vector.broadcast %127 : vector<1x32xf32> to vector<64x32xf32>
    %129 = arith.mulf %126, %128 : vector<64x32xf32>
    %130 = arith.addf %125, %129 : vector<64x32xf32>
    %131 = vector.extract_strided_slice %106 {offsets = [40, 0], sizes = [64, 32], strides = [1, 1]} : vector<112x32xf32> to vector<64x32xf32>
    %132 = vector.extract_strided_slice %104 {offsets = [5, 0], sizes = [1, 32], strides = [1, 1]} : vector<7x32xf32> to vector<1x32xf32>
    %133 = vector.broadcast %132 : vector<1x32xf32> to vector<64x32xf32>
    %134 = arith.mulf %131, %133 : vector<64x32xf32>
    %135 = arith.addf %130, %134 : vector<64x32xf32>
    %136 = vector.extract_strided_slice %106 {offsets = [48, 0], sizes = [64, 32], strides = [1, 1]} : vector<112x32xf32> to vector<64x32xf32>
    %137 = vector.extract_strided_slice %104 {offsets = [6, 0], sizes = [1, 32], strides = [1, 1]} : vector<7x32xf32> to vector<1x32xf32>
    %138 = vector.broadcast %137 : vector<1x32xf32> to vector<64x32xf32>
    %139 = arith.mulf %136, %138 : vector<64x32xf32>
    %140 = arith.addf %135, %139 : vector<64x32xf32>
    %c0_43 = arith.constant 0 : index
    %c0_44 = arith.constant 0 : index
    %141 = vector.load %arg13[%c0_43, %c0_44] : memref<1x32xf32, #tpu.memory_space<vmem>>, vector<1x32xf32>
    %142 = vector.broadcast %141 : vector<1x32xf32> to vector<64x32xf32>
    %143 = arith.addf %140, %142 : vector<64x32xf32>
    %c0_45 = arith.constant 0 : index
    %c0_46 = arith.constant 0 : index
    %144 = vector.load %arg14[%c0_45, %c0_46] : memref<1x1xf32, #tpu.memory_space<vmem>>, vector<1x1xf32>
    %cst_47 = arith.constant 5.000000e-01 : f32
    %145 = vector.broadcast %cst_47 : f32 to vector<64x32xf32>
    %146 = arith.mulf %145, %143 : vector<64x32xf32>
    %cst_48 = arith.constant 4.471500e-02 : f32
    %147 = vector.broadcast %cst_48 : f32 to vector<64x32xf32>
    %148 = arith.mulf %147, %143 : vector<64x32xf32>
    %149 = arith.mulf %148, %143 : vector<64x32xf32>
    %150 = arith.mulf %149, %143 : vector<64x32xf32>
    %151 = arith.addf %143, %150 : vector<64x32xf32>
    %cst_49 = arith.constant 0.797884583 : f32
    %152 = vector.broadcast %cst_49 : f32 to vector<64x32xf32>
    %153 = arith.mulf %152, %151 : vector<64x32xf32>
    %154 = math.tanh %153 : vector<64x32xf32>
    %cst_50 = arith.constant 1.000000e+00 : f32
    %155 = vector.broadcast %cst_50 : f32 to vector<64x32xf32>
    %156 = arith.addf %155, %154 : vector<64x32xf32>
    %157 = arith.mulf %146, %156 : vector<64x32xf32>
    %158 = vector.broadcast %144 : vector<1x1xf32> to vector<64x32xf32>
    %159 = arith.mulf %158, %157 : vector<64x32xf32>
    %160 = arith.addf %103, %159 : vector<64x32xf32>
    %c0_51 = arith.constant 0 : index
    %c0_52 = arith.constant 0 : index
    %161 = vector.load %arg15[%c0_51, %c0_52] : memref<1x32xf32, #tpu.memory_space<vmem>>, vector<1x32xf32>
    %c0_53 = arith.constant 0 : index
    %c0_54 = arith.constant 0 : index
    %162 = vector.load %arg16[%c0_53, %c0_54] : memref<1x32xf32, #tpu.memory_space<vmem>>, vector<1x32xf32>
    %cst_55 = arith.constant dense<0.000000e+00> : vector<32xf32>
    %163 = vector.multi_reduction <add>, %160, %cst_55 [0] : vector<64x32xf32> to vector<32xf32>
    %164 = vector.shape_cast %163 : vector<32xf32> to vector<1x32xf32>
    %cst_56 = arith.constant 6.400000e+01 : f32
    %165 = vector.broadcast %cst_56 : f32 to vector<1x32xf32>
    %166 = arith.divf %164, %165 : vector<1x32xf32>
    %167 = arith.mulf %160, %160 : vector<64x32xf32>
    %cst_57 = arith.constant dense<0.000000e+00> : vector<32xf32>
    %168 = vector.multi_reduction <add>, %167, %cst_57 [0] : vector<64x32xf32> to vector<32xf32>
    %169 = vector.shape_cast %168 : vector<32xf32> to vector<1x32xf32>
    %cst_58 = arith.constant 6.400000e+01 : f32
    %170 = vector.broadcast %cst_58 : f32 to vector<1x32xf32>
    %171 = arith.divf %169, %170 : vector<1x32xf32>
    %172 = arith.mulf %166, %166 : vector<1x32xf32>
    %173 = arith.subf %171, %172 : vector<1x32xf32>
    %174 = vector.broadcast %166 : vector<1x32xf32> to vector<64x32xf32>
    %175 = arith.subf %160, %174 : vector<64x32xf32>
    %cst_59 = arith.constant 9.99999974E-6 : f32
    %176 = vector.broadcast %cst_59 : f32 to vector<1x32xf32>
    %177 = arith.addf %173, %176 : vector<1x32xf32>
    %178 = math.rsqrt %177 : vector<1x32xf32>
    %179 = vector.broadcast %178 : vector<1x32xf32> to vector<64x32xf32>
    %180 = arith.mulf %175, %179 : vector<64x32xf32>
    %181 = vector.broadcast %161 : vector<1x32xf32> to vector<64x32xf32>
    %182 = arith.mulf %180, %181 : vector<64x32xf32>
    %183 = vector.broadcast %162 : vector<1x32xf32> to vector<64x32xf32>
    %184 = arith.addf %182, %183 : vector<64x32xf32>
    %c0_60 = arith.constant 0 : index
    %c0_61 = arith.constant 0 : index
    %185 = vector.load %arg17[%c0_60, %c0_61] : memref<32x64xbf16, #tpu.memory_space<vmem>>, vector<32x64xbf16>
    %186 = arith.extf %185 : vector<32x64xbf16> to vector<32x64xf32>
    %c0_62 = arith.constant 0 : index
    %c0_63 = arith.constant 0 : index
    %187 = vector.load %arg21[%c0_62, %c0_63] : memref<64x32xbf16, #tpu.memory_space<vmem>>, vector<64x32xbf16>
    %188 = arith.extf %187 : vector<64x32xbf16> to vector<64x32xf32>
    %cst_64 = arith.constant dense<0.000000e+00> : vector<64x64xf32>
    %189 = tpu.matmul %184, %186, %cst_64 {dimension_numbers = #tpu.dot_dimension_numbers<[1], [0], [0], [1], [0, 0, 1, 1], [], []>} : vector<64x32xf32>, vector<32x64xf32>, vector<64x64xf32> -> vector<64x64xf32>
    %c0_65 = arith.constant 0 : index
    %c0_66 = arith.constant 0 : index
    %190 = vector.load %arg18[%c0_65, %c0_66] : memref<1x64xf32, #tpu.memory_space<vmem>>, vector<1x64xf32>
    %191 = vector.broadcast %190 : vector<1x64xf32> to vector<64x64xf32>
    %192 = arith.addf %189, %191 : vector<64x64xf32>
    %cst_67 = arith.constant 5.000000e-01 : f32
    %193 = vector.broadcast %cst_67 : f32 to vector<64x64xf32>
    %194 = arith.mulf %193, %192 : vector<64x64xf32>
    %cst_68 = arith.constant 4.471500e-02 : f32
    %195 = vector.broadcast %cst_68 : f32 to vector<64x64xf32>
    %196 = arith.mulf %195, %192 : vector<64x64xf32>
    %197 = arith.mulf %196, %192 : vector<64x64xf32>
    %198 = arith.mulf %197, %192 : vector<64x64xf32>
    %199 = arith.addf %192, %198 : vector<64x64xf32>
    %cst_69 = arith.constant 0.797884583 : f32
    %200 = vector.broadcast %cst_69 : f32 to vector<64x64xf32>
    %201 = arith.mulf %200, %199 : vector<64x64xf32>
    %202 = math.tanh %201 : vector<64x64xf32>
    %cst_70 = arith.constant 1.000000e+00 : f32
    %203 = vector.broadcast %cst_70 : f32 to vector<64x64xf32>
    %204 = arith.addf %203, %202 : vector<64x64xf32>
    %205 = arith.mulf %194, %204 : vector<64x64xf32>
    %c0_71 = arith.constant 0 : index
    %c0_72 = arith.constant 0 : index
    %206 = vector.load %arg19[%c0_71, %c0_72] : memref<1x64xf32, #tpu.memory_space<vmem>>, vector<1x64xf32>
    %c0_73 = arith.constant 0 : index
    %c0_74 = arith.constant 0 : index
    %207 = vector.load %arg20[%c0_73, %c0_74] : memref<1x64xf32, #tpu.memory_space<vmem>>, vector<1x64xf32>
    %cst_75 = arith.constant dense<0.000000e+00> : vector<64xf32>
    %208 = vector.multi_reduction <add>, %205, %cst_75 [0] : vector<64x64xf32> to vector<64xf32>
    %209 = vector.shape_cast %208 : vector<64xf32> to vector<1x64xf32>
    %cst_76 = arith.constant 6.400000e+01 : f32
    %210 = vector.broadcast %cst_76 : f32 to vector<1x64xf32>
    %211 = arith.divf %209, %210 : vector<1x64xf32>
    %212 = arith.mulf %205, %205 : vector<64x64xf32>
    %cst_77 = arith.constant dense<0.000000e+00> : vector<64xf32>
    %213 = vector.multi_reduction <add>, %212, %cst_77 [0] : vector<64x64xf32> to vector<64xf32>
    %214 = vector.shape_cast %213 : vector<64xf32> to vector<1x64xf32>
    %cst_78 = arith.constant 6.400000e+01 : f32
    %215 = vector.broadcast %cst_78 : f32 to vector<1x64xf32>
    %216 = arith.divf %214, %215 : vector<1x64xf32>
    %217 = arith.mulf %211, %211 : vector<1x64xf32>
    %218 = arith.subf %216, %217 : vector<1x64xf32>
    %219 = vector.broadcast %211 : vector<1x64xf32> to vector<64x64xf32>
    %220 = arith.subf %205, %219 : vector<64x64xf32>
    %cst_79 = arith.constant 9.99999974E-6 : f32
    %221 = vector.broadcast %cst_79 : f32 to vector<1x64xf32>
    %222 = arith.addf %218, %221 : vector<1x64xf32>
    %223 = math.rsqrt %222 : vector<1x64xf32>
    %224 = vector.broadcast %223 : vector<1x64xf32> to vector<64x64xf32>
    %225 = arith.mulf %220, %224 : vector<64x64xf32>
    %226 = vector.broadcast %206 : vector<1x64xf32> to vector<64x64xf32>
    %227 = arith.mulf %225, %226 : vector<64x64xf32>
    %228 = vector.broadcast %207 : vector<1x64xf32> to vector<64x64xf32>
    %229 = arith.addf %227, %228 : vector<64x64xf32>
    %cst_80 = arith.constant dense<0.000000e+00> : vector<64x32xf32>
    %230 = tpu.matmul %229, %188, %cst_80 {dimension_numbers = #tpu.dot_dimension_numbers<[1], [0], [0], [1], [0, 0, 1, 1], [], []>} : vector<64x64xf32>, vector<64x32xf32>, vector<64x32xf32> -> vector<64x32xf32>
    %c0_81 = arith.constant 0 : index
    %c0_82 = arith.constant 0 : index
    %231 = vector.load %arg22[%c0_81, %c0_82] : memref<1x32xf32, #tpu.memory_space<vmem>>, vector<1x32xf32>
    %232 = vector.broadcast %231 : vector<1x32xf32> to vector<64x32xf32>
    %233 = arith.addf %230, %232 : vector<64x32xf32>
    %cst_83 = arith.constant 5.000000e-01 : f32
    %234 = vector.broadcast %cst_83 : f32 to vector<64x32xf32>
    %235 = arith.mulf %234, %233 : vector<64x32xf32>
    %cst_84 = arith.constant 4.471500e-02 : f32
    %236 = vector.broadcast %cst_84 : f32 to vector<64x32xf32>
    %237 = arith.mulf %236, %233 : vector<64x32xf32>
    %238 = arith.mulf %237, %233 : vector<64x32xf32>
    %239 = arith.mulf %238, %233 : vector<64x32xf32>
    %240 = arith.addf %233, %239 : vector<64x32xf32>
    %cst_85 = arith.constant 0.797884583 : f32
    %241 = vector.broadcast %cst_85 : f32 to vector<64x32xf32>
    %242 = arith.mulf %241, %240 : vector<64x32xf32>
    %243 = math.tanh %242 : vector<64x32xf32>
    %cst_86 = arith.constant 1.000000e+00 : f32
    %244 = vector.broadcast %cst_86 : f32 to vector<64x32xf32>
    %245 = arith.addf %244, %243 : vector<64x32xf32>
    %246 = arith.mulf %235, %245 : vector<64x32xf32>
    %c0_87 = arith.constant 0 : index
    %c0_88 = arith.constant 0 : index
    %247 = vector.load %arg23[%c0_87, %c0_88] : memref<1x1xf32, #tpu.memory_space<vmem>>, vector<1x1xf32>
    %248 = vector.broadcast %247 : vector<1x1xf32> to vector<64x32xf32>
    %249 = arith.mulf %248, %246 : vector<64x32xf32>
    %250 = arith.addf %184, %249 : vector<64x32xf32>
    %c0_89 = arith.constant 0 : index
    %c0_90 = arith.constant 0 : index
    %251 = vector.load %arg24[%c0_89, %c0_90] : memref<1x32xf32, #tpu.memory_space<vmem>>, vector<1x32xf32>
    %c0_91 = arith.constant 0 : index
    %c0_92 = arith.constant 0 : index
    %252 = vector.load %arg25[%c0_91, %c0_92] : memref<1x32xf32, #tpu.memory_space<vmem>>, vector<1x32xf32>
    %cst_93 = arith.constant dense<0.000000e+00> : vector<32xf32>
    %253 = vector.multi_reduction <add>, %250, %cst_93 [0] : vector<64x32xf32> to vector<32xf32>
    %254 = vector.shape_cast %253 : vector<32xf32> to vector<1x32xf32>
    %cst_94 = arith.constant 6.400000e+01 : f32
    %255 = vector.broadcast %cst_94 : f32 to vector<1x32xf32>
    %256 = arith.divf %254, %255 : vector<1x32xf32>
    %257 = arith.mulf %250, %250 : vector<64x32xf32>
    %cst_95 = arith.constant dense<0.000000e+00> : vector<32xf32>
    %258 = vector.multi_reduction <add>, %257, %cst_95 [0] : vector<64x32xf32> to vector<32xf32>
    %259 = vector.shape_cast %258 : vector<32xf32> to vector<1x32xf32>
    %cst_96 = arith.constant 6.400000e+01 : f32
    %260 = vector.broadcast %cst_96 : f32 to vector<1x32xf32>
    %261 = arith.divf %259, %260 : vector<1x32xf32>
    %262 = arith.mulf %256, %256 : vector<1x32xf32>
    %263 = arith.subf %261, %262 : vector<1x32xf32>
    %264 = vector.broadcast %256 : vector<1x32xf32> to vector<64x32xf32>
    %265 = arith.subf %250, %264 : vector<64x32xf32>
    %cst_97 = arith.constant 9.99999974E-6 : f32
    %266 = vector.broadcast %cst_97 : f32 to vector<1x32xf32>
    %267 = arith.addf %263, %266 : vector<1x32xf32>
    %268 = math.rsqrt %267 : vector<1x32xf32>
    %269 = vector.broadcast %268 : vector<1x32xf32> to vector<64x32xf32>
    %270 = arith.mulf %265, %269 : vector<64x32xf32>
    %271 = vector.broadcast %251 : vector<1x32xf32> to vector<64x32xf32>
    %272 = arith.mulf %270, %271 : vector<64x32xf32>
    %273 = vector.broadcast %252 : vector<1x32xf32> to vector<64x32xf32>
    %274 = arith.addf %272, %273 : vector<64x32xf32>
    %c0_98 = arith.constant 0 : index
    %c0_99 = arith.constant 0 : index
    %275 = vector.load %arg26[%c0_98, %c0_99] : memref<13x32xf32, #tpu.memory_space<vmem>>, vector<13x32xf32>
    %cst_100 = arith.constant 0.000000e+00 : f32
    %276 = vector.broadcast %cst_100 : f32 to vector<48x32xf32>
    %277 = tpu.concatenate %276, %274, %276 in 0 : vector<48x32xf32>, vector<64x32xf32>, vector<48x32xf32> -> vector<160x32xf32>
    %278 = vector.extract_strided_slice %277 {offsets = [0, 0], sizes = [64, 32], strides = [1, 1]} : vector<160x32xf32> to vector<64x32xf32>
    %279 = vector.extract_strided_slice %275 {offsets = [0, 0], sizes = [1, 32], strides = [1, 1]} : vector<13x32xf32> to vector<1x32xf32>
    %280 = vector.broadcast %279 : vector<1x32xf32> to vector<64x32xf32>
    %281 = arith.mulf %278, %280 : vector<64x32xf32>
    %282 = vector.extract_strided_slice %277 {offsets = [8, 0], sizes = [64, 32], strides = [1, 1]} : vector<160x32xf32> to vector<64x32xf32>
    %283 = vector.extract_strided_slice %275 {offsets = [1, 0], sizes = [1, 32], strides = [1, 1]} : vector<13x32xf32> to vector<1x32xf32>
    %284 = vector.broadcast %283 : vector<1x32xf32> to vector<64x32xf32>
    %285 = arith.mulf %282, %284 : vector<64x32xf32>
    %286 = arith.addf %281, %285 : vector<64x32xf32>
    %287 = vector.extract_strided_slice %277 {offsets = [16, 0], sizes = [64, 32], strides = [1, 1]} : vector<160x32xf32> to vector<64x32xf32>
    %288 = vector.extract_strided_slice %275 {offsets = [2, 0], sizes = [1, 32], strides = [1, 1]} : vector<13x32xf32> to vector<1x32xf32>
    %289 = vector.broadcast %288 : vector<1x32xf32> to vector<64x32xf32>
    %290 = arith.mulf %287, %289 : vector<64x32xf32>
    %291 = arith.addf %286, %290 : vector<64x32xf32>
    %292 = vector.extract_strided_slice %277 {offsets = [24, 0], sizes = [64, 32], strides = [1, 1]} : vector<160x32xf32> to vector<64x32xf32>
    %293 = vector.extract_strided_slice %275 {offsets = [3, 0], sizes = [1, 32], strides = [1, 1]} : vector<13x32xf32> to vector<1x32xf32>
    %294 = vector.broadcast %293 : vector<1x32xf32> to vector<64x32xf32>
    %295 = arith.mulf %292, %294 : vector<64x32xf32>
    %296 = arith.addf %291, %295 : vector<64x32xf32>
    %297 = vector.extract_strided_slice %277 {offsets = [32, 0], sizes = [64, 32], strides = [1, 1]} : vector<160x32xf32> to vector<64x32xf32>
    %298 = vector.extract_strided_slice %275 {offsets = [4, 0], sizes = [1, 32], strides = [1, 1]} : vector<13x32xf32> to vector<1x32xf32>
    %299 = vector.broadcast %298 : vector<1x32xf32> to vector<64x32xf32>
    %300 = arith.mulf %297, %299 : vector<64x32xf32>
    %301 = arith.addf %296, %300 : vector<64x32xf32>
    %302 = vector.extract_strided_slice %277 {offsets = [40, 0], sizes = [64, 32], strides = [1, 1]} : vector<160x32xf32> to vector<64x32xf32>
    %303 = vector.extract_strided_slice %275 {offsets = [5, 0], sizes = [1, 32], strides = [1, 1]} : vector<13x32xf32> to vector<1x32xf32>
    %304 = vector.broadcast %303 : vector<1x32xf32> to vector<64x32xf32>
    %305 = arith.mulf %302, %304 : vector<64x32xf32>
    %306 = arith.addf %301, %305 : vector<64x32xf32>
    %307 = vector.extract_strided_slice %277 {offsets = [48, 0], sizes = [64, 32], strides = [1, 1]} : vector<160x32xf32> to vector<64x32xf32>
    %308 = vector.extract_strided_slice %275 {offsets = [6, 0], sizes = [1, 32], strides = [1, 1]} : vector<13x32xf32> to vector<1x32xf32>
    %309 = vector.broadcast %308 : vector<1x32xf32> to vector<64x32xf32>
    %310 = arith.mulf %307, %309 : vector<64x32xf32>
    %311 = arith.addf %306, %310 : vector<64x32xf32>
    %312 = vector.extract_strided_slice %277 {offsets = [56, 0], sizes = [64, 32], strides = [1, 1]} : vector<160x32xf32> to vector<64x32xf32>
    %313 = vector.extract_strided_slice %275 {offsets = [7, 0], sizes = [1, 32], strides = [1, 1]} : vector<13x32xf32> to vector<1x32xf32>
    %314 = vector.broadcast %313 : vector<1x32xf32> to vector<64x32xf32>
    %315 = arith.mulf %312, %314 : vector<64x32xf32>
    %316 = arith.addf %311, %315 : vector<64x32xf32>
    %317 = vector.extract_strided_slice %277 {offsets = [64, 0], sizes = [64, 32], strides = [1, 1]} : vector<160x32xf32> to vector<64x32xf32>
    %318 = vector.extract_strided_slice %275 {offsets = [8, 0], sizes = [1, 32], strides = [1, 1]} : vector<13x32xf32> to vector<1x32xf32>
    %319 = vector.broadcast %318 : vector<1x32xf32> to vector<64x32xf32>
    %320 = arith.mulf %317, %319 : vector<64x32xf32>
    %321 = arith.addf %316, %320 : vector<64x32xf32>
    %322 = vector.extract_strided_slice %277 {offsets = [72, 0], sizes = [64, 32], strides = [1, 1]} : vector<160x32xf32> to vector<64x32xf32>
    %323 = vector.extract_strided_slice %275 {offsets = [9, 0], sizes = [1, 32], strides = [1, 1]} : vector<13x32xf32> to vector<1x32xf32>
    %324 = vector.broadcast %323 : vector<1x32xf32> to vector<64x32xf32>
    %325 = arith.mulf %322, %324 : vector<64x32xf32>
    %326 = arith.addf %321, %325 : vector<64x32xf32>
    %327 = vector.extract_strided_slice %277 {offsets = [80, 0], sizes = [64, 32], strides = [1, 1]} : vector<160x32xf32> to vector<64x32xf32>
    %328 = vector.extract_strided_slice %275 {offsets = [10, 0], sizes = [1, 32], strides = [1, 1]} : vector<13x32xf32> to vector<1x32xf32>
    %329 = vector.broadcast %328 : vector<1x32xf32> to vector<64x32xf32>
    %330 = arith.mulf %327, %329 : vector<64x32xf32>
    %331 = arith.addf %326, %330 : vector<64x32xf32>
    %332 = vector.extract_strided_slice %277 {offsets = [88, 0], sizes = [64, 32], strides = [1, 1]} : vector<160x32xf32> to vector<64x32xf32>
    %333 = vector.extract_strided_slice %275 {offsets = [11, 0], sizes = [1, 32], strides = [1, 1]} : vector<13x32xf32> to vector<1x32xf32>
    %334 = vector.broadcast %333 : vector<1x32xf32> to vector<64x32xf32>
    %335 = arith.mulf %332, %334 : vector<64x32xf32>
    %336 = arith.addf %331, %335 : vector<64x32xf32>
    %337 = vector.extract_strided_slice %277 {offsets = [96, 0], sizes = [64, 32], strides = [1, 1]} : vector<160x32xf32> to vector<64x32xf32>
    %338 = vector.extract_strided_slice %275 {offsets = [12, 0], sizes = [1, 32], strides = [1, 1]} : vector<13x32xf32> to vector<1x32xf32>
    %339 = vector.broadcast %338 : vector<1x32xf32> to vector<64x32xf32>
    %340 = arith.mulf %337, %339 : vector<64x32xf32>
    %341 = arith.addf %336, %340 : vector<64x32xf32>
    %c0_101 = arith.constant 0 : index
    %c0_102 = arith.constant 0 : index
    %342 = vector.load %arg27[%c0_101, %c0_102] : memref<1x32xf32, #tpu.memory_space<vmem>>, vector<1x32xf32>
    %343 = vector.broadcast %342 : vector<1x32xf32> to vector<64x32xf32>
    %344 = arith.addf %341, %343 : vector<64x32xf32>
    %c0_103 = arith.constant 0 : index
    %c0_104 = arith.constant 0 : index
    %345 = vector.load %arg28[%c0_103, %c0_104] : memref<1x1xf32, #tpu.memory_space<vmem>>, vector<1x1xf32>
    %cst_105 = arith.constant 5.000000e-01 : f32
    %346 = vector.broadcast %cst_105 : f32 to vector<64x32xf32>
    %347 = arith.mulf %346, %344 : vector<64x32xf32>
    %cst_106 = arith.constant 4.471500e-02 : f32
    %348 = vector.broadcast %cst_106 : f32 to vector<64x32xf32>
    %349 = arith.mulf %348, %344 : vector<64x32xf32>
    %350 = arith.mulf %349, %344 : vector<64x32xf32>
    %351 = arith.mulf %350, %344 : vector<64x32xf32>
    %352 = arith.addf %344, %351 : vector<64x32xf32>
    %cst_107 = arith.constant 0.797884583 : f32
    %353 = vector.broadcast %cst_107 : f32 to vector<64x32xf32>
    %354 = arith.mulf %353, %352 : vector<64x32xf32>
    %355 = math.tanh %354 : vector<64x32xf32>
    %cst_108 = arith.constant 1.000000e+00 : f32
    %356 = vector.broadcast %cst_108 : f32 to vector<64x32xf32>
    %357 = arith.addf %356, %355 : vector<64x32xf32>
    %358 = arith.mulf %347, %357 : vector<64x32xf32>
    %359 = vector.broadcast %345 : vector<1x1xf32> to vector<64x32xf32>
    %360 = arith.mulf %359, %358 : vector<64x32xf32>
    %361 = arith.addf %274, %360 : vector<64x32xf32>
    %c0_109 = arith.constant 0 : index
    %c0_110 = arith.constant 0 : index
    %362 = vector.load %arg29[%c0_109, %c0_110] : memref<1x32xf32, #tpu.memory_space<vmem>>, vector<1x32xf32>
    %c0_111 = arith.constant 0 : index
    %c0_112 = arith.constant 0 : index
    %363 = vector.load %arg30[%c0_111, %c0_112] : memref<1x32xf32, #tpu.memory_space<vmem>>, vector<1x32xf32>
    %cst_113 = arith.constant dense<0.000000e+00> : vector<32xf32>
    %364 = vector.multi_reduction <add>, %361, %cst_113 [0] : vector<64x32xf32> to vector<32xf32>
    %365 = vector.shape_cast %364 : vector<32xf32> to vector<1x32xf32>
    %cst_114 = arith.constant 6.400000e+01 : f32
    %366 = vector.broadcast %cst_114 : f32 to vector<1x32xf32>
    %367 = arith.divf %365, %366 : vector<1x32xf32>
    %368 = arith.mulf %361, %361 : vector<64x32xf32>
    %cst_115 = arith.constant dense<0.000000e+00> : vector<32xf32>
    %369 = vector.multi_reduction <add>, %368, %cst_115 [0] : vector<64x32xf32> to vector<32xf32>
    %370 = vector.shape_cast %369 : vector<32xf32> to vector<1x32xf32>
    %cst_116 = arith.constant 6.400000e+01 : f32
    %371 = vector.broadcast %cst_116 : f32 to vector<1x32xf32>
    %372 = arith.divf %370, %371 : vector<1x32xf32>
    %373 = arith.mulf %367, %367 : vector<1x32xf32>
    %374 = arith.subf %372, %373 : vector<1x32xf32>
    %375 = vector.broadcast %367 : vector<1x32xf32> to vector<64x32xf32>
    %376 = arith.subf %361, %375 : vector<64x32xf32>
    %cst_117 = arith.constant 9.99999974E-6 : f32
    %377 = vector.broadcast %cst_117 : f32 to vector<1x32xf32>
    %378 = arith.addf %374, %377 : vector<1x32xf32>
    %379 = math.rsqrt %378 : vector<1x32xf32>
    %380 = vector.broadcast %379 : vector<1x32xf32> to vector<64x32xf32>
    %381 = arith.mulf %376, %380 : vector<64x32xf32>
    %382 = vector.broadcast %362 : vector<1x32xf32> to vector<64x32xf32>
    %383 = arith.mulf %381, %382 : vector<64x32xf32>
    %384 = vector.broadcast %363 : vector<1x32xf32> to vector<64x32xf32>
    %385 = arith.addf %383, %384 : vector<64x32xf32>
    %c0_118 = arith.constant 0 : index
    %c0_119 = arith.constant 0 : index
    %386 = vector.load %arg31[%c0_118, %c0_119] : memref<32x64xbf16, #tpu.memory_space<vmem>>, vector<32x64xbf16>
    %387 = arith.extf %386 : vector<32x64xbf16> to vector<32x64xf32>
    %c0_120 = arith.constant 0 : index
    %c0_121 = arith.constant 0 : index
    %388 = vector.load %arg35[%c0_120, %c0_121] : memref<64x32xbf16, #tpu.memory_space<vmem>>, vector<64x32xbf16>
    %389 = arith.extf %388 : vector<64x32xbf16> to vector<64x32xf32>
    %cst_122 = arith.constant dense<0.000000e+00> : vector<64x64xf32>
    %390 = tpu.matmul %385, %387, %cst_122 {dimension_numbers = #tpu.dot_dimension_numbers<[1], [0], [0], [1], [0, 0, 1, 1], [], []>} : vector<64x32xf32>, vector<32x64xf32>, vector<64x64xf32> -> vector<64x64xf32>
    %c0_123 = arith.constant 0 : index
    %c0_124 = arith.constant 0 : index
    %391 = vector.load %arg32[%c0_123, %c0_124] : memref<1x64xf32, #tpu.memory_space<vmem>>, vector<1x64xf32>
    %392 = vector.broadcast %391 : vector<1x64xf32> to vector<64x64xf32>
    %393 = arith.addf %390, %392 : vector<64x64xf32>
    %cst_125 = arith.constant 5.000000e-01 : f32
    %394 = vector.broadcast %cst_125 : f32 to vector<64x64xf32>
    %395 = arith.mulf %394, %393 : vector<64x64xf32>
    %cst_126 = arith.constant 4.471500e-02 : f32
    %396 = vector.broadcast %cst_126 : f32 to vector<64x64xf32>
    %397 = arith.mulf %396, %393 : vector<64x64xf32>
    %398 = arith.mulf %397, %393 : vector<64x64xf32>
    %399 = arith.mulf %398, %393 : vector<64x64xf32>
    %400 = arith.addf %393, %399 : vector<64x64xf32>
    %cst_127 = arith.constant 0.797884583 : f32
    %401 = vector.broadcast %cst_127 : f32 to vector<64x64xf32>
    %402 = arith.mulf %401, %400 : vector<64x64xf32>
    %403 = math.tanh %402 : vector<64x64xf32>
    %cst_128 = arith.constant 1.000000e+00 : f32
    %404 = vector.broadcast %cst_128 : f32 to vector<64x64xf32>
    %405 = arith.addf %404, %403 : vector<64x64xf32>
    %406 = arith.mulf %395, %405 : vector<64x64xf32>
    %c0_129 = arith.constant 0 : index
    %c0_130 = arith.constant 0 : index
    %407 = vector.load %arg33[%c0_129, %c0_130] : memref<1x64xf32, #tpu.memory_space<vmem>>, vector<1x64xf32>
    %c0_131 = arith.constant 0 : index
    %c0_132 = arith.constant 0 : index
    %408 = vector.load %arg34[%c0_131, %c0_132] : memref<1x64xf32, #tpu.memory_space<vmem>>, vector<1x64xf32>
    %cst_133 = arith.constant dense<0.000000e+00> : vector<64xf32>
    %409 = vector.multi_reduction <add>, %406, %cst_133 [0] : vector<64x64xf32> to vector<64xf32>
    %410 = vector.shape_cast %409 : vector<64xf32> to vector<1x64xf32>
    %cst_134 = arith.constant 6.400000e+01 : f32
    %411 = vector.broadcast %cst_134 : f32 to vector<1x64xf32>
    %412 = arith.divf %410, %411 : vector<1x64xf32>
    %413 = arith.mulf %406, %406 : vector<64x64xf32>
    %cst_135 = arith.constant dense<0.000000e+00> : vector<64xf32>
    %414 = vector.multi_reduction <add>, %413, %cst_135 [0] : vector<64x64xf32> to vector<64xf32>
    %415 = vector.shape_cast %414 : vector<64xf32> to vector<1x64xf32>
    %cst_136 = arith.constant 6.400000e+01 : f32
    %416 = vector.broadcast %cst_136 : f32 to vector<1x64xf32>
    %417 = arith.divf %415, %416 : vector<1x64xf32>
    %418 = arith.mulf %412, %412 : vector<1x64xf32>
    %419 = arith.subf %417, %418 : vector<1x64xf32>
    %420 = vector.broadcast %412 : vector<1x64xf32> to vector<64x64xf32>
    %421 = arith.subf %406, %420 : vector<64x64xf32>
    %cst_137 = arith.constant 9.99999974E-6 : f32
    %422 = vector.broadcast %cst_137 : f32 to vector<1x64xf32>
    %423 = arith.addf %419, %422 : vector<1x64xf32>
    %424 = math.rsqrt %423 : vector<1x64xf32>
    %425 = vector.broadcast %424 : vector<1x64xf32> to vector<64x64xf32>
    %426 = arith.mulf %421, %425 : vector<64x64xf32>
    %427 = vector.broadcast %407 : vector<1x64xf32> to vector<64x64xf32>
    %428 = arith.mulf %426, %427 : vector<64x64xf32>
    %429 = vector.broadcast %408 : vector<1x64xf32> to vector<64x64xf32>
    %430 = arith.addf %428, %429 : vector<64x64xf32>
    %cst_138 = arith.constant dense<0.000000e+00> : vector<64x32xf32>
    %431 = tpu.matmul %430, %389, %cst_138 {dimension_numbers = #tpu.dot_dimension_numbers<[1], [0], [0], [1], [0, 0, 1, 1], [], []>} : vector<64x64xf32>, vector<64x32xf32>, vector<64x32xf32> -> vector<64x32xf32>
    %c0_139 = arith.constant 0 : index
    %c0_140 = arith.constant 0 : index
    %432 = vector.load %arg36[%c0_139, %c0_140] : memref<1x32xf32, #tpu.memory_space<vmem>>, vector<1x32xf32>
    %433 = vector.broadcast %432 : vector<1x32xf32> to vector<64x32xf32>
    %434 = arith.addf %431, %433 : vector<64x32xf32>
    %cst_141 = arith.constant 5.000000e-01 : f32
    %435 = vector.broadcast %cst_141 : f32 to vector<64x32xf32>
    %436 = arith.mulf %435, %434 : vector<64x32xf32>
    %cst_142 = arith.constant 4.471500e-02 : f32
    %437 = vector.broadcast %cst_142 : f32 to vector<64x32xf32>
    %438 = arith.mulf %437, %434 : vector<64x32xf32>
    %439 = arith.mulf %438, %434 : vector<64x32xf32>
    %440 = arith.mulf %439, %434 : vector<64x32xf32>
    %441 = arith.addf %434, %440 : vector<64x32xf32>
    %cst_143 = arith.constant 0.797884583 : f32
    %442 = vector.broadcast %cst_143 : f32 to vector<64x32xf32>
    %443 = arith.mulf %442, %441 : vector<64x32xf32>
    %444 = math.tanh %443 : vector<64x32xf32>
    %cst_144 = arith.constant 1.000000e+00 : f32
    %445 = vector.broadcast %cst_144 : f32 to vector<64x32xf32>
    %446 = arith.addf %445, %444 : vector<64x32xf32>
    %447 = arith.mulf %436, %446 : vector<64x32xf32>
    %c0_145 = arith.constant 0 : index
    %c0_146 = arith.constant 0 : index
    %448 = vector.load %arg37[%c0_145, %c0_146] : memref<1x1xf32, #tpu.memory_space<vmem>>, vector<1x1xf32>
    %449 = vector.broadcast %448 : vector<1x1xf32> to vector<64x32xf32>
    %450 = arith.mulf %449, %447 : vector<64x32xf32>
    %451 = arith.addf %385, %450 : vector<64x32xf32>
    %c0_147 = arith.constant 0 : index
    %c0_148 = arith.constant 0 : index
    %452 = vector.load %arg38[%c0_147, %c0_148] : memref<1x32xf32, #tpu.memory_space<vmem>>, vector<1x32xf32>
    %c0_149 = arith.constant 0 : index
    %c0_150 = arith.constant 0 : index
    %453 = vector.load %arg39[%c0_149, %c0_150] : memref<1x32xf32, #tpu.memory_space<vmem>>, vector<1x32xf32>
    %cst_151 = arith.constant dense<0.000000e+00> : vector<32xf32>
    %454 = vector.multi_reduction <add>, %451, %cst_151 [0] : vector<64x32xf32> to vector<32xf32>
    %455 = vector.shape_cast %454 : vector<32xf32> to vector<1x32xf32>
    %cst_152 = arith.constant 6.400000e+01 : f32
    %456 = vector.broadcast %cst_152 : f32 to vector<1x32xf32>
    %457 = arith.divf %455, %456 : vector<1x32xf32>
    %458 = arith.mulf %451, %451 : vector<64x32xf32>
    %cst_153 = arith.constant dense<0.000000e+00> : vector<32xf32>
    %459 = vector.multi_reduction <add>, %458, %cst_153 [0] : vector<64x32xf32> to vector<32xf32>
    %460 = vector.shape_cast %459 : vector<32xf32> to vector<1x32xf32>
    %cst_154 = arith.constant 6.400000e+01 : f32
    %461 = vector.broadcast %cst_154 : f32 to vector<1x32xf32>
    %462 = arith.divf %460, %461 : vector<1x32xf32>
    %463 = arith.mulf %457, %457 : vector<1x32xf32>
    %464 = arith.subf %462, %463 : vector<1x32xf32>
    %465 = vector.broadcast %457 : vector<1x32xf32> to vector<64x32xf32>
    %466 = arith.subf %451, %465 : vector<64x32xf32>
    %cst_155 = arith.constant 9.99999974E-6 : f32
    %467 = vector.broadcast %cst_155 : f32 to vector<1x32xf32>
    %468 = arith.addf %464, %467 : vector<1x32xf32>
    %469 = math.rsqrt %468 : vector<1x32xf32>
    %470 = vector.broadcast %469 : vector<1x32xf32> to vector<64x32xf32>
    %471 = arith.mulf %466, %470 : vector<64x32xf32>
    %472 = vector.broadcast %452 : vector<1x32xf32> to vector<64x32xf32>
    %473 = arith.mulf %471, %472 : vector<64x32xf32>
    %474 = vector.broadcast %453 : vector<1x32xf32> to vector<64x32xf32>
    %475 = arith.addf %473, %474 : vector<64x32xf32>
    %cst_156 = arith.constant 0.000000e+00 : f32
    %476 = vector.broadcast %cst_156 : f32 to vector<8x16xf32>
    %c0_157 = arith.constant 0 : index
    %c0_158 = arith.constant 0 : index
    %477 = vector.load %arg11[%c0_157, %c0_158] : memref<1x16xf32, #tpu.memory_space<vmem>>, vector<1x16xf32>
    %478 = vector.broadcast %477 : vector<1x16xf32> to vector<8x16xf32>
    %479 = arith.addf %476, %478 : vector<8x16xf32>
    %480 = vector.extract_strided_slice %475 {offsets = [0, 0], sizes = [8, 32], strides = [1, 1]} : vector<64x32xf32> to vector<8x32xf32>
    %c0_159 = arith.constant 0 : index
    %c0_160 = arith.constant 0 : index
    %c0_161 = arith.constant 0 : index
    %481 = vector.load %arg10[%c0_159, %c0_160, %c0_161] : memref<8x32x16xf32, #tpu.memory_space<vmem>>, vector<1x32x16xf32>
    %482 = vector.shape_cast %481 : vector<1x32x16xf32> to vector<32x16xf32>
    %cst_162 = arith.constant dense<0.000000e+00> : vector<8x16xf32>
    %483 = tpu.matmul %480, %482, %cst_162 {dimension_numbers = #tpu.dot_dimension_numbers<[1], [0], [0], [1], [0, 0, 1, 1], [], []>} : vector<8x32xf32>, vector<32x16xf32>, vector<8x16xf32> -> vector<8x16xf32>
    %484 = arith.addf %479, %483 : vector<8x16xf32>
    %485 = vector.extract_strided_slice %475 {offsets = [8, 0], sizes = [8, 32], strides = [1, 1]} : vector<64x32xf32> to vector<8x32xf32>
    %c1 = arith.constant 1 : index
    %c0_163 = arith.constant 0 : index
    %c0_164 = arith.constant 0 : index
    %486 = vector.load %arg10[%c1, %c0_163, %c0_164] : memref<8x32x16xf32, #tpu.memory_space<vmem>>, vector<1x32x16xf32>
    %487 = vector.shape_cast %486 : vector<1x32x16xf32> to vector<32x16xf32>
    %cst_165 = arith.constant dense<0.000000e+00> : vector<8x16xf32>
    %488 = tpu.matmul %485, %487, %cst_165 {dimension_numbers = #tpu.dot_dimension_numbers<[1], [0], [0], [1], [0, 0, 1, 1], [], []>} : vector<8x32xf32>, vector<32x16xf32>, vector<8x16xf32> -> vector<8x16xf32>
    %489 = arith.addf %484, %488 : vector<8x16xf32>
    %490 = vector.extract_strided_slice %475 {offsets = [16, 0], sizes = [8, 32], strides = [1, 1]} : vector<64x32xf32> to vector<8x32xf32>
    %c2 = arith.constant 2 : index
    %c0_166 = arith.constant 0 : index
    %c0_167 = arith.constant 0 : index
    %491 = vector.load %arg10[%c2, %c0_166, %c0_167] : memref<8x32x16xf32, #tpu.memory_space<vmem>>, vector<1x32x16xf32>
    %492 = vector.shape_cast %491 : vector<1x32x16xf32> to vector<32x16xf32>
    %cst_168 = arith.constant dense<0.000000e+00> : vector<8x16xf32>
    %493 = tpu.matmul %490, %492, %cst_168 {dimension_numbers = #tpu.dot_dimension_numbers<[1], [0], [0], [1], [0, 0, 1, 1], [], []>} : vector<8x32xf32>, vector<32x16xf32>, vector<8x16xf32> -> vector<8x16xf32>
    %494 = arith.addf %489, %493 : vector<8x16xf32>
    %495 = vector.extract_strided_slice %475 {offsets = [24, 0], sizes = [8, 32], strides = [1, 1]} : vector<64x32xf32> to vector<8x32xf32>
    %c3 = arith.constant 3 : index
    %c0_169 = arith.constant 0 : index
    %c0_170 = arith.constant 0 : index
    %496 = vector.load %arg10[%c3, %c0_169, %c0_170] : memref<8x32x16xf32, #tpu.memory_space<vmem>>, vector<1x32x16xf32>
    %497 = vector.shape_cast %496 : vector<1x32x16xf32> to vector<32x16xf32>
    %cst_171 = arith.constant dense<0.000000e+00> : vector<8x16xf32>
    %498 = tpu.matmul %495, %497, %cst_171 {dimension_numbers = #tpu.dot_dimension_numbers<[1], [0], [0], [1], [0, 0, 1, 1], [], []>} : vector<8x32xf32>, vector<32x16xf32>, vector<8x16xf32> -> vector<8x16xf32>
    %499 = arith.addf %494, %498 : vector<8x16xf32>
    %500 = vector.extract_strided_slice %475 {offsets = [32, 0], sizes = [8, 32], strides = [1, 1]} : vector<64x32xf32> to vector<8x32xf32>
    %c4 = arith.constant 4 : index
    %c0_172 = arith.constant 0 : index
    %c0_173 = arith.constant 0 : index
    %501 = vector.load %arg10[%c4, %c0_172, %c0_173] : memref<8x32x16xf32, #tpu.memory_space<vmem>>, vector<1x32x16xf32>
    %502 = vector.shape_cast %501 : vector<1x32x16xf32> to vector<32x16xf32>
    %cst_174 = arith.constant dense<0.000000e+00> : vector<8x16xf32>
    %503 = tpu.matmul %500, %502, %cst_174 {dimension_numbers = #tpu.dot_dimension_numbers<[1], [0], [0], [1], [0, 0, 1, 1], [], []>} : vector<8x32xf32>, vector<32x16xf32>, vector<8x16xf32> -> vector<8x16xf32>
    %504 = arith.addf %499, %503 : vector<8x16xf32>
    %505 = vector.extract_strided_slice %475 {offsets = [40, 0], sizes = [8, 32], strides = [1, 1]} : vector<64x32xf32> to vector<8x32xf32>
    %c5 = arith.constant 5 : index
    %c0_175 = arith.constant 0 : index
    %c0_176 = arith.constant 0 : index
    %506 = vector.load %arg10[%c5, %c0_175, %c0_176] : memref<8x32x16xf32, #tpu.memory_space<vmem>>, vector<1x32x16xf32>
    %507 = vector.shape_cast %506 : vector<1x32x16xf32> to vector<32x16xf32>
    %cst_177 = arith.constant dense<0.000000e+00> : vector<8x16xf32>
    %508 = tpu.matmul %505, %507, %cst_177 {dimension_numbers = #tpu.dot_dimension_numbers<[1], [0], [0], [1], [0, 0, 1, 1], [], []>} : vector<8x32xf32>, vector<32x16xf32>, vector<8x16xf32> -> vector<8x16xf32>
    %509 = arith.addf %504, %508 : vector<8x16xf32>
    %510 = vector.extract_strided_slice %475 {offsets = [48, 0], sizes = [8, 32], strides = [1, 1]} : vector<64x32xf32> to vector<8x32xf32>
    %c6 = arith.constant 6 : index
    %c0_178 = arith.constant 0 : index
    %c0_179 = arith.constant 0 : index
    %511 = vector.load %arg10[%c6, %c0_178, %c0_179] : memref<8x32x16xf32, #tpu.memory_space<vmem>>, vector<1x32x16xf32>
    %512 = vector.shape_cast %511 : vector<1x32x16xf32> to vector<32x16xf32>
    %cst_180 = arith.constant dense<0.000000e+00> : vector<8x16xf32>
    %513 = tpu.matmul %510, %512, %cst_180 {dimension_numbers = #tpu.dot_dimension_numbers<[1], [0], [0], [1], [0, 0, 1, 1], [], []>} : vector<8x32xf32>, vector<32x16xf32>, vector<8x16xf32> -> vector<8x16xf32>
    %514 = arith.addf %509, %513 : vector<8x16xf32>
    %515 = vector.extract_strided_slice %475 {offsets = [56, 0], sizes = [8, 32], strides = [1, 1]} : vector<64x32xf32> to vector<8x32xf32>
    %c7 = arith.constant 7 : index
    %c0_181 = arith.constant 0 : index
    %c0_182 = arith.constant 0 : index
    %516 = vector.load %arg10[%c7, %c0_181, %c0_182] : memref<8x32x16xf32, #tpu.memory_space<vmem>>, vector<1x32x16xf32>
    %517 = vector.shape_cast %516 : vector<1x32x16xf32> to vector<32x16xf32>
    %cst_183 = arith.constant dense<0.000000e+00> : vector<8x16xf32>
    %518 = tpu.matmul %515, %517, %cst_183 {dimension_numbers = #tpu.dot_dimension_numbers<[1], [0], [0], [1], [0, 0, 1, 1], [], []>} : vector<8x32xf32>, vector<32x16xf32>, vector<8x16xf32> -> vector<8x16xf32>
    %519 = arith.addf %514, %518 : vector<8x16xf32>
    %c0_184 = arith.constant 0 : index
    %c0_185 = arith.constant 0 : index
    %520 = vector.load %arg3[%c0_184, %c0_185] : memref<8x1xf32, #tpu.memory_space<vmem>>, vector<8x1xf32>
    %521 = vector.broadcast %520 : vector<8x1xf32> to vector<8x16xf32>
    %522 = arith.subf %519, %521 : vector<8x16xf32>
    %c0_186 = arith.constant 0 : index
    %c0_187 = arith.constant 0 : index
    %523 = vector.load %arg4[%c0_186, %c0_187] : memref<8x1xf32, #tpu.memory_space<vmem>>, vector<8x1xf32>
    %524 = vector.broadcast %523 : vector<8x1xf32> to vector<8x16xf32>
    %525 = arith.mulf %522, %524 : vector<8x16xf32>
    %526 = vector.broadcast %17 : vector<8x1xf32> to vector<8x16xf32>
    %527 = arith.mulf %525, %526 : vector<8x16xf32>
    %528 = vector.broadcast %4 : vector<8x1xf32> to vector<8x16xf32>
    %529 = arith.addf %527, %528 : vector<8x16xf32>
    %cst_188 = arith.constant 0.000000e+00 : f32
    %530 = vector.broadcast %cst_188 : f32 to vector<8x112xf32>
    %531 = tpu.concatenate %529, %530 in 1 : vector<8x16xf32>, vector<8x112xf32> -> vector<8x128xf32>
    %c0_189 = arith.constant 0 : index
    %c0_190 = arith.constant 0 : index
    %532 = vector.load %arg40[%c0_189, %c0_190] : memref<8x128xf32, #tpu.memory_space<vmem>>, vector<8x128xf32>
    tpu.vector_store %arg40[%c0_189, %c0_190], %531 {strides = array<i32>} : memref<8x128xf32, #tpu.memory_space<vmem>>, vector<8x128xf32>,
    return
  }
  func.func @transform_0(%arg0: i32) -> (i32, i32) {
    %c0_i32 = arith.constant 0 : i32
    %c0_i32_0 = arith.constant 0 : i32
    %c0_i32_1 = arith.constant 0 : i32
    return %c0_i32, %c0_i32_0 : i32, i32
  }
  func.func @transform_1(%arg0: i32) -> (i32, i32) {
    %c0_i32 = arith.constant 0 : i32
    %c0_i32_0 = arith.constant 0 : i32
    %c0_i32_1 = arith.constant 0 : i32
    return %c0_i32, %c0_i32_0 : i32, i32
  }
  func.func @transform_2(%arg0: i32) -> (i32, i32) {
    %c0_i32 = arith.constant 0 : i32
    %c0_i32_0 = arith.constant 0 : i32
    %c0_i32_1 = arith.constant 0 : i32
    return %c0_i32, %c0_i32_0 : i32, i32
  }
  func.func @transform_3(%arg0: i32) -> (i32, i32) {
    %c0_i32 = arith.constant 0 : i32
    %c0_i32_0 = arith.constant 0 : i32
    %c0_i32_1 = arith.constant 0 : i32
    return %c0_i32, %c0_i32_0 : i32, i32
  }
  func.func @transform_4(%arg0: i32) -> (i32, i32) {
    %c0_i32 = arith.constant 0 : i32
    %c0_i32_0 = arith.constant 0 : i32
    %c0_i32_1 = arith.constant 0 : i32
    return %c0_i32, %c0_i32_0 : i32, i32
  }
  func.func @transform_5(%arg0: i32) -> (i32, i32) {
    %c0_i32 = arith.constant 0 : i32
    %c0_i32_0 = arith.constant 0 : i32
    %c0_i32_1 = arith.constant 0 : i32
    return %c0_i32, %c0_i32_0 : i32, i32
  }
  func.func @transform_6(%arg0: i32) -> (i32, i32) {
    %c0_i32 = arith.constant 0 : i32
    %c0_i32_0 = arith.constant 0 : i32
    %c0_i32_1 = arith.constant 0 : i32
    return %c0_i32, %c0_i32_0 : i32, i32
  }
  func.func @transform_7(%arg0: i32) -> (i32, i32) {
    %c0_i32 = arith.constant 0 : i32
    %c0_i32_0 = arith.constant 0 : i32
    %c0_i32_1 = arith.constant 0 : i32
    return %c0_i32, %c0_i32_0 : i32, i32
  }
  func.func @transform_8(%arg0: i32) -> (i32, i32) {
    %c0_i32 = arith.constant 0 : i32
    %c0_i32_0 = arith.constant 0 : i32
    %c0_i32_1 = arith.constant 0 : i32
    return %c0_i32, %c0_i32_0 : i32, i32
  }
  func.func @transform_9(%arg0: i32) -> (i32, i32, i32) {
    %c0_i32 = arith.constant 0 : i32
    %c0_i32_0 = arith.constant 0 : i32
    %c0_i32_1 = arith.constant 0 : i32
    %c0_i32_2 = arith.constant 0 : i32
    return %c0_i32, %c0_i32_0, %c0_i32_1 : i32, i32, i32
  }
  func.func @transform_10(%arg0: i32) -> (i32, i32) {
    %c0_i32 = arith.constant 0 : i32
    %c0_i32_0 = arith.constant 0 : i32
    %c0_i32_1 = arith.constant 0 : i32
    return %c0_i32, %c0_i32_0 : i32, i32
  }
  func.func @transform_11(%arg0: i32) -> (i32, i32) {
    %c0_i32 = arith.constant 0 : i32
    %c0_i32_0 = arith.constant 0 : i32
    %c0_i32_1 = arith.constant 0 : i32
    return %c0_i32, %c0_i32_0 : i32, i32
  }
  func.func @transform_12(%arg0: i32) -> (i32, i32) {
    %c0_i32 = arith.constant 0 : i32
    %c0_i32_0 = arith.constant 0 : i32
    %c0_i32_1 = arith.constant 0 : i32
    return %c0_i32, %c0_i32_0 : i32, i32
  }
  func.func @transform_13(%arg0: i32) -> (i32, i32) {
    %c0_i32 = arith.constant 0 : i32
    %c0_i32_0 = arith.constant 0 : i32
    %c0_i32_1 = arith.constant 0 : i32
    return %c0_i32, %c0_i32_0 : i32, i32
  }
  func.func @transform_14(%arg0: i32) -> (i32, i32) {
    %c0_i32 = arith.constant 0 : i32
    %c0_i32_0 = arith.constant 0 : i32
    %c0_i32_1 = arith.constant 0 : i32
    return %c0_i32, %c0_i32_0 : i32, i32
  }
  func.func @transform_15(%arg0: i32) -> (i32, i32) {
    %c0_i32 = arith.constant 0 : i32
    %c0_i32_0 = arith.constant 0 : i32
    %c0_i32_1 = arith.constant 0 : i32
    return %c0_i32, %c0_i32_0 : i32, i32
  }
  func.func @transform_16(%arg0: i32) -> (i32, i32) {
    %c0_i32 = arith.constant 0 : i32
    %c0_i32_0 = arith.constant 0 : i32
    %c0_i32_1 = arith.constant 0 : i32
    return %c0_i32, %c0_i32_0 : i32, i32
  }
  func.func @transform_17(%arg0: i32) -> (i32, i32) {
    %c0_i32 = arith.constant 0 : i32
    %c0_i32_0 = arith.constant 0 : i32
    %c0_i32_1 = arith.constant 0 : i32
    return %c0_i32, %c0_i32_0 : i32, i32
  }
  func.func @transform_18(%arg0: i32) -> (i32, i32) {
    %c0_i32 = arith.constant 0 : i32
    %c0_i32_0 = arith.constant 0 : i32
    %c0_i32_1 = arith.constant 0 : i32
    return %c0_i32, %c0_i32_0 : i32, i32
  }
  func.func @transform_19(%arg0: i32) -> (i32, i32) {
    %c0_i32 = arith.constant 0 : i32
    %c0_i32_0 = arith.constant 0 : i32
    %c0_i32_1 = arith.constant 0 : i32
    return %c0_i32, %c0_i32_0 : i32, i32
  }
  func.func @transform_20(%arg0: i32) -> (i32, i32) {
    %c0_i32 = arith.constant 0 : i32
    %c0_i32_0 = arith.constant 0 : i32
    %c0_i32_1 = arith.constant 0 : i32
    return %c0_i32, %c0_i32_0 : i32, i32
  }
  func.func @transform_21(%arg0: i32) -> (i32, i32) {
    %c0_i32 = arith.constant 0 : i32
    %c0_i32_0 = arith.constant 0 : i32
    %c0_i32_1 = arith.constant 0 : i32
    return %c0_i32, %c0_i32_0 : i32, i32
  }
  func.func @transform_22(%arg0: i32) -> (i32, i32) {
    %c0_i32 = arith.constant 0 : i32
    %c0_i32_0 = arith.constant 0 : i32
    %c0_i32_1 = arith.constant 0 : i32
    return %c0_i32, %c0_i32_0 : i32, i32
  }
  func.func @transform_23(%arg0: i32) -> (i32, i32) {
    %c0_i32 = arith.constant 0 : i32
    %c0_i32_0 = arith.constant 0 : i32
    %c0_i32_1 = arith.constant 0 : i32
    return %c0_i32, %c0_i32_0 : i32, i32
  }
  func.func @transform_24(%arg0: i32) -> (i32, i32) {
    %c0_i32 = arith.constant 0 : i32
    %c0_i32_0 = arith.constant 0 : i32
    %c0_i32_1 = arith.constant 0 : i32
    return %c0_i32, %c0_i32_0 : i32, i32
  }
  func.func @transform_25(%arg0: i32) -> (i32, i32) {
    %c0_i32 = arith.constant 0 : i32
    %c0_i32_0 = arith.constant 0 : i32
    %c0_i32_1 = arith.constant 0 : i32
    return %c0_i32, %c0_i32_0 : i32, i32
  }
  func.func @transform_26(%arg0: i32) -> (i32, i32) {
    %c0_i32 = arith.constant 0 : i32
    %c0_i32_0 = arith.constant 0 : i32
    %c0_i32_1 = arith.constant 0 : i32
    return %c0_i32, %c0_i32_0 : i32, i32
  }
  func.func @transform_27(%arg0: i32) -> (i32, i32) {
    %c0_i32 = arith.constant 0 : i32
    %c0_i32_0 = arith.constant 0 : i32
    %c0_i32_1 = arith.constant 0 : i32
    return %c0_i32, %c0_i32_0 : i32, i32
  }
  func.func @transform_28(%arg0: i32) -> (i32, i32) {
    %c0_i32 = arith.constant 0 : i32
    %c0_i32_0 = arith.constant 0 : i32
    %c0_i32_1 = arith.constant 0 : i32
    return %c0_i32, %c0_i32_0 : i32, i32
  }
  func.func @transform_29(%arg0: i32) -> (i32, i32) {
    %c0_i32 = arith.constant 0 : i32
    %c0_i32_0 = arith.constant 0 : i32
    %c0_i32_1 = arith.constant 0 : i32
    return %c0_i32, %c0_i32_0 : i32, i32
  }
  func.func @transform_30(%arg0: i32) -> (i32, i32) {
    %c0_i32 = arith.constant 0 : i32
    %c0_i32_0 = arith.constant 0 : i32
    %c0_i32_1 = arith.constant 0 : i32
    return %c0_i32, %c0_i32_0 : i32, i32
  }
  func.func @transform_31(%arg0: i32) -> (i32, i32) {
    %c0_i32 = arith.constant 0 : i32
    %c0_i32_0 = arith.constant 0 : i32
    %c0_i32_1 = arith.constant 0 : i32
    return %c0_i32, %c0_i32_0 : i32, i32
  }
  func.func @transform_32(%arg0: i32) -> (i32, i32) {
    %c0_i32 = arith.constant 0 : i32
    %c0_i32_0 = arith.constant 0 : i32
    %c0_i32_1 = arith.constant 0 : i32
    return %c0_i32, %c0_i32_0 : i32, i32
  }
  func.func @transform_33(%arg0: i32) -> (i32, i32) {
    %c0_i32 = arith.constant 0 : i32
    %c0_i32_0 = arith.constant 0 : i32
    %c0_i32_1 = arith.constant 0 : i32
    return %c0_i32, %c0_i32_0 : i32, i32
  }
  func.func @transform_34(%arg0: i32) -> (i32, i32) {
    %c0_i32 = arith.constant 0 : i32
    %c0_i32_0 = arith.constant 0 : i32
    %c0_i32_1 = arith.constant 0 : i32
    return %c0_i32, %c0_i32_0 : i32, i32
  }
  func.func @transform_35(%arg0: i32) -> (i32, i32) {
    %c0_i32 = arith.constant 0 : i32
    %c0_i32_0 = arith.constant 0 : i32
    %c0_i32_1 = arith.constant 0 : i32
    return %c0_i32, %c0_i32_0 : i32, i32
  }
  func.func @transform_36(%arg0: i32) -> (i32, i32) {
    %c0_i32 = arith.constant 0 : i32
    %c0_i32_0 = arith.constant 0 : i32
    %c0_i32_1 = arith.constant 0 : i32
    return %c0_i32, %c0_i32_0 : i32, i32
  }
  func.func @transform_37(%arg0: i32) -> (i32, i32) {
    %c0_i32 = arith.constant 0 : i32
    %c0_i32_0 = arith.constant 0 : i32
    %c0_i32_1 = arith.constant 0 : i32
    return %c0_i32, %c0_i32_0 : i32, i32
  }
  func.func @transform_38(%arg0: i32) -> (i32, i32) {
    %c0_i32 = arith.constant 0 : i32
    %c0_i32_0 = arith.constant 0 : i32
    %c0_i32_1 = arith.constant 0 : i32
    return %c0_i32, %c0_i32_0 : i32, i32
  }
  func.func @transform_39(%arg0: i32) -> (i32, i32) {
    %c0_i32 = arith.constant 0 : i32
    %c0_i32_0 = arith.constant 0 : i32
    %c0_i32_1 = arith.constant 0 : i32
    return %c0_i32, %c0_i32_0 : i32, i32
  }
}

</mosaic_0001>

<bundles_post_ra>
// kernel: convtimenet_forward.1
= control target key start
LH: loop header
LB: loop body
LE: loop exit
PB: predicated region body
PF: predicated region fallthrough
CT: control target
= control target key end

     0   :  { %s2909_s6 = smov 1   ;;  %s2910_s10 = smov 2   ;;  %s4377_s0 = inlined_call_operand.smem [shape: u32[40], index: -1, kind: input, shape index: {}] }
   0x1   :  { %s2968_s5 = sld [smem:[%s4377_s0]]   ;;  %s2911_s14 = smov 3  }
   0x2   :  { %s2973_s9 = sld [smem:[%s4377_s0 + %s2909_s6]]   ;;  %s2912_s18 = smov 4  }
   0x3   :  { %s2978_s13 = sld [smem:[%s4377_s0 + %s2910_s10]]   ;;  %s2913_s22 = smov 5  }
   0x4   :  { %s2983_s17 = sld [smem:[%s4377_s0 + %s2911_s14]]   ;;  %s2914_s26 = smov 6  }
   0x5   :  { %s2988_s21 = sld [smem:[%s4377_s0 + %s2912_s18]]   ;;  %s2915_s30 = smov 7  }
   0x6   :  { %s2511_s25 = sld [smem:[%s4377_s0 + %s2913_s22]]   ;;  %s2916_s4 = smov 8  }
   0x7   :  { %s2996_s29 = sld [smem:[%s4377_s0 + %s2914_s26]]   ;;  %s2917_s10 = smov 9  }
   0x8   :  { %s3001_s3 = sld [smem:[%s4377_s0 + %s2915_s30]]   ;;  %s2918_s15 = smov 10  }
   0x9   :  { %s3006_s8 = sld [smem:[%s4377_s0 + %s2916_s4]]   ;;  %s2919_s20 = smov 11  }
   0xa   :  { %s3011_s14 = sld [smem:[%s4377_s0 + %s2917_s10]]   ;;  %s2920_s26 = smov 12  }
   0xb   :  { %s3016_s19 = sld [smem:[%s4377_s0 + %s2918_s15]]   ;;  %s2921_s1 = smov 14  }
   0xc   :  { %s3021_s24 = sld [smem:[%s4377_s0 + %s2919_s20]]   ;;  %v84_v0 = vstv %s2511_s25  ;;  %s2922_s7 = smov 15  }
   0xd   :  { %s3026_s30 = sld [smem:[%s4377_s0 + %s2920_s26]]   ;;  %85 = vst [vmem:[#allocation2] sm:$0x1] %v84_v0  ;;  %s2923_s25 = smov 16  }
   0xe   :  { %s3031_s6 = sld [smem:[%s4377_s0 + %s2921_s1]]   ;;  %s2924_s20 = smov 17  }
   0xf   :  { %s3036_s12 = sld [smem:[%s4377_s0 + %s2922_s7]]   ;;  %s2925_s27 = smov 18  }
  0x10   :  { %4383 = sst [smem:[#allocation10_spill]] %s3011_s14  ;;  %s2926_s4 = smov 19  }
  0x11   :  { %4384 = sst [smem:[#allocation11_spill]] %s3016_s19  ;;  %s2945_s28 = smov 22  }
  0x12   :  { %s3041_s18 = sld [smem:[%s4377_s0 + %s2923_s25]]   ;;  %s2927_s25 = smov 20  }
  0x13   :  { %s3046_s26 = sld [smem:[%s4377_s0 + %s2924_s20]]   ;;  %s2928_s20 = smov 21  }
  0x14   :  { %s3051_s2 = sld [smem:[%s4377_s0 + %s2925_s27]]   ;;  %s2929_s27 = smov 23  }
  0x15   :  { %4385 = sst [smem:[#allocation12_spill]] %s3036_s12 }
  0x16   :  { %s3056_s11 = sld [smem:[%s4377_s0 + %s2926_s4]]   ;;  %s2930_s4 = smov 24  }
  0x17   :  { %s3061_s19 = sld [smem:[%s4377_s0 + %s2927_s25]]   ;;  %s2931_s25 = smov 25  }
  0x18   :  { %s3066_s14 = sld [smem:[%s4377_s0 + %s2928_s20]]   ;;  %s2932_s20 = smov 26  }
  0x19   :  { %4386 = sst [smem:[#allocation13_spill]] %s3046_s26  ;;  %s2946_s26 = smov 27  }
  0x1a   :  { %4387 = sst [smem:[#allocation14_spill]] %s3051_s2 }
  0x1b   :  { %s3071_s2 = sld [smem:[%s4377_s0 + %s2929_s27]]   ;;  %s2933_s27 = smov 28  }
  0x1c   :  { %4388 = sst [smem:[#allocation15_spill]] %s3056_s11 }
  0x1d   :  { %4389 = sst [smem:[#allocation16_spill]] %s3061_s19 }
  0x1e   :  { %4390 = sst [smem:[#allocation17_spill]] %s3066_s14 }
  0x1f   :  { %s3076_s11 = sld [smem:[%s4377_s0 + %s2930_s4]]   ;;  %s2934_s4 = smov 29  }
  0x20   :  { %s3081_s19 = sld [smem:[%s4377_s0 + %s2931_s25]]   ;;  %s2935_s25 = smov 30  }
  0x21   :  { %4391 = sst [smem:[#allocation18_spill]] %s3071_s2 }
  0x22   :  { %s3086_s14 = sld [smem:[%s4377_s0 + %s2932_s20]]   ;;  %s2936_s20 = smov 31  }
  0x23   :  { %s3091_s2 = sld [smem:[%s4377_s0 + %s2933_s27]]   ;;  %s2937_s27 = smov 32  }
  0x24   :  { %s2533_s10 = sld [smem:[%s4377_s0 + %s2946_s26]]  }
  0x25   :  { %4392 = sst [smem:[#allocation19_spill]] %s3076_s11 }
  0x26   :  { %4393 = sst [smem:[#allocation20_spill]] %s3081_s19 }
  0x27   :  { %s3096_s11 = sld [smem:[%s4377_s0 + %s2934_s4]]   ;;  %s2938_s4 = smov 33  }
  0x28   :  { %4394 = sst [smem:[#allocation21_spill]] %s3086_s14 }
  0x29   :  { %4395 = sst [smem:[#allocation22_spill]] %s3091_s2 }
  0x2a   :  { %s3101_s19 = sld [smem:[%s4377_s0 + %s2935_s25]]   ;;  %s2939_s25 = smov 34   ;;  %v90_v3 = vstv %s2533_s10 }
  0x2b   :  { %s3106_s14 = sld [smem:[%s4377_s0 + %s2936_s20]]   ;;  %s2940_s20 = smov 35   ;;  %91 = vst [vmem:[#allocation5] sm:$0x1] %v90_v3 }
  0x2c   :  { %s3111_s2 = sld [smem:[%s4377_s0 + %s2937_s27]]   ;;  %s2941_s27 = smov 37  }
  0x2d   :  { %4396 = sst [smem:[#allocation23_spill]] %s3096_s11 }
  0x2e   :  { %s3116_s11 = sld [smem:[%s4377_s0 + %s2938_s4]]   ;;  %s2942_s4 = smov 38  }
  0x30   :  { %4397 = sst [smem:[#allocation24_spill]] %s3101_s19 }
  0x31   :  { %4398 = sst [smem:[#allocation25_spill]] %s3106_s14 }
  0x32   :  { %4399 = sst [smem:[#allocation26_spill]] %s3111_s2 }
  0x33   :  { %s3121_s19 = sld [smem:[%s4377_s0 + %s2939_s25]]   ;;  %s2943_s25 = smov 39  }
  0x34   :  { %4400 = sst [smem:[#allocation27_spill]] %s3116_s11 }
  0x35   :  { %s3126_s14 = sld [smem:[%s4377_s0 + %s2940_s20]]   ;;  %s2944_s20 = smov 13  }
  0x36   :  { %s3131_s2 = sld [smem:[%s4377_s0 + %s2941_s27]]  }
  0x37   :  { %s3136_s11 = sld [smem:[%s4377_s0 + %s2942_s4]]  }
  0x39   :  { %4401 = sst [smem:[#allocation28_spill]] %s3121_s19 }
  0x3a   :  { %s3141_s19 = sld [smem:[%s4377_s0 + %s2943_s25]]  }
  0x3b   :  { %4402 = sst [smem:[#allocation29_spill]] %s3126_s14 }
  0x3c   :  { %4403 = sst [smem:[#allocation30_spill]] %s3131_s2 }
  0x3d   :  { %4404 = sst [smem:[#allocation31_spill]] %s3136_s11  ;;  %s2947_s11 = smov 36  }
  0x3e   :  { %s2519_s14 = sld [smem:[%s4377_s0 + %s2944_s20]]  }
  0x3f   :  { %s2528_s2 = sld [smem:[%s4377_s0 + %s2945_s28]]  }
  0x40   :  { %s2542_s25 = sld [smem:[%s4377_s0 + %s2947_s11]]  }
  0x44   :  { %v86_v1 = vstv %s2519_s14 }
  0x45   :  { %87 = vst [vmem:[#allocation3] sm:$0x1] %v86_v1  ;;  %v88_v2 = vstv %s2528_s2 }
  0x46   :  { %89 = vst [vmem:[#allocation4] sm:$0x1] %v88_v2  ;;  %v92_v4 = vstv %s2542_s25 }
  0x47   :  { %93 = vst [vmem:[#allocation6] sm:$0x1] %v92_v4 }
  0x48   :  { %v3156_v5 = vld [vmem:[%s2968_s5] sm:$0xff]  ;;  %vm174_vm0 = vcmask 261120   ;;  %v2948_v9 = vmov 0  }
  0x49   :  { %v207_v6 = vld [vmem:[%s2973_s9] sm:$0xff]  ;;  %v175_v7 = vsel %vm174_vm0, %v3156_v5, 0.0  ;;  %v186_v8 = vmul.f32 %v3156_v5, %v3156_v5  ;;  %2739 = vset.pattern.permute.xlu1 %v2948_v9  ;;  %2740 = vset.pattern.permute.xlu2 %v2948_v9 }
  0x4a   :  { %176 = vadd.xlane.f32.xlu0 %v175_v7  ;;  %210 = vperm.xlu1 %2739, %v207_v6   ;;  %v214_v11 = vld [vmem:[%s2978_s13] sm:$0xff] }
  0x4b   :  { %v187_v10 = vsel %vm174_vm0, %v186_v8, 0.0  ;;  %2741 = vset.pattern.permute.xlu0 %v2948_v9 }
  0x52   :  { %188 = vadd.xlane.f32.xlu0 %v187_v10  ;;  %217 = vperm.xlu1 %2739, %v214_v11  }
  0x53   :  { %94 = vsyncpa [#allocation8], 0  ;;  %v2949_v12 = vmov 32.0   ;;  %v263_v17 = vld [vmem:[%s2996_s29 + $0x24] sm:$0xff]  ;;  %v224_v21 = vld [vmem:[%s2988_s21 + $0x18] sm:$0xff]  ;;  %s2950_s0 = smov 64  }
  0x54   :  { %2767 = vrcp.f32 %v2949_v12  ;;  %v274_v19 = vunpack.c.l.bf16 %v263_v17  ;;  %v275_v20 = vunpack.c.h.bf16 %v263_v17  ;;  %v261_v22 = vld [vmem:[%s2996_s29 + $0x18] sm:$0xff]  ;;  %247 = vmatpush.msra.mxu3 %v224_v21  ;;  %v223_v26 = vld [vmem:[%s2988_s21 + $0x10] sm:$0xff]  ;;  %v222_v31 = vld [vmem:[%s2988_s21 + $0x8] sm:$0xff]  ;;  %vm394_vm5 = vcmask 64512   ;;  %s2951_s5 = smov 88   ;;  %s2952_s9 = smov 112  }
  0x55   :  { %v271_v24 = vunpack.c.l.bf16 %v261_v22  ;;  %v272_v25 = vunpack.c.h.bf16 %v261_v22  ;;  %v259_v27 = vld [vmem:[%s2996_s29 + $0xc] sm:$0xff]  ;;  %v257_v32 = vld [vmem:[%s2996_s29] sm:$0xff]  ;;  %v260_v41 = vld [vmem:[%s2996_s29 + $0x14] sm:$0xf]  ;;  %s2953_s13 = smov 120   ;;  %s2957_s14 = smov 96  }
  0x56   :  { %289 = vmatpush.msra.mxu1 %v274_v19  ;;  %309 = vmatpush.msra.mxu2 %v275_v20  ;;  %v268_v29 = vunpack.c.l.bf16 %v259_v27  ;;  %v269_v30 = vunpack.c.h.bf16 %v259_v27  ;;  %v265_v33 = vunpack.c.l.bf16 %v257_v32  ;;  %v266_v34 = vunpack.c.h.bf16 %v257_v32  ;;  %v221_v36 = vld [vmem:[%s2988_s21] sm:$0xff]  ;;  %v264_v37 = vld [vmem:[%s2996_s29 + $0x2c] sm:$0xf]  ;;  %v258_v42 = vld [vmem:[%s2996_s29 + $0x8] sm:$0xf]  ;;  %s2954_s21 = smov 80  }
  0x57   :  { %248 = vmatpush.msra.mxu3 %v223_v26  ;;  %v276_v38 = vunpack.c.l.bf16 %v264_v37  ;;  %v262_v40 = vld [vmem:[%s2996_s29 + $0x20] sm:$0xf]  ;;  %v270_v46 = vunpack.c.l.bf16 %v260_v41  ;;  %v267_v48 = vunpack.c.l.bf16 %v258_v42  ;;  %s2955_s29 = smov 104   ;;  %vm943_vm10 = vcmask 523264   ;;  %s4410_s12 = sld [smem:[#allocation17_spill]] }
  0x58   :  { %290 = vmatpush.msra.mxu1 %v271_v24  ;;  %310 = vmatpush.msra.mxu2 %v272_v25  ;;  %v273_v45 = vunpack.c.l.bf16 %v262_v40  ;;  %v2742_v50 = vld [vmem:[#allocation2] ss:$0 sm:$0xff]  ;;  %v2743_v41 = vld [vmem:[#allocation4] ss:$0 sm:$0xff]  ;;  %v2744_v42 = vld [vmem:[#allocation3] ss:$0 sm:$0xff] }
  0x59   :  { %249 = vmatpush.msra.mxu3 %v222_v31  ;;  %229 = vperm.xlu2 %2740, %v2742_v50   ;;  %v389_v7 = vld [vmem:[%s3001_s3] sm:$0xff]  ;;  %s2956_s3 = smov 72   ;;  %s4412_s26 = sld [smem:[#allocation18_spill]] }
  0x5a   :  { %v2768_v13 = vpop.eup %2767  ;;  %291 = vmatpush.msra.mxu1 %v268_v29  ;;  %311 = vmatpush.msra.mxu2 %v269_v30  ;;  %s4413_s2 = sld [smem:[#allocation19_spill]] }
  0x5b   :  { %v179_v14 = vmul.f32 32.0, %v2768_v13  ;;  %vm183_vm1 = vweird.f32 %v2768_v13  ;;  %250 = vmatpush.msra.mxu3 %v221_v36  ;;  %426 = vmatpush.msra.mxu0 %v389_v7  ;;  %s4414_s11 = sld [smem:[#allocation21_spill]] }
  0x5c   :  { %292 = vmatpush.msra.mxu1 %v265_v33  ;;  %312 = vmatpush.msra.mxu2 %v266_v34  ;;  %s4415_s16 = sld [smem:[#allocation24_spill]] }
  0x5d   :  { %v180_v15 = vsub.f32 1.0, %v179_v14  ;;  %329 = vmatpush.msrb.mxu3 %v276_v38  ;;  %s4416_s20 = sld [smem:[#allocation22_spill]] }
  0x5e   :  { %2687 = vmatpush.msrb.mxu2 %v389_v7  ;;  %2686 = vmatpush.msrb.mxu1 %v389_v7  ;;  %s4417_s22 = sld [smem:[#allocation23_spill]] }
  0x5f   :  { %v181_v16 = vmul.f32 %v2768_v13, %v180_v15  ;;  %330 = vmatpush.msrb.mxu3 %v273_v45  ;;  %s4418_s23 = sld [smem:[#allocation25_spill]] }
  0x60   :  { %s4419_s28 = sld [smem:[#allocation28_spill]] }
  0x61   :  { %v182_v18 = vadd.f32 %v2768_v13, %v181_v16  ;;  %331 = vmatpush.msrb.mxu3 %v270_v46  ;;  %s4420_s27 = sld [smem:[#allocation26_spill]] }
  0x62   :  { %s4421_s1 = sld [smem:[#allocation27_spill]] }
  0x63   :  { %v184_v28 = vsel %vm183_vm1, %v2768_v13, %v182_v18  ;;  %332 = vmatpush.msrb.mxu3 %v267_v48  ;;  %s4422_s7 = sld [smem:[#allocation29_spill]] }
  0x64   :  { %s4423_s4 = sld [smem:[#allocation10_spill]] }
  0x65   :  { %s4424_s10 = sld [smem:[#allocation30_spill]] }
  0x66   :  { %s4425_s15 = sld [smem:[#allocation31_spill]] }
  0x67   :  { %s4426_s25 = sld [smem:[#allocation11_spill]] }
  0xb3   :  { %v230_v3 = vpop.permute.xlu2 %229 }
  0xbc   :  { %v211_v54 = vpop.permute.xlu1 %210 }
  0xbd   :  { %v177_v23 = vpop.xlane.xlu0 %176 }
  0xbe   :  { %v3172_v35 = vmul.f32 %v184_v28, %v177_v23 }
  0xc0   :  { %v191_v43 = vmul.f32 %v3172_v35, %v3172_v35  ;;  %v205_v58 = vsub.f32 %v3156_v5, %v3172_v35 }
  0xc4   :  { %v3185_v63 = vpop.permute.xlu1 %217 }
  0xc5   :  { %v189_v39 = vpop.xlane.xlu0 %188 }
  0xc6   :  { %v190_v44 = vmul.f32 %v189_v39, %v184_v28 }
  0xc8   :  { %v192_v47 = vsub.f32 %v190_v44, %v191_v43  ;;  %v2479_v43 = vld [vmem:[%s2983_s17] sm:$0xff]  ;;  %s4405_s17 = sld [smem:[#allocation12_spill]] }
  0xc9   :  { %v2745_v44 = vld [vmem:[#allocation6] ss:$0 sm:$0xff] }
  0xca   :  { %v193_v49 = vadd.f32 1e-05, %v192_v47 }
  0xcc   :  { %2769 = vrsqrt.f32 %v193_v49  ;;  %vm200_vm3 = vweird.f32 %v193_v49 }
  0xd2   :  { %v2770_v51 = vpop.eup %2769 }
  0xd3   :  { %v195_v52 = vmul.f32 %v2770_v51, %v193_v49  ;;  %vm201_vm2 = vweird.f32 %v2770_v51 }
  0xd4   :  { %vm202_vm4 = vmor %vm200_vm3, %vm201_vm2 }
  0xd5   :  { %v196_v53 = vmul.f32 %v2770_v51, %v195_v52 }
  0xd7   :  { %v197_v55 = vmul.f32 0.5, %v196_v53  ;;  %v452_v53 = vld [vmem:[%s3021_s24] sm:$0x7f]  ;;  %s4407_s24 = sld [smem:[#allocation16_spill]] }
  0xd9   :  { %v198_v56 = vsub.f32 1.5, %v197_v55  ;;  %v3205_v55 = vperm.slane %v452_v53, 1 }
  0xdb   :  { %v199_v57 = vmul.f32 %v2770_v51, %v198_v56 }
  0xdd   :  { %v203_v59 = vsel %vm202_vm4, %v2770_v51, %v199_v57  ;;  %v3208_v57 = vld [vmem:[%s3006_s8] ss:$0 sm:$0xff]  ;;  %s4406_s8 = sld [smem:[#allocation13_spill]] }
  0xde   :  { %v3183_v60 = vmul.f32 %v203_v59, %v193_v49  ;;  %v206_v61 = vmul.f32 %v205_v58, %v203_v59 }
  0xe0   :  { %v213_v62 = vmul.f32 %v211_v54, %v206_v61  ;;  %v3203_v54 = vperm.slane %v452_v53, 0  ;;  %v461_v61 = vmul.f32 0.0, %v3205_v55 }
  0xe2   :  { %v220_v0 = vadd.f32 %v3185_v63, %v213_v62  ;;  %v454_v59 = vmul.f32 0.0, %v3203_v54  ;;  %v3212_v62 = vperm.slane %v452_v53, 2 }
  0xe4   :  { %2546 = vmatmul.msk.f32.vlgmr.msra.gmra.mxu3 %vm174_vm0, %v220_v0  ;;  %2547 = vmatmul.msk.f32.vlgmr.msra.gmra.mxu1 %vm174_vm0, %v220_v0 }
  0xe5   :  { %2548 = vmatmul.msk.f32.vlgmr.msra.gmra.mxu2 %vm174_vm0, %v220_v0 }
  0xec   :  { %2549 = vmatmul.msk.f32.vlgmr.msrb.gmra.mxu3 %vm174_vm0, %v220_v0 }
 0x161   :  { %v294_v1 = vpop.f32.mrf.mxu1 }
 0x162   :  { %348 = vrot.lane.b32.xlu2 %v294_v1, %s2950_s0 }
 0x167   :  { %v252_v4 = vpop.f32.mrf.mxu3 }
 0x168   :  { %v314_v2 = vpop.f32.mrf.mxu2  ;;  %v253_v5 = vadd.f32 %v252_v4, %v230_v3  ;;  %v3218_v3 = vperm.slane %v452_v53, 3 }
 0x169   :  { %363 = vrot.lane.b32.xlu0 %v314_v2, %s2950_s0  ;;  %s2959_s0 = smov [#allocation7]  }
 0x16a   :  { %2771 = vtanh.f32 %v253_v5 }
 0x16f   :  { %v334_v37 = vpop.f32.mrf.mxu3 }
 0x170   :  { %v2772_v6 = vpop.eup %2771 }
 0x171   :  { %v256_v8 = vmul.f32 2.0, %v2772_v6 }
 0x173   :  { %v2550_v9 = vadd.f32 2.0, %v256_v8  ;;  %v2551_v10 = vadd.f32 1.0, %v256_v8  ;;  %v353_v13 = vand.u32 2147483647, %v256_v8  ;;  %v2553_v14 = vadd.f32 -2.0, %v256_v8 }
 0x174   :  { %v2552_v17 = vadd.f32 -1.0, %v256_v8 }
 0x175   :  { %v338_v11 = vand.u32 2147483647, %v2550_v9  ;;  %v344_v12 = vand.u32 2147483647, %v2551_v10  ;;  %v354_v18 = vsub.f32 1.0, %v353_v13 }
 0x176   :  { %v369_v20 = vand.u32 2147483647, %v2553_v14  ;;  %v359_v23 = vand.u32 2147483647, %v2552_v17  ;;  %v3236_v14 = vperm.slane %v452_v53, 6 }
 0x177   :  { %v339_v15 = vsub.f32 1.0, %v338_v11  ;;  %v345_v16 = vsub.f32 1.0, %v344_v12  ;;  %v355_v25 = vmax.f32 %v354_v18, 0.0  ;;  %v3229_v11 = vperm.slane %v452_v53, 4 }
 0x178   :  { %v370_v26 = vsub.f32 1.0, %v369_v20  ;;  %v360_v28 = vsub.f32 1.0, %v359_v23  ;;  %v3231_v12 = vperm.slane %v452_v53, 5 }
 0x179   :  { %v340_v21 = vmax.f32 %v339_v15, 0.0  ;;  %v346_v22 = vmax.f32 %v345_v16, 0.0  ;;  %v356_v30 = vmul.f32 %v355_v25, %v314_v2  ;;  %v476_v2 = vmul.f32 0.0, %v3212_v62 }
 0x17a   :  { %v371_v31 = vmax.f32 %v370_v26, 0.0  ;;  %v361_v32 = vmax.f32 %v360_v28, 0.0 }
 0x17b   :  { %v341_v27 = vmul.f32 %v340_v21, %v294_v1  ;;  %v468_v1 = vadd.f32 %v461_v61, %v454_v59 }
 0x17c   :  { %v372_v38 = vmul.f32 %v371_v31, %v334_v37 }
 0x17d   :  { %v484_v8 = vadd.f32 %v476_v2, %v468_v1 }
 0x1bc   :  { %v349_v19 = vpop.permute.xlu2 %348 }
 0x1bd   :  { %v351_v24 = vmul.f32 %v349_v19, %v346_v22 }
 0x1bf   :  { %v352_v29 = vadd.f32 %v351_v24, %v341_v27 }
 0x1c1   :  { %v357_v34 = vadd.f32 %v356_v30, %v352_v29 }
 0x1db   :  { %v364_v33 = vpop.permute.xlu0 %363 }
 0x1dc   :  { %v366_v36 = vmul.f32 %v364_v33, %v361_v32 }
 0x1de   :  { %v367_v39 = vadd.f32 %v366_v36, %v357_v34 }
 0x1e0   :  { %v373_v40 = vadd.f32 %v372_v38, %v367_v39 }
 0x1e2   :  { %383 = vrot.lane.b32.xlu0 %v373_v40, %s2951_s5  ;;  %377 = vrot.lane.b32.xlu2 %v373_v40, %s2952_s9  ;;  %s2496_s5 = sshll.u32 %s2959_s0, 4  ;;  %s2498_s9 = sshll.u32 %s3141_s19, 4  ;;  %s2497_s5 = int_to_ptr.vmem [resolvable:$true] %s2496_s5  ;;  %s2499_s9 = int_to_ptr.hbm [resolvable:$true] %s2498_s9 }
 0x1e3   :  { %375 = vrot.lane.b32.xlu1 %v373_v40, %s2953_s13  ;;  %2554 = vmatmul.msk.f32.vlgmr.msra.gmra.mxu0 %vm394_vm5, %v373_v40  ;;  %s2895_s13 = sshra.s32 %s2499_s9, 4  ;;  %s2896_s13 = int_to_ptr.hbm [resolvable:$true] %s2895_s13 }
 0x1e4   :  { %p2900_p1 = scmp.lt.s32.totalorder %s2896_s13, %s3141_s19 }
 0x1ea   :  { %385 = vrot.lane.b32.xlu2 %v373_v40, %s2954_s21  ;;  %s2897_s21 = scalar_lea.hbm %s2896_s13, 8 }
 0x1eb   :  { %379 = vrot.lane.b32.xlu1 %v373_v40, %s2955_s29  ;;  %p2898_p0 = scmp.ne.s32.totalorder %s2896_s13, %s2897_s21  ;;  %s2899_s29 = scalar_lea.hbm %s3141_s19, 8 }
 0x1ec   :  { %p2901_p2 = scmp.lt.s32.totalorder %s2899_s29, %s2897_s21 }
 0x1ee   :  { %p2902_p3 = por %p2901_p2, %p2900_p1 }
 0x1f0   :  { %p2903_p4 = pnand %p2902_p3, %p2898_p0 }
 0x1f2   :  { %387 = vrot.lane.b32.xlu2 %v373_v40, %s2956_s3 }
 0x1f3   :  { %381 = vrot.lane.b32.xlu1 %v373_v40, %s2957_s14 }
 0x1fa   :  { %1192 = vperm.xlu2 %2740, %v2743_v41   ;;  %v3301_v41 = vmul.f32 0.0, %v3229_v11 }
 0x1fb   :  { %645 = vperm.xlu1 %2739, %v2744_v42  }
 0x202   :  { %2482 = vperm.xlu2 %2740, %v2479_v43  }
 0x203   :  { %2118 = vperm.xlu1 %2739, %v2745_v44  }
 0x23c   :  { %v378_v45 = vpop.permute.xlu2 %377 }
 0x244   :  { %v386_v46 = vpop.permute.xlu2 %385 }
 0x245   :  { %2560 = vmatmul.msk.f32.vlgmr.msrb.gmra.mxu2 %vm394_vm5, %v386_v46 }
 0x24c   :  { %v388_v47 = vpop.permute.xlu2 %387 }
 0x24d   :  { %2561 = vmatmul.msk.f32.gmra.mxu2 %vm394_vm5, %v388_v47 }
 0x254   :  { %v384_v48 = vpop.permute.xlu0 %383 }
 0x255   :  { %v376_v49 = vpop.permute.xlu1 %375  ;;  %2559 = vmatmul.msk.f32.vlgmr.msrb.gmra.mxu1 %vm394_vm5, %v384_v48 }
 0x256   :  { %2555 = vmatmul.msk.f32.gmra.mxu0 %vm394_vm5, %v376_v49 }
 0x25d   :  { %v380_v50 = vpop.permute.xlu1 %379 }
 0x25e   :  { %2556 = vmatmul.msk.f32.gmra.mxu0 %vm394_vm5, %v378_v45 }
 0x260   :  { %v428_v52 = vpop.f32.mrf.mxu0 }
 0x261   :  { %v3215_v0 = vadd.f32 %v3208_v57, %v428_v52 }
 0x263   :  { %v462_v4 = vmul.f32 %v3205_v55, %v3215_v0  ;;  %v477_v7 = vmul.f32 %v3212_v62, %v3215_v0  ;;  %v493_v9 = vmul.f32 %v3218_v3, %v3215_v0  ;;  %v455_v17 = vmul.f32 %v3203_v54, %v3215_v0 }
 0x265   :  { %v382_v51 = vpop.permute.xlu1 %381  ;;  %v469_v18 = vadd.f32 %v462_v4, %v454_v59  ;;  %v485_v20 = vadd.f32 %v477_v7, %v468_v1  ;;  %v501_v21 = vadd.f32 %v493_v9, %v484_v8 }
 0x266   :  { %2557 = vmatmul.msk.f32.gmra.mxu0 %vm394_vm5, %v380_v50 }
 0x26e   :  { %2558 = vmatmul.msk.f32.gmra.mxu0 %vm394_vm5, %v382_v51 }
 0x2c8   :  { %v446_v56 = vpop.f32.mrf.mxu2 }
 0x2c9   :  { %v3227_v10 = vadd.f32 %v3208_v57, %v446_v56  ;;  %v3320_v56 = vld [vmem:[%s3026_s30] ss:$0 sm:$0xff]  ;;  %s4408_s30 = sld [smem:[#allocation14_spill]] }
 0x2cb   :  { %v3248_v22 = vmul.f32 %v3212_v62, %v3227_v10  ;;  %v3252_v23 = vmul.f32 %v3218_v3, %v3227_v10  ;;  %v3256_v24 = vmul.f32 %v3229_v11, %v3227_v10  ;;  %v3260_v25 = vmul.f32 %v3231_v12, %v3227_v10 }
 0x2cc   :  { %v3269_v28 = vmul.f32 %v3236_v14, %v3227_v10 }
 0x2d0   :  { %v449_v5 = vpop.f32.mrf.mxu2 }
 0x2d1   :  { %v3239_v15 = vadd.f32 %v3208_v57, %v449_v5 }
 0x2d2   :  { %v443_v16 = vpop.f32.mrf.mxu1 }
 0x2d3   :  { %v431_v58 = vpop.f32.mrf.mxu0  ;;  %v3265_v27 = vadd.f32 %v3208_v57, %v443_v16  ;;  %v3273_v29 = vmul.f32 %v3218_v3, %v3239_v15  ;;  %v3281_v32 = vmul.f32 %v3229_v11, %v3239_v15  ;;  %v3285_v33 = vmul.f32 %v3231_v12, %v3239_v15 }
 0x2d4   :  { %v3234_v13 = vadd.f32 %v3208_v57, %v431_v58  ;;  %v3289_v34 = vmul.f32 %v3236_v14, %v3239_v15 }
 0x2d5   :  { %v467_v43 = vmul.f32 %v3205_v55, %v3265_v27  ;;  %v482_v44 = vmul.f32 %v3212_v62, %v3265_v27  ;;  %v498_v45 = vmul.f32 %v3218_v3, %v3265_v27  ;;  %v514_v59 = vmul.f32 %v3229_v11, %v3265_v27 }
 0x2d6   :  { %v510_v26 = vmul.f32 %v3229_v11, %v3234_v13  ;;  %v463_v30 = vmul.f32 %v3205_v55, %v3234_v13  ;;  %v478_v31 = vmul.f32 %v3212_v62, %v3234_v13  ;;  %v456_v38 = vmul.f32 %v3203_v54, %v3234_v13 }
 0x2d7   :  { %v494_v39 = vmul.f32 %v3218_v3, %v3234_v13  ;;  %v530_v7 = vmul.f32 %v3231_v12, %v3265_v27  ;;  %v545_v8 = vmul.f32 %v3236_v14, %v3265_v27 }
 0x2d8   :  { %v518_v42 = vadd.f32 %v510_v26, %v501_v21  ;;  %v470_v46 = vadd.f32 %v463_v30, %v455_v17  ;;  %v486_v47 = vadd.f32 %v478_v31, %v469_v18 }
 0x2d9   :  { %v502_v58 = vadd.f32 %v494_v39, %v485_v20 }
 0x2db   :  { %v434_v6 = vpop.f32.mrf.mxu0 }
 0x2dc   :  { %v3244_v19 = vadd.f32 %v3208_v57, %v434_v6 }
 0x2de   :  { %v527_v36 = vmul.f32 %v3231_v12, %v3244_v19  ;;  %v464_v48 = vmul.f32 %v3205_v55, %v3244_v19  ;;  %v479_v49 = vmul.f32 %v3212_v62, %v3244_v19  ;;  %v495_v50 = vmul.f32 %v3218_v3, %v3244_v19 }
 0x2df   :  { %v511_v51 = vmul.f32 %v3229_v11, %v3244_v19  ;;  %v457_v9 = vmul.f32 %v3203_v54, %v3244_v19 }
 0x2e0   :  { %v534_v52 = vadd.f32 %v527_v36, %v518_v42  ;;  %v471_v16 = vadd.f32 %v464_v48, %v456_v38  ;;  %v487_v17 = vadd.f32 %v479_v49, %v470_v46  ;;  %v503_v18 = vadd.f32 %v495_v50, %v486_v47 }
 0x2e1   :  { %v519_v20 = vadd.f32 %v511_v51, %v502_v58 }
 0x2e3   :  { %v437_v37 = vpop.f32.mrf.mxu0 }
 0x2e4   :  { %v3298_v40 = vadd.f32 %v3208_v57, %v437_v37  ;;  %v533_v37 = vmul.f32 0.0, %v3231_v12 }
 0x2e6   :  { %v543_v53 = vmul.f32 %v3236_v14, %v3298_v40  ;;  %v465_v61 = vmul.f32 %v3205_v55, %v3298_v40  ;;  %v480_v1 = vmul.f32 %v3212_v62, %v3298_v40  ;;  %v496_v2 = vmul.f32 %v3218_v3, %v3298_v40 }
 0x2e7   :  { %v512_v4 = vmul.f32 %v3229_v11, %v3298_v40  ;;  %v528_v5 = vmul.f32 %v3231_v12, %v3298_v40  ;;  %v458_v30 = vmul.f32 %v3203_v54, %v3298_v40 }
 0x2e8   :  { %v549_v6 = vadd.f32 %v543_v53, %v534_v52  ;;  %v472_v31 = vadd.f32 %v465_v61, %v457_v9  ;;  %v488_v39 = vadd.f32 %v480_v1, %v471_v16  ;;  %v504_v42 = vadd.f32 %v496_v2, %v487_v17 }
 0x2e9   :  { %v520_v52 = vadd.f32 %v512_v4, %v503_v18  ;;  %v535_v38 = vadd.f32 %v528_v5, %v519_v20 }
 0x2ea   :  { %v3341_v21 = vadd.f32 %v3320_v56, %v549_v6 }
 0x2eb   :  { %v440_v26 = vpop.f32.mrf.mxu0 }
 0x2ec   :  { %v3346_v36 = vadd.f32 %v3208_v57, %v440_v26  ;;  %v2631_v26 = vld [vmem:[%s3041_s18] sm:$0xff]  }
 0x2ee   :  { %v459_v46 = vmul.f32 %v3203_v54, %v3346_v36  ;;  %v466_v47 = vmul.f32 %v3205_v55, %v3346_v36  ;;  %v481_v48 = vmul.f32 %v3212_v62, %v3346_v36  ;;  %v497_v49 = vmul.f32 %v3218_v3, %v3346_v36 }
 0x2ef   :  { %v513_v57 = vmul.f32 %v3229_v11, %v3346_v36  ;;  %v529_v50 = vmul.f32 %v3231_v12, %v3346_v36  ;;  %v544_v51 = vmul.f32 %v3236_v14, %v3346_v36  ;;  %v578_v54 = vmul.f32 0.044715, %v3341_v21 }
 0x2f0   :  { %v473_v53 = vadd.f32 %v466_v47, %v458_v30  ;;  %v474_v58 = vadd.f32 %v467_v43, %v459_v46  ;;  %v489_v55 = vadd.f32 %v481_v48, %v472_v31  ;;  %v505_v61 = vadd.f32 %v497_v49, %v488_v39 }
 0x2f1   :  { %v521_v1 = vadd.f32 %v513_v57, %v504_v42  ;;  %v536_v62 = vadd.f32 %v529_v50, %v520_v52  ;;  %v548_v3 = vmul.f32 0.0, %v3236_v14  ;;  %v550_v2 = vadd.f32 %v544_v51, %v535_v38 }
 0x2f2   :  { %v490_v11 = vadd.f32 %v482_v44, %v473_v53  ;;  %v491_v4 = vadd.f32 %v3248_v22, %v474_v58  ;;  %v506_v12 = vadd.f32 %v498_v45, %v489_v55  ;;  %v522_v5 = vadd.f32 %v514_v59, %v505_v61  ;;  %v2678_v44 = vld [vmem:[%s3041_s18 + $0x8] sm:$0xff]   ;;  %s4411_s18 = sld [smem:[#allocation20_spill]] }
 0x2f3   :  { %v537_v6 = vadd.f32 %v530_v7, %v521_v1  ;;  %v551_v9 = vadd.f32 %v545_v8, %v536_v62  ;;  %v3367_v16 = vadd.f32 %v3320_v56, %v550_v2  ;;  %v586_v43 = vmul.f32 %v578_v54, %v3341_v21 }
 0x2f4   :  { %v507_v17 = vadd.f32 %v3252_v23, %v490_v11  ;;  %v508_v18 = vadd.f32 %v3273_v29, %v491_v4  ;;  %v523_v20 = vadd.f32 %v3256_v24, %v506_v12  ;;  %v538_v14 = vadd.f32 %v3260_v25, %v522_v5 }
 0x2f5   :  { %v552_v22 = vadd.f32 %v3269_v28, %v537_v6  ;;  %v3378_v45 = vadd.f32 %v3320_v56, %v551_v9  ;;  %v2637_v59 = vunpack.c.h.bf16 %v2678_v44  ;;  %v2636_v7 = vunpack.c.l.bf16 %v2678_v44 }
 0x2f6   :  { %v524_v8 = vadd.f32 %v3281_v32, %v507_v17  ;;  %v525_v30 = vadd.f32 %v3301_v41, %v508_v18  ;;  %v539_v23 = vadd.f32 %v3285_v33, %v523_v20  ;;  %v553_v29 = vadd.f32 %v3289_v34, %v538_v14 }
 0x2f7   :  { %v3385_v24 = vadd.f32 %v3320_v56, %v552_v22  ;;  %840 = vmatpush.msra.mxu1 %v2637_v59  ;;  %v2633_v25 = vunpack.c.h.bf16 %v2631_v26  ;;  %v594_v28 = vmul.f32 %v586_v43, %v3341_v21  ;;  %v2632_v32 = vunpack.c.l.bf16 %v2631_v26 }
 0x2f8   :  { %v540_v31 = vadd.f32 %v533_v37, %v524_v8  ;;  %v541_v39 = vadd.f32 %v533_v37, %v525_v30  ;;  %v554_v42 = vadd.f32 %v548_v3, %v539_v23  ;;  %v3389_v52 = vadd.f32 %v3320_v56, %v553_v29 }
 0x2f9   :  { %841 = vmatpush.msra.mxu1 %v2636_v7  ;;  %v579_v41 = vmul.f32 0.044715, %v3367_v16  ;;  %v580_v33 = vmul.f32 0.044715, %v3378_v45  ;;  %v581_v37 = vmul.f32 0.044715, %v3385_v24  ;;  %v602_v54 = vadd.f32 %v594_v28, %v3341_v21 }
 0x2fa   :  { %v555_v34 = vadd.f32 %v548_v3, %v540_v31  ;;  %v556_v38 = vadd.f32 %v548_v3, %v541_v39  ;;  %v3394_v46 = vadd.f32 %v3320_v56, %v554_v42  ;;  %v582_v47 = vmul.f32 0.044715, %v3389_v52 }
 0x2fb   :  { %842 = vmatpush.msra.mxu1 %v2633_v25  ;;  %v587_v48 = vmul.f32 %v579_v41, %v3367_v16  ;;  %v588_v49 = vmul.f32 %v580_v33, %v3378_v45  ;;  %v589_v58 = vmul.f32 %v581_v37, %v3385_v24  ;;  %v610_v6 = vmul.f32 0.7978846, %v602_v54 }
 0x2fc   :  { %v567_v57 = vadd.f32 %v3320_v56, %v555_v34  ;;  %v568_v50 = vadd.f32 %v3320_v56, %v556_v38  ;;  %v583_v51 = vmul.f32 0.044715, %v3394_v46  ;;  %v590_v53 = vmul.f32 %v582_v47, %v3389_v52 }
 0x2fd   :  { %843 = vmatpush.msra.mxu1 %v2632_v32  ;;  %v595_v55 = vmul.f32 %v587_v48, %v3367_v16  ;;  %v596_v61 = vmul.f32 %v588_v49, %v3378_v45  ;;  %v597_v56 = vmul.f32 %v589_v58, %v3385_v24  ;;  %2773 = vtanh.f32 %v610_v6 }
 0x2fe   :  { %v585_v1 = vmul.f32 0.044715, %v568_v50  ;;  %v584_v62 = vmul.f32 0.044715, %v567_v57  ;;  %v598_v3 = vmul.f32 %v590_v53, %v3389_v52  ;;  %v591_v2 = vmul.f32 %v583_v51, %v3394_v46  ;;  %v646_v51 = vpop.permute.xlu1 %645 }
 0x2ff   :  { %v603_v11 = vadd.f32 %v595_v55, %v3367_v16  ;;  %v604_v5 = vadd.f32 %v596_v61, %v3378_v45  ;;  %v605_v17 = vadd.f32 %v597_v56, %v3385_v24  ;;  %v570_v31 = vmul.f32 0.5, %v3341_v21 }
 0x300   :  { %v592_v4 = vmul.f32 %v584_v62, %v567_v57  ;;  %v593_v12 = vmul.f32 %v585_v1, %v568_v50  ;;  %v606_v9 = vadd.f32 %v598_v3, %v3389_v52  ;;  %v599_v43 = vmul.f32 %v591_v2, %v3394_v46 }
 0x301   :  { %v611_v18 = vmul.f32 0.7978846, %v603_v11  ;;  %v612_v44 = vmul.f32 0.7978846, %v604_v5  ;;  %v613_v59 = vmul.f32 0.7978846, %v605_v17 }
 0x302   :  { %v600_v20 = vmul.f32 %v592_v4, %v567_v57  ;;  %v601_v14 = vmul.f32 %v593_v12, %v568_v50  ;;  %v614_v26 = vmul.f32 0.7978846, %v606_v9  ;;  %v607_v22 = vadd.f32 %v599_v43, %v3394_v46 }
 0x303   :  { %2775 = vtanh.f32 %v611_v18  ;;  %v2774_v25 = vpop.eup %2773  ;;  %v571_v32 = vmul.f32 0.5, %v3367_v16  ;;  %v572_v41 = vmul.f32 0.5, %v3378_v45  ;;  %v573_v33 = vmul.f32 0.5, %v3385_v24 }
 0x304   :  { %v608_v7 = vadd.f32 %v600_v20, %v567_v57  ;;  %v609_v8 = vadd.f32 %v601_v14, %v568_v50  ;;  %2777 = vtanh.f32 %v612_v44  ;;  %v615_v30 = vmul.f32 0.7978846, %v607_v22 }
 0x305   :  { %2779 = vtanh.f32 %v614_v26  ;;  %v626_v39 = vadd.f32 1.0, %v2774_v25  ;;  %v574_v47 = vmul.f32 0.5, %v3389_v52  ;;  %v575_v21 = vmul.f32 0.5, %v3394_v46 }
 0x306   :  { %v616_v23 = vmul.f32 0.7978846, %v608_v7  ;;  %v617_v29 = vmul.f32 0.7978846, %v609_v8  ;;  %2781 = vtanh.f32 %v613_v59  ;;  %v576_v53 = vmul.f32 0.5, %v567_v57 }
 0x307   :  { %2783 = vtanh.f32 %v615_v30  ;;  %v634_v48 = vmul.f32 %v626_v39, %v570_v31  ;;  %v577_v61 = vmul.f32 0.5, %v568_v50  ;;  %v2958_v56 = vmov 64.0  }
 0x308   :  { %2785 = vtanh.f32 %v616_v23 }
 0x309   :  { %v2776_v28 = vpop.eup %2775  ;;  %2787 = vtanh.f32 %v617_v29  ;;  %v648_v45 = vmul.f32 %v646_v51, %v634_v48 }
 0x30a   :  { %v2778_v42 = vpop.eup %2777  ;;  %v627_v34 = vadd.f32 1.0, %v2776_v28  ;;  %2789 = vrcp.f32 %v2958_v56 }
 0x30b   :  { %v2780_v38 = vpop.eup %2779  ;;  %v628_v37 = vadd.f32 1.0, %v2778_v42  ;;  %v3424_v5 = vadd.f32 %v648_v45, %v3215_v0 }
 0x30c   :  { %v2782_v49 = vpop.eup %2781  ;;  %v630_v54 = vadd.f32 1.0, %v2780_v38  ;;  %v635_v58 = vmul.f32 %v627_v34, %v571_v32 }
 0x30d   :  { %v2784_v55 = vpop.eup %2783  ;;  %v629_v16 = vadd.f32 1.0, %v2782_v49  ;;  %v636_v1 = vmul.f32 %v628_v37, %v572_v41  ;;  %v666_v18 = vsel %vm174_vm0, %v3424_v5, 0.0  ;;  %v695_v29 = vmul.f32 %v3424_v5, %v3424_v5 }
 0x30e   :  { %v2786_v62 = vpop.eup %2785  ;;  %v638_v24 = vmul.f32 %v630_v54, %v574_v47  ;;  %v631_v3 = vadd.f32 1.0, %v2784_v55  ;;  %v649_v2 = vmul.f32 %v646_v51, %v635_v58 }
 0x30f   :  { %v2788_v52 = vpop.eup %2787  ;;  %v632_v11 = vadd.f32 1.0, %v2786_v62  ;;  %v637_v4 = vmul.f32 %v629_v16, %v573_v33  ;;  %v650_v12 = vmul.f32 %v646_v51, %v636_v1  ;;  %v703_v34 = vsel %vm174_vm0, %v695_v29, 0.0 }
 0x310   :  { %v652_v46 = vmul.f32 %v646_v51, %v638_v24  ;;  %v633_v57 = vadd.f32 1.0, %v2788_v52  ;;  %v639_v6 = vmul.f32 %v631_v3, %v575_v21  ;;  %v3427_v50 = vadd.f32 %v649_v2, %v3234_v13  ;;  %v2790_v59 = vpop.eup %2789 }
 0x311   :  { %v640_v9 = vmul.f32 %v632_v11, %v576_v53  ;;  %v651_v43 = vmul.f32 %v646_v51, %v637_v4  ;;  %v3430_v17 = vadd.f32 %v650_v12, %v3244_v19  ;;  %v688_v41 = vmul.f32 64.0, %v2790_v59 }
 0x312   :  { %v3435_v20 = vadd.f32 %v652_v46, %v3346_v36  ;;  %v641_v14 = vmul.f32 %v633_v57, %v577_v61  ;;  %v653_v0 = vmul.f32 %v646_v51, %v639_v6  ;;  %v667_v44 = vsel %vm174_vm0, %v3427_v50, 0.0 }
 0x313   :  { %v654_v26 = vmul.f32 %v646_v51, %v640_v9  ;;  %v3440_v13 = vadd.f32 %v651_v43, %v3298_v40  ;;  %v668_v22 = vadd.f32 %v667_v44, %v666_v18  ;;  %v669_v19 = vsel %vm174_vm0, %v3430_v17, 0.0 }
 0x314   :  { %v3445_v7 = vadd.f32 %v653_v0, %v3265_v27  ;;  %v655_v8 = vmul.f32 %v646_v51, %v641_v14  ;;  %v673_v40 = vsel %vm174_vm0, %v3435_v20, 0.0  ;;  %v696_v28 = vmul.f32 %v3427_v50, %v3427_v50 }
 0x315   :  { %v670_v36 = vadd.f32 %v669_v19, %v668_v22  ;;  %v671_v30 = vsel %vm174_vm0, %v3440_v13, 0.0  ;;  %v3450_v23 = vadd.f32 %v654_v26, %v3227_v10  ;;  %v697_v31 = vmul.f32 %v3430_v17, %v3430_v17 }
 0x316   :  { %v675_v27 = vsel %vm174_vm0, %v3445_v7, 0.0  ;;  %v698_v10 = vmul.f32 %v3440_v13, %v3440_v13  ;;  %v699_v39 = vmul.f32 %v3435_v20, %v3435_v20  ;;  %v3467_v42 = vadd.f32 %v655_v8, %v3239_v15 }
 0x317   :  { %v672_v25 = vadd.f32 %v671_v30, %v670_v36  ;;  %v677_v33 = vsel %vm174_vm0, %v3450_v23, 0.0  ;;  %v704_v38 = vsel %vm174_vm0, %v696_v28, 0.0  ;;  %v706_v47 = vsel %vm174_vm0, %v697_v31, 0.0 }
 0x318   :  { %v705_v48 = vadd.f32 %v704_v38, %v703_v34  ;;  %v700_v49 = vmul.f32 %v3445_v7, %v3445_v7  ;;  %v708_v51 = vsel %vm174_vm0, %v698_v10, 0.0  ;;  %v679_v21 = vsel %vm174_vm0, %v3467_v42, 0.0  ;;  %v2749_v34 = vld [vmem:[%s4405_s17] ss:$0 sm:$0xff] }
 0x319   :  { %v674_v32 = vadd.f32 %v673_v40, %v672_v25  ;;  %v689_v53 = vsub.f32 1.0, %v688_v41  ;;  %v701_v58 = vmul.f32 %v3450_v23, %v3450_v23  ;;  %v710_v55 = vsel %vm174_vm0, %v699_v39, 0.0 }
 0x31a   :  { %v707_v54 = vadd.f32 %v706_v47, %v705_v48  ;;  %v712_v1 = vsel %vm174_vm0, %v700_v49, 0.0  ;;  %v702_v3 = vmul.f32 %v3467_v42, %v3467_v42  ;;  %vm692_vm6 = vweird.f32 %v2790_v59 }
 0x31b   :  { %v676_v37 = vadd.f32 %v675_v27, %v674_v32  ;;  %v690_v24 = vmul.f32 %v2790_v59, %v689_v53  ;;  %v714_v2 = vsel %vm174_vm0, %v701_v58, 0.0 }
 0x31c   :  { %v709_v16 = vadd.f32 %v708_v51, %v707_v54  ;;  %v716_v46 = vsel %vm174_vm0, %v702_v3, 0.0 }
 0x31d   :  { %v678_v15 = vadd.f32 %v677_v33, %v676_v37  ;;  %v691_v12 = vadd.f32 %v2790_v59, %v690_v24 }
 0x31e   :  { %v711_v62 = vadd.f32 %v710_v55, %v709_v16 }
 0x31f   :  { %v680_v61 = vadd.f32 %v679_v21, %v678_v15  ;;  %v3487_v18 = vsel %vm692_vm6, %v2790_v59, %v691_v12 }
 0x320   :  { %v713_v52 = vadd.f32 %v712_v1, %v711_v62 }
 0x321   :  { %v681_v45 = vrot.slane %v680_v61, 4 }
 0x322   :  { %v715_v4 = vadd.f32 %v714_v2, %v713_v52 }
 0x323   :  { %v682_v56 = vadd.f32 %v681_v45, %v680_v61 }
 0x324   :  { %v717_v6 = vadd.f32 %v716_v46, %v715_v4  ;;  %v2750_v46 = vld [vmem:[%s4406_s8] ss:$0 sm:$0xff] }
 0x325   :  { %v683_v11 = vrot.slane %v682_v56, 2 }
 0x326   :  { %v718_v43 = vrot.slane %v717_v6, 4 }
 0x327   :  { %v684_v57 = vadd.f32 %v683_v11, %v682_v56 }
 0x328   :  { %v719_v0 = vadd.f32 %v718_v43, %v717_v6 }
 0x329   :  { %v685_v9 = vrot.slane %v684_v57, 1 }
 0x32a   :  { %v720_v26 = vrot.slane %v719_v0, 2 }
 0x32b   :  { %v686_v14 = vadd.f32 %v685_v9, %v684_v57 }
 0x32c   :  { %v721_v22 = vadd.f32 %v720_v26, %v719_v0 }
 0x32d   :  { %v694_v44 = vmul.f32 %v3487_v18, %v686_v14 }
 0x32e   :  { %v722_v19 = vrot.slane %v721_v22, 1 }
 0x32f   :  { %v733_v8 = vsub.f32 %v3450_v23, %v694_v44  ;;  %v734_v36 = vsub.f32 %v3467_v42, %v694_v44  ;;  %v725_v40 = vmul.f32 %v694_v44, %v694_v44  ;;  %v727_v23 = vsub.f32 %v3424_v5, %v694_v44  ;;  %v2748_v42 = vld [vmem:[%s3031_s6] ss:$0 sm:$0xff]  ;;  %s4409_s6 = sld [smem:[#allocation15_spill]] }
 0x330   :  { %v723_v30 = vadd.f32 %v722_v19, %v721_v22  ;;  %v728_v47 = vsub.f32 %v3427_v50, %v694_v44  ;;  %v729_v51 = vsub.f32 %v3430_v17, %v694_v44  ;;  %v730_v21 = vsub.f32 %v3440_v13, %v694_v44 }
 0x331   :  { %v731_v55 = vsub.f32 %v3435_v20, %v694_v44  ;;  %v732_v1 = vsub.f32 %v3445_v7, %v694_v44 }
 0x332   :  { %v724_v29 = vmul.f32 %v723_v30, %v3487_v18 }
 0x334   :  { %v726_v25 = vsub.f32 %v724_v29, %v725_v40 }
 0x336   :  { %v735_v59 = vadd.f32 1e-05, %v726_v25 }
 0x338   :  { %2791 = vrsqrt.f32 %v735_v59  ;;  %vm742_vm8 = vweird.f32 %v735_v59 }
 0x33e   :  { %v2792_v28 = vpop.eup %2791 }
 0x33f   :  { %v737_v27 = vmul.f32 %v2792_v28, %v735_v59  ;;  %vm743_vm7 = vweird.f32 %v2792_v28 }
 0x340   :  { %vm744_vm9 = vmor %vm742_vm8, %vm743_vm7 }
 0x341   :  { %v738_v31 = vmul.f32 %v2792_v28, %v737_v27 }
 0x343   :  { %v739_v10 = vmul.f32 0.5, %v738_v31 }
 0x345   :  { %v740_v39 = vsub.f32 1.5, %v739_v10 }
 0x347   :  { %v741_v32 = vmul.f32 %v2792_v28, %v740_v39 }
 0x349   :  { %v745_v41 = vsel %vm744_vm9, %v2792_v28, %v741_v32 }
 0x34a   :  { %v746_v33 = vmul.f32 %v745_v41, %v727_v23  ;;  %v747_v48 = vmul.f32 %v745_v41, %v728_v47  ;;  %v748_v5 = vmul.f32 %v745_v41, %v729_v51  ;;  %v749_v50 = vmul.f32 %v745_v41, %v730_v21 }
 0x34b   :  { %v750_v17 = vmul.f32 %v745_v41, %v731_v55  ;;  %v751_v13 = vmul.f32 %v745_v41, %v732_v1  ;;  %v752_v20 = vmul.f32 %v745_v41, %v733_v8  ;;  %v753_v56 = vmul.f32 %v745_v41, %v734_v36 }
 0x34c   :  { %v757_v38 = vmul.f32 %v2748_v42, %v746_v33  ;;  %v758_v49 = vmul.f32 %v2748_v42, %v747_v48  ;;  %v759_v54 = vmul.f32 %v2748_v42, %v748_v5  ;;  %v760_v58 = vmul.f32 %v2748_v42, %v749_v50 }
 0x34d   :  { %v761_v16 = vmul.f32 %v2748_v42, %v750_v17  ;;  %v762_v62 = vmul.f32 %v2748_v42, %v751_v13  ;;  %v763_v3 = vmul.f32 %v2748_v42, %v752_v20  ;;  %v764_v7 = vmul.f32 %v2748_v42, %v753_v56 }
 0x34e   :  { %v3497_v37 = vadd.f32 %v2749_v34, %v757_v38  ;;  %v3502_v15 = vadd.f32 %v2749_v34, %v758_v49  ;;  %v3507_v53 = vadd.f32 %v2749_v34, %v759_v54  ;;  %v3512_v61 = vadd.f32 %v2749_v34, %v760_v58 }
 0x34f   :  { %v3517_v45 = vadd.f32 %v2749_v34, %v761_v16  ;;  %v3521_v24 = vadd.f32 %v2749_v34, %v762_v62  ;;  %v3525_v2 = vadd.f32 %v2749_v34, %v763_v3  ;;  %v3529_v52 = vadd.f32 %v2749_v34, %v764_v7 }
 0x350   :  { %2562 = vmatmul.msk.f32.vlgmr.msra.gmra.mxu1 %vm174_vm0, %v3497_v37 }
 0x358   :  { %2563 = vmatmul.msk.f32.gmra.mxu1 %vm174_vm0, %v3502_v15 }
 0x360   :  { %2564 = vmatmul.msk.f32.gmra.mxu1 %vm174_vm0, %v3507_v53 }
 0x368   :  { %2565 = vmatmul.msk.f32.gmra.mxu1 %vm174_vm0, %v3512_v61 }
 0x370   :  { %2566 = vmatmul.msk.f32.gmra.mxu1 %vm174_vm0, %v3517_v45 }
 0x378   :  { %2567 = vmatmul.msk.f32.gmra.mxu1 %vm174_vm0, %v3521_v24 }
 0x380   :  { %2568 = vmatmul.msk.f32.gmra.mxu1 %vm174_vm0, %v3525_v2 }
 0x388   :  { %2569 = vmatmul.msk.f32.gmra.mxu1 %vm174_vm0, %v3529_v52 }
 0x3cd   :  { %v845_v11 = vpop.f32.mrf.mxu1 }
 0x3ce   :  { %v846_v6 = vadd.f32 %v2750_v46, %v845_v11 }
 0x3d0   :  { %v877_v44 = vmul.f32 0.044715, %v846_v6 }
 0x3d2   :  { %v885_v8 = vmul.f32 %v877_v44, %v846_v6 }
 0x3d4   :  { %v893_v28 = vmul.f32 %v885_v8, %v846_v6 }
 0x3d5   :  { %v848_v4 = vpop.f32.mrf.mxu1 }
 0x3d6   :  { %v849_v57 = vadd.f32 %v2750_v46, %v848_v4  ;;  %v901_v32 = vadd.f32 %v893_v28, %v846_v6 }
 0x3d8   :  { %v878_v14 = vmul.f32 0.044715, %v849_v57  ;;  %v909_v48 = vmul.f32 0.7978846, %v901_v32 }
 0x3da   :  { %v886_v22 = vmul.f32 %v878_v14, %v849_v57 }
 0x3dc   :  { %v894_v29 = vmul.f32 %v886_v22, %v849_v57 }
 0x3dd   :  { %v851_v12 = vpop.f32.mrf.mxu1 }
 0x3de   :  { %v852_v43 = vadd.f32 %v2750_v46, %v851_v12  ;;  %v902_v10 = vadd.f32 %v894_v29, %v849_v57 }
 0x3e0   :  { %v879_v26 = vmul.f32 0.044715, %v852_v43  ;;  %v910_v34 = vmul.f32 0.7978846, %v902_v10  ;;  %v871_v29 = vmul.f32 0.5, %v852_v43 }
 0x3e2   :  { %v887_v30 = vmul.f32 %v879_v26, %v852_v43  ;;  %2793 = vtanh.f32 %v910_v34 }
 0x3e3   :  { %2795 = vtanh.f32 %v909_v48 }
 0x3e4   :  { %v895_v27 = vmul.f32 %v887_v30, %v852_v43 }
 0x3e5   :  { %v854_v9 = vpop.f32.mrf.mxu1 }
 0x3e6   :  { %v3534_v0 = vadd.f32 %v2750_v46, %v854_v9  ;;  %v903_v42 = vadd.f32 %v895_v27, %v852_v43  ;;  %v870_v9 = vmul.f32 0.5, %v849_v57 }
 0x3e8   :  { %v880_v19 = vmul.f32 0.044715, %v3534_v0  ;;  %v911_v49 = vmul.f32 0.7978846, %v903_v42  ;;  %v2794_v13 = vpop.eup %2793  ;;  %v872_v57 = vmul.f32 0.5, %v3534_v0 }
 0x3e9   :  { %v2796_v20 = vpop.eup %2795  ;;  %v926_v56 = vadd.f32 1.0, %v2794_v13 }
 0x3ea   :  { %v888_v25 = vmul.f32 %v880_v19, %v3534_v0  ;;  %2797 = vtanh.f32 %v911_v49  ;;  %v925_v12 = vadd.f32 1.0, %v2796_v20  ;;  %v869_v19 = vmul.f32 0.5, %v846_v6 }
 0x3eb   :  { %v3546_v8 = vmul.f32 %v926_v56, %v870_v9 }
 0x3ec   :  { %v896_v39 = vmul.f32 %v888_v25, %v3534_v0  ;;  %v3548_v28 = vmul.f32 %v925_v12, %v869_v19 }
 0x3ed   :  { %v857_v36 = vpop.f32.mrf.mxu1 }
 0x3ee   :  { %v3537_v40 = vadd.f32 %v2750_v46, %v857_v36  ;;  %v904_v38 = vadd.f32 %v896_v39, %v3534_v0  ;;  %v944_v48 = vsel %vm943_vm10, %v3548_v28, 0.0 }
 0x3f0   :  { %v881_v59 = vmul.f32 0.044715, %v3537_v40  ;;  %v912_v54 = vmul.f32 0.7978846, %v904_v38  ;;  %v2798_v3 = vpop.eup %2797  ;;  %v873_v43 = vmul.f32 0.5, %v3537_v40 }
 0x3f1   :  { %v927_v26 = vadd.f32 1.0, %v2798_v3 }
 0x3f2   :  { %v889_v31 = vmul.f32 %v881_v59, %v3537_v40  ;;  %2799 = vtanh.f32 %v912_v54 }
 0x3f4   :  { %v897_v41 = vmul.f32 %v889_v31, %v3537_v40  ;;  %v3550_v31 = vmul.f32 %v927_v26, %v871_v29 }
 0x3f5   :  { %v860_v23 = vpop.f32.mrf.mxu1 }
 0x3f6   :  { %v861_v33 = vadd.f32 %v2750_v46, %v860_v23  ;;  %v905_v51 = vadd.f32 %v897_v41, %v3537_v40  ;;  %v966_v23 = vmul.f32 %v3548_v28, %v3548_v28  ;;  %v945_v41 = vsel %vm943_vm10, %v3546_v8, 0.0 }
 0x3f7   :  { %v968_v0 = vmul.f32 %v3550_v31, %v3550_v31  ;;  %v947_v49 = vsel %vm943_vm10, %v3550_v31, 0.0 }
 0x3f8   :  { %v882_v47 = vmul.f32 0.044715, %v861_v33  ;;  %v913_v58 = vmul.f32 0.7978846, %v905_v51  ;;  %v2800_v4 = vpop.eup %2799  ;;  %v874_v38 = vmul.f32 0.5, %v861_v33 }
 0x3f9   :  { %v928_v25 = vadd.f32 1.0, %v2800_v4 }
 0x3fa   :  { %v890_v5 = vmul.f32 %v882_v47, %v861_v33  ;;  %2801 = vtanh.f32 %v913_v58  ;;  %v974_v58 = vsel %vm943_vm10, %v966_v23, 0.0 }
 0x3fb   :  { %v3555_v39 = vmul.f32 %v928_v25, %v872_v57 }
 0x3fc   :  { %v898_v21 = vmul.f32 %v890_v5, %v861_v33 }
 0x3fd   :  { %v863_v50 = vpop.f32.mrf.mxu1  ;;  %v969_v5 = vmul.f32 %v3555_v39, %v3555_v39 }
 0x3fe   :  { %v906_v55 = vadd.f32 %v898_v21, %v861_v33  ;;  %v864_v17 = vadd.f32 %v2750_v46, %v863_v50  ;;  %v946_v33 = vadd.f32 %v945_v41, %v944_v48  ;;  %v2679_v48 = vld [vmem:[%s4407_s24 + $0x8] sm:$0xff]  }
 0x3ff   :  { %v979_v3 = vsel %vm943_vm10, %v969_v5, 0.0 }
 0x400   :  { %v914_v16 = vmul.f32 0.7978846, %v906_v55  ;;  %v883_v1 = vmul.f32 0.044715, %v864_v17  ;;  %v2802_v22 = vpop.eup %2801  ;;  %v875_v21 = vmul.f32 0.5, %v864_v17  ;;  %v977_v55 = vsel %vm943_vm10, %v968_v0, 0.0 }
 0x401   :  { %v929_v10 = vadd.f32 1.0, %v2802_v22  ;;  %v948_v20 = vadd.f32 %v947_v49, %v946_v33 }
 0x402   :  { %v891_v62 = vmul.f32 %v883_v1, %v864_v17  ;;  %2803 = vtanh.f32 %v914_v16  ;;  %v949_v16 = vsel %vm943_vm10, %v3555_v39, 0.0 }
 0x403   :  { %v3564_v34 = vmul.f32 %v929_v10, %v873_v43  ;;  %v2681_v10 = vld [vmem:[%s4407_s24 + $0x18] sm:$0xff]  }
 0x404   :  { %v899_v7 = vmul.f32 %v891_v62, %v864_v17  ;;  %v2652_v23 = vunpack.c.l.bf16 %v2681_v10 }
 0x405   :  { %v866_v11 = vpop.f32.mrf.mxu1  ;;  %v970_v1 = vmul.f32 %v3564_v34, %v3564_v34 }
 0x406   :  { %v907_v14 = vadd.f32 %v899_v7, %v864_v17  ;;  %v867_v44 = vadd.f32 %v2750_v46, %v866_v11  ;;  %v967_v46 = vmul.f32 %v3546_v8, %v3546_v8  ;;  %v951_v17 = vsel %vm943_vm10, %v3564_v34, 0.0 }
 0x407   :  { %v950_v11 = vadd.f32 %v949_v16, %v948_v20  ;;  %v981_v4 = vsel %vm943_vm10, %v970_v1, 0.0  ;;  %v2644_v16 = vunpack.c.l.bf16 %v2679_v48 }
 0x408   :  { %v915_v36 = vmul.f32 0.7978846, %v907_v14  ;;  %v884_v30 = vmul.f32 0.044715, %v867_v44  ;;  %v2804_v59 = vpop.eup %2803  ;;  %v975_v40 = vsel %vm943_vm10, %v967_v46, 0.0  ;;  %v2680_v46 = vld [vmem:[%s4407_s24 + $0x10] sm:$0xff]  }
 0x409   :  { %v930_v32 = vadd.f32 1.0, %v2804_v59  ;;  %v976_v62 = vadd.f32 %v975_v40, %v974_v58  ;;  %v952_v22 = vadd.f32 %v951_v17, %v950_v11  ;;  %v2639_v58 = vld [vmem:[%s4407_s24] sm:$0xff]  }
 0x40a   :  { %2805 = vtanh.f32 %v915_v36  ;;  %v892_v27 = vmul.f32 %v884_v30, %v867_v44  ;;  %v876_v30 = vmul.f32 0.5, %v867_v44  ;;  %v2641_v20 = vunpack.c.h.bf16 %v2639_v58 }
 0x40b   :  { %v3573_v54 = vmul.f32 %v930_v32, %v874_v38  ;;  %v978_v7 = vadd.f32 %v977_v55, %v976_v62  ;;  %v2653_v32 = vunpack.c.h.bf16 %v2681_v10  ;;  %v2649_v38 = vunpack.c.h.bf16 %v2680_v46 }
 0x40c   :  { %v900_v6 = vmul.f32 %v892_v27, %v867_v44 }
 0x40d   :  { %v971_v56 = vmul.f32 %v3573_v54, %v3573_v54  ;;  %v953_v12 = vsel %vm943_vm10, %v3573_v54, 0.0  ;;  %v980_v26 = vadd.f32 %v979_v3, %v978_v7  ;;  %1083 = vmatpush.msra.mxu2 %v2653_v32 }
 0x40e   :  { %v908_v42 = vadd.f32 %v900_v6, %v867_v44  ;;  %v954_v59 = vadd.f32 %v953_v12, %v952_v22 }
 0x40f   :  { %v983_v19 = vsel %vm943_vm10, %v971_v56, 0.0  ;;  %v982_v25 = vadd.f32 %v981_v4, %v980_v26  ;;  %1084 = vmatpush.msra.mxu2 %v2652_v23  ;;  %v2640_v56 = vunpack.c.l.bf16 %v2639_v58 }
 0x410   :  { %v2806_v47 = vpop.eup %2805  ;;  %v916_v51 = vmul.f32 0.7978846, %v908_v42 }
 0x411   :  { %v931_v50 = vadd.f32 1.0, %v2806_v47  ;;  %v984_v6 = vadd.f32 %v983_v19, %v982_v25  ;;  %1085 = vmatpush.msra.mxu2 %v2649_v38 }
 0x412   :  { %2807 = vtanh.f32 %v916_v51  ;;  %v2648_v51 = vunpack.c.l.bf16 %v2680_v46 }
 0x413   :  { %v3581_v13 = vmul.f32 %v931_v50, %v875_v21  ;;  %v2645_v50 = vunpack.c.h.bf16 %v2679_v48 }
 0x414   :  { %1086 = vmatpush.msra.mxu2 %v2648_v51 }
 0x415   :  { %v972_v9 = vmul.f32 %v3581_v13, %v3581_v13  ;;  %v955_v36 = vsel %vm943_vm10, %v3581_v13, 0.0 }
 0x416   :  { %v956_v43 = vadd.f32 %v955_v36, %v954_v59  ;;  %1087 = vmatpush.msra.mxu2 %v2645_v50 }
 0x417   :  { %v985_v27 = vsel %vm943_vm10, %v972_v9, 0.0 }
 0x418   :  { %v2808_v14 = vpop.eup %2807  ;;  %v986_v41 = vadd.f32 %v985_v27, %v984_v6  ;;  %1088 = vmatpush.msra.mxu2 %v2644_v16  ;;  %v2751_v6 = vld [vmem:[%s4408_s30] ss:$0 sm:$0xff] }
 0x419   :  { %v932_v29 = vadd.f32 1.0, %v2808_v14 }
 0x41a   :  { %1089 = vmatpush.msra.mxu2 %v2641_v20 }
 0x41b   :  { %v3597_v57 = vmul.f32 %v932_v29, %v876_v30 }
 0x41c   :  { %1090 = vmatpush.msra.mxu2 %v2640_v56  ;;  %v3629_v56 = vld [vmem:[%s4410_s12] ss:$0 sm:$0xff] }
 0x41d   :  { %v957_v42 = vsel %vm943_vm10, %v3597_v57, 0.0  ;;  %v973_v44 = vmul.f32 %v3597_v57, %v3597_v57 }
 0x41e   :  { %v958_v0 = vadd.f32 %v957_v42, %v956_v43 }
 0x41f   :  { %v987_v47 = vsel %vm943_vm10, %v973_v44, 0.0 }
 0x420   :  { %v959_v40 = vrot.slane %v958_v0, 4  ;;  %v988_v49 = vadd.f32 %v987_v47, %v986_v41 }
 0x422   :  { %v960_v5 = vadd.f32 %v959_v40, %v958_v0  ;;  %v989_v21 = vrot.slane %v988_v49, 4 }
 0x424   :  { %v961_v33 = vrot.slane %v960_v5, 2  ;;  %v990_v55 = vadd.f32 %v989_v21, %v988_v49 }
 0x426   :  { %v962_v1 = vadd.f32 %v961_v33, %v960_v5  ;;  %v991_v62 = vrot.slane %v990_v55, 2 }
 0x428   :  { %v963_v3 = vrot.slane %v962_v1, 1  ;;  %v992_v17 = vadd.f32 %v991_v62, %v990_v55 }
 0x42a   :  { %v964_v7 = vadd.f32 %v963_v3, %v962_v1  ;;  %v993_v11 = vrot.slane %v992_v17, 1 }
 0x42c   :  { %v965_v4 = vmul.f32 %v964_v7, %v3487_v18  ;;  %v994_v12 = vadd.f32 %v993_v11, %v992_v17 }
 0x42e   :  { %v995_v9 = vmul.f32 %v994_v12, %v3487_v18  ;;  %v996_v14 = vmul.f32 %v965_v4, %v965_v4  ;;  %v1004_v22 = vsub.f32 %v3581_v13, %v965_v4  ;;  %v1005_v19 = vsub.f32 %v3597_v57, %v965_v4  ;;  %v2752_v13 = vld [vmem:[%s4409_s6] ss:$0 sm:$0xff] }
 0x42f   :  { %v998_v46 = vsub.f32 %v3548_v28, %v965_v4  ;;  %v999_v57 = vsub.f32 %v3546_v8, %v965_v4  ;;  %v1000_v0 = vsub.f32 %v3550_v31, %v965_v4  ;;  %v1001_v48 = vsub.f32 %v3555_v39, %v965_v4 }
 0x430   :  { %v997_v26 = vsub.f32 %v995_v9, %v996_v14  ;;  %v1002_v8 = vsub.f32 %v3564_v34, %v965_v4  ;;  %v1003_v31 = vsub.f32 %v3573_v54, %v965_v4 }
 0x432   :  { %v1006_v36 = vadd.f32 1e-05, %v997_v26 }
 0x434   :  { %2809 = vrsqrt.f32 %v1006_v36  ;;  %vm1013_vm12 = vweird.f32 %v1006_v36 }
 0x43a   :  { %v2810_v30 = vpop.eup %2809 }
 0x43b   :  { %v1008_v29 = vmul.f32 %v2810_v30, %v1006_v36  ;;  %vm1014_vm11 = vweird.f32 %v2810_v30 }
 0x43c   :  { %vm1015_vm13 = vmor %vm1013_vm12, %vm1014_vm11 }
 0x43d   :  { %v1009_v25 = vmul.f32 %v2810_v30, %v1008_v29 }
 0x43f   :  { %v1010_v59 = vmul.f32 0.5, %v1009_v25 }
 0x441   :  { %v1011_v27 = vsub.f32 1.5, %v1010_v59  ;;  %v2754_v59 = vld [vmem:[#allocation5] ss:$0 sm:$0xff] }
 0x442   :  { %1579 = vperm.xlu0 %2741, %v2754_v59  }
 0x443   :  { %v1012_v10 = vmul.f32 %v2810_v30, %v1011_v27 }
 0x445   :  { %v1016_v43 = vsel %vm1015_vm13, %v2810_v30, %v1012_v10 }
 0x446   :  { %v1017_v32 = vmul.f32 %v1016_v43, %v998_v46  ;;  %v1018_v44 = vmul.f32 %v1016_v43, %v999_v57  ;;  %v1019_v47 = vmul.f32 %v1016_v43, %v1000_v0  ;;  %v1020_v49 = vmul.f32 %v1016_v43, %v1001_v48 }
 0x447   :  { %v1021_v21 = vmul.f32 %v1016_v43, %v1002_v8  ;;  %v1022_v33 = vmul.f32 %v1016_v43, %v1003_v31  ;;  %v1023_v16 = vmul.f32 %v1016_v43, %v1004_v22  ;;  %v1024_v34 = vmul.f32 %v1016_v43, %v1005_v19 }
 0x448   :  { %v1028_v23 = vmul.f32 %v2751_v6, %v1017_v32  ;;  %v1029_v41 = vmul.f32 %v2751_v6, %v1018_v44  ;;  %v1030_v28 = vmul.f32 %v2751_v6, %v1019_v47  ;;  %v1031_v51 = vmul.f32 %v2751_v6, %v1020_v49 }
 0x449   :  { %v1032_v50 = vmul.f32 %v2751_v6, %v1021_v21  ;;  %v1033_v39 = vmul.f32 %v2751_v6, %v1022_v33  ;;  %v1034_v1 = vmul.f32 %v2751_v6, %v1023_v16  ;;  %v1035_v20 = vmul.f32 %v2751_v6, %v1024_v34 }
 0x44a   :  { %v1039_v42 = vadd.f32 %v2752_v13, %v1028_v23  ;;  %v1040_v38 = vadd.f32 %v2752_v13, %v1029_v41  ;;  %v1041_v40 = vadd.f32 %v2752_v13, %v1030_v28  ;;  %v1042_v5 = vadd.f32 %v2752_v13, %v1031_v51 }
 0x44b   :  { %v1043_v58 = vadd.f32 %v2752_v13, %v1032_v50  ;;  %v1044_v55 = vadd.f32 %v2752_v13, %v1033_v39  ;;  %v1045_v62 = vadd.f32 %v2752_v13, %v1034_v1  ;;  %v1046_v3 = vadd.f32 %v2752_v13, %v1035_v20 }
 0x44c   :  { %2570 = vmatmul.msk.f32.vlgmr.msra.gmra.mxu2 %vm943_vm10, %v1039_v42 }
 0x454   :  { %2571 = vmatmul.msk.f32.gmra.mxu2 %vm943_vm10, %v1040_v38 }
 0x45c   :  { %2572 = vmatmul.msk.f32.gmra.mxu2 %vm943_vm10, %v1041_v40 }
 0x464   :  { %2573 = vmatmul.msk.f32.gmra.mxu2 %vm943_vm10, %v1042_v5 }
 0x46c   :  { %2574 = vmatmul.msk.f32.gmra.mxu2 %vm943_vm10, %v1043_v58 }
 0x474   :  { %2575 = vmatmul.msk.f32.gmra.mxu2 %vm943_vm10, %v1044_v55 }
 0x47c   :  { %2576 = vmatmul.msk.f32.gmra.mxu2 %vm943_vm10, %v1045_v62 }
 0x484   :  { %2577 = vmatmul.msk.f32.gmra.mxu2 %vm943_vm10, %v1046_v3 }
 0x4cf   :  { %v1092_v54 = vpop.f32.mrf.mxu2 }
 0x4d0   :  { %v1093_v4 = vadd.f32 %v3629_v56, %v1092_v54 }
 0x4d2   :  { %v1124_v14 = vmul.f32 0.044715, %v1093_v4 }
 0x4d4   :  { %v1132_v29 = vmul.f32 %v1124_v14, %v1093_v4 }
 0x4d6   :  { %v1140_v46 = vmul.f32 %v1132_v29, %v1093_v4 }
 0x4d7   :  { %v1095_v17 = vpop.f32.mrf.mxu2 }
 0x4d8   :  { %v1096_v11 = vadd.f32 %v3629_v56, %v1095_v17  ;;  %v1148_v42 = vadd.f32 %v1140_v46, %v1093_v4 }
 0x4da   :  { %v1125_v9 = vmul.f32 0.044715, %v1096_v11  ;;  %v1156_v28 = vmul.f32 0.7978846, %v1148_v42 }
 0x4dc   :  { %v1133_v36 = vmul.f32 %v1125_v9, %v1096_v11 }
 0x4de   :  { %v1141_v10 = vmul.f32 %v1133_v36, %v1096_v11 }
 0x4df   :  { %v1098_v7 = vpop.f32.mrf.mxu2 }
 0x4e0   :  { %v1099_v12 = vadd.f32 %v3629_v56, %v1098_v7  ;;  %v1149_v23 = vadd.f32 %v1141_v10, %v1096_v11  ;;  %v1117_v7 = vmul.f32 0.5, %v1096_v11 }
 0x4e2   :  { %v1126_v22 = vmul.f32 0.044715, %v1099_v12  ;;  %v1157_v38 = vmul.f32 0.7978846, %v1149_v23  ;;  %v1118_v29 = vmul.f32 0.5, %v1099_v12  ;;  %v3639_v23 = vpop.permute.xlu2 %1192 }
 0x4e4   :  { %v1134_v25 = vmul.f32 %v1126_v22, %v1099_v12  ;;  %2811 = vtanh.f32 %v1157_v38 }
 0x4e5   :  { %2813 = vtanh.f32 %v1156_v28 }
 0x4e6   :  { %v1142_v43 = vmul.f32 %v1134_v25, %v1099_v12 }
 0x4e7   :  { %v1101_v26 = vpop.f32.mrf.mxu2 }
 0x4e8   :  { %v1102_v19 = vadd.f32 %v3629_v56, %v1101_v26  ;;  %v1150_v44 = vadd.f32 %v1142_v43, %v1099_v12  ;;  %v1116_v26 = vmul.f32 0.5, %v1093_v4 }
 0x4ea   :  { %v1127_v30 = vmul.f32 0.044715, %v1102_v19  ;;  %v1158_v40 = vmul.f32 0.7978846, %v1150_v44  ;;  %v2812_v33 = vpop.eup %2811 }
 0x4eb   :  { %v2814_v16 = vpop.eup %2813  ;;  %v1173_v3 = vadd.f32 1.0, %v2812_v33 }
 0x4ec   :  { %v1135_v27 = vmul.f32 %v1127_v30, %v1102_v19  ;;  %2815 = vtanh.f32 %v1158_v40  ;;  %v1172_v54 = vadd.f32 1.0, %v2814_v16 }
 0x4ed   :  { %v1181_v30 = vmul.f32 %v1173_v3, %v1117_v7 }
 0x4ee   :  { %v1143_v13 = vmul.f32 %v1135_v27, %v1102_v19  ;;  %v1180_v59 = vmul.f32 %v1172_v54, %v1116_v26  ;;  %v1119_v27 = vmul.f32 0.5, %v1102_v19 }
 0x4ef   :  { %v1104_v6 = vpop.f32.mrf.mxu2  ;;  %v1196_v4 = vmul.f32 %v3639_v23, %v1181_v30 }
 0x4f0   :  { %v1105_v32 = vadd.f32 %v3629_v56, %v1104_v6  ;;  %v1151_v0 = vadd.f32 %v1143_v13, %v1102_v19  ;;  %v1195_v12 = vmul.f32 %v3639_v23, %v1180_v59 }
 0x4f2   :  { %v1128_v57 = vmul.f32 0.044715, %v1105_v32  ;;  %v1159_v8 = vmul.f32 0.7978846, %v1151_v0  ;;  %v2816_v1 = vpop.eup %2815  ;;  %v1120_v44 = vmul.f32 0.5, %v1105_v32 }
 0x4f3   :  { %v1174_v9 = vadd.f32 1.0, %v2816_v1 }
 0x4f4   :  { %v1136_v41 = vmul.f32 %v1128_v57, %v1105_v32  ;;  %2817 = vtanh.f32 %v1159_v8 }
 0x4f5   :  { %v1182_v6 = vmul.f32 %v1174_v9, %v1118_v29 }
 0x4f6   :  { %v1144_v47 = vmul.f32 %v1136_v41, %v1105_v32 }
 0x4f7   :  { %v1107_v48 = vpop.f32.mrf.mxu2  ;;  %v1197_v19 = vmul.f32 %v3639_v23, %v1182_v6 }
 0x4f8   :  { %v1152_v49 = vadd.f32 %v1144_v47, %v1105_v32  ;;  %v1108_v51 = vadd.f32 %v3629_v56, %v1107_v48  ;;  %v3646_v48 = vadd.f32 %v1196_v4, %v3502_v15 }
 0x4f9   :  { %v3652_v8 = vadd.f32 %v1197_v19, %v3507_v53 }
 0x4fa   :  { %v1129_v5 = vmul.f32 0.044715, %v1108_v51  ;;  %v1160_v21 = vmul.f32 0.7978846, %v1152_v49  ;;  %v2818_v20 = vpop.eup %2817  ;;  %v3649_v49 = vadd.f32 %v1195_v12, %v3497_v37  ;;  %v1214_v53 = vsel %vm174_vm0, %v3646_v48, 0.0 }
 0x4fb   :  { %v1175_v22 = vadd.f32 1.0, %v2818_v20 }
 0x4fc   :  { %v1137_v50 = vmul.f32 %v1129_v5, %v1108_v51  ;;  %2819 = vtanh.f32 %v1160_v21  ;;  %v1235_v37 = vmul.f32 %v3649_v49, %v3649_v49  ;;  %v1213_v1 = vsel %vm174_vm0, %v3649_v49, 0.0 }
 0x4fd   :  { %v1183_v57 = vmul.f32 %v1175_v22, %v1119_v27  ;;  %v1215_v54 = vadd.f32 %v1214_v53, %v1213_v1 }
 0x4fe   :  { %v1145_v31 = vmul.f32 %v1137_v50, %v1108_v51 }
 0x4ff   :  { %v1110_v58 = vpop.f32.mrf.mxu2  ;;  %v1198_v47 = vmul.f32 %v3639_v23, %v1183_v57 }
 0x500   :  { %v1153_v39 = vadd.f32 %v1145_v31, %v1108_v51  ;;  %v1111_v55 = vadd.f32 %v3629_v56, %v1110_v58  ;;  %v1236_v31 = vmul.f32 %v3646_v48, %v3646_v48 }
 0x501   :  { %v3656_v50 = vadd.f32 %v1198_v47, %v3512_v61 }
 0x502   :  { %v1161_v62 = vmul.f32 0.7978846, %v1153_v39  ;;  %v1130_v34 = vmul.f32 0.044715, %v1111_v55  ;;  %v2820_v14 = vpop.eup %2819  ;;  %v1122_v58 = vmul.f32 0.5, %v1111_v55  ;;  %v1237_v39 = vmul.f32 %v3652_v8, %v3652_v8 }
 0x503   :  { %v1176_v43 = vadd.f32 1.0, %v2820_v14  ;;  %v1218_v7 = vsel %vm174_vm0, %v3656_v50, 0.0 }
 0x504   :  { %2821 = vtanh.f32 %v1161_v62  ;;  %v1138_v17 = vmul.f32 %v1130_v34, %v1111_v55  ;;  %v1244_v62 = vsel %vm174_vm0, %v1236_v31, 0.0  ;;  %v1216_v34 = vsel %vm174_vm0, %v3652_v8, 0.0 }
 0x505   :  { %v1184_v38 = vmul.f32 %v1176_v43, %v1120_v44 }
 0x506   :  { %v1146_v36 = vmul.f32 %v1138_v17, %v1111_v55  ;;  %v1246_v17 = vsel %vm174_vm0, %v1237_v39, 0.0 }
 0x507   :  { %v1113_v25 = vpop.f32.mrf.mxu2  ;;  %v1199_v5 = vmul.f32 %v3639_v23, %v1184_v38 }
 0x508   :  { %v1154_v10 = vadd.f32 %v1146_v36, %v1111_v55  ;;  %v1114_v46 = vadd.f32 %v3629_v56, %v1113_v25  ;;  %v1121_v56 = vmul.f32 0.5, %v1108_v51  ;;  %v1238_v55 = vmul.f32 %v3656_v50, %v3656_v50 }
 0x509   :  { %v3668_v61 = vadd.f32 %v1199_v5, %v3517_v45  ;;  %v1243_v45 = vsel %vm174_vm0, %v1235_v37, 0.0 }
 0x50a   :  { %v2822_v13 = vpop.eup %2821  ;;  %v1162_v11 = vmul.f32 0.7978846, %v1154_v10  ;;  %v1131_v42 = vmul.f32 0.044715, %v1114_v46  ;;  %v1245_v22 = vadd.f32 %v1244_v62, %v1243_v45  ;;  %v1248_v36 = vsel %vm174_vm0, %v1238_v55, 0.0 }
 0x50b   :  { %v1177_v41 = vadd.f32 1.0, %v2822_v13  ;;  %v1239_v9 = vmul.f32 %v3668_v61, %v3668_v61  ;;  %v1220_v30 = vsel %vm174_vm0, %v3668_v61, 0.0  ;;  %v1123_v25 = vmul.f32 0.5, %v1114_v46 }
 0x50c   :  { %2823 = vtanh.f32 %v1162_v11  ;;  %v1139_v0 = vmul.f32 %v1131_v42, %v1114_v46  ;;  %v1247_v27 = vadd.f32 %v1246_v17, %v1245_v22 }
 0x50d   :  { %v1185_v40 = vmul.f32 %v1177_v41, %v1121_v56  ;;  %v1250_v6 = vsel %vm174_vm0, %v1239_v9, 0.0 }
 0x50e   :  { %v1147_v28 = vmul.f32 %v1139_v0, %v1114_v46  ;;  %v1249_v57 = vadd.f32 %v1248_v36, %v1247_v27 }
 0x50f   :  { %v1200_v15 = vmul.f32 %v3639_v23, %v1185_v40 }
 0x510   :  { %v1155_v32 = vadd.f32 %v1147_v28, %v1114_v46  ;;  %v1251_v44 = vadd.f32 %v1250_v6, %v1249_v57 }
 0x511   :  { %v3678_v20 = vadd.f32 %v1200_v15, %v3521_v24  ;;  %v1217_v24 = vadd.f32 %v1216_v34, %v1215_v54 }
 0x512   :  { %v2824_v21 = vpop.eup %2823  ;;  %v1163_v51 = vmul.f32 0.7978846, %v1155_v32 }
 0x513   :  { %v1178_v33 = vadd.f32 1.0, %v2824_v21  ;;  %v1240_v29 = vmul.f32 %v3678_v20, %v3678_v20  ;;  %v1219_v10 = vadd.f32 %v1218_v7, %v1217_v24 }
 0x514   :  { %2825 = vtanh.f32 %v1163_v51 }
 0x515   :  { %v1186_v16 = vmul.f32 %v1178_v33, %v1122_v58  ;;  %v1221_v11 = vadd.f32 %v1220_v30, %v1219_v10  ;;  %v1252_v42 = vsel %vm174_vm0, %v1240_v29, 0.0 }
 0x516   :  { %v1253_v19 = vadd.f32 %v1252_v42, %v1251_v44  ;;  %v1317_v44 = vld [vmem:[%s4411_s18 + $0x8] sm:$0x1f] }
 0x517   :  { %v1201_v3 = vmul.f32 %v3639_v23, %v1186_v16  ;;  %v1316_v16 = vld [vmem:[%s4411_s18] sm:$0xff] }
 0x518   :  { %v3717_v62 = vperm.slane %v1316_v16, 0  ;;  %v3719_v34 = vperm.slane %v1316_v16, 1  ;;  %v3728_v9 = vperm.slane %v1316_v16, 2  ;;  %v3734_v36 = vperm.slane %v1316_v16, 3 }
 0x519   :  { %v3688_v14 = vadd.f32 %v1201_v3, %v3525_v2  ;;  %v1222_v2 = vsel %vm174_vm0, %v3678_v20, 0.0  ;;  %v3742_v27 = vperm.slane %v1316_v16, 5  ;;  %v3749_v57 = vperm.slane %v1316_v16, 6 }
 0x51a   :  { %v2826_v26 = vpop.eup %2825  ;;  %v1223_v41 = vadd.f32 %v1222_v2, %v1221_v11  ;;  %v3725_v17 = vmul.f32 0.0, %v3717_v62  ;;  %v1323_v7 = vmul.f32 0.0, %v3719_v34  ;;  %v1332_v24 = vmul.f32 0.0, %v3728_v9 }
 0x51b   :  { %v1179_v59 = vadd.f32 1.0, %v2826_v26  ;;  %v1241_v43 = vmul.f32 %v3688_v14, %v3688_v14  ;;  %v1224_v4 = vsel %vm174_vm0, %v3688_v14, 0.0  ;;  %v1343_v29 = vmul.f32 0.0, %v3734_v36 }
 0x51c   :  { %v1225_v38 = vadd.f32 %v1224_v4, %v1223_v41  ;;  %v3731_v22 = vadd.f32 %v1323_v7, %v3725_v17 }
 0x51d   :  { %v1187_v13 = vmul.f32 %v1179_v59, %v1123_v25  ;;  %v1254_v12 = vsel %vm174_vm0, %v1241_v43, 0.0  ;;  %v3740_v25 = vperm.slane %v1316_v16, 4 }
 0x51e   :  { %v1255_v28 = vadd.f32 %v1254_v12, %v1253_v19  ;;  %v3737_v30 = vadd.f32 %v1332_v24, %v3731_v22 }
 0x51f   :  { %v1202_v46 = vmul.f32 %v3639_v23, %v1187_v13  ;;  %v1356_v43 = vmul.f32 0.0, %v3740_v25  ;;  %v1371_v13 = vmul.f32 0.0, %v3742_v27 }
 0x520   :  { %v3745_v2 = vadd.f32 %v1343_v29, %v3737_v30 }
 0x521   :  { %v3706_v0 = vadd.f32 %v1202_v46, %v3529_v52 }
 0x523   :  { %v1226_v56 = vsel %vm174_vm0, %v3706_v0, 0.0  ;;  %v1242_v47 = vmul.f32 %v3706_v0, %v3706_v0 }
 0x524   :  { %v1227_v40 = vadd.f32 %v1226_v56, %v1225_v38  ;;  %v3771_v56 = vperm.slane %v1317_v44, 0 }
 0x525   :  { %v1256_v23 = vsel %vm174_vm0, %v1242_v47, 0.0  ;;  %v3775_v47 = vperm.slane %v1317_v44, 2 }
 0x526   :  { %v1228_v32 = vrot.slane %v1227_v40, 4  ;;  %v1257_v5 = vadd.f32 %v1256_v23, %v1255_v28  ;;  %v3786_v23 = vmul.f32 0.0, %v3771_v56 }
 0x528   :  { %v1229_v21 = vadd.f32 %v1228_v32, %v1227_v40  ;;  %v1258_v51 = vrot.slane %v1257_v5, 4  ;;  %v2755_v40 = vld [vmem:[%s4412_s26] ss:$0 sm:$0xff] }
 0x52a   :  { %v1230_v31 = vrot.slane %v1229_v21, 2  ;;  %v1259_v52 = vadd.f32 %v1258_v51, %v1257_v5  ;;  %v3792_v5 = vmul.f32 0.0, %v3775_v47 }
 0x52c   :  { %v1231_v15 = vadd.f32 %v1230_v31, %v1229_v21  ;;  %v1260_v58 = vrot.slane %v1259_v52, 2 }
 0x52e   :  { %v1232_v33 = vrot.slane %v1231_v15, 1  ;;  %v1261_v37 = vadd.f32 %v1260_v58, %v1259_v52 }
 0x530   :  { %v1233_v53 = vadd.f32 %v1232_v33, %v1231_v15  ;;  %v1262_v39 = vrot.slane %v1261_v37, 1 }
 0x532   :  { %v3715_v1 = vmul.f32 %v1233_v53, %v3487_v18  ;;  %v1263_v55 = vadd.f32 %v1262_v39, %v1261_v37  ;;  %v2756_v39 = vld [vmem:[%s4413_s2] ss:$0 sm:$0xff] }
 0x534   :  { %v1264_v3 = vmul.f32 %v1263_v55, %v3487_v18  ;;  %v1265_v45 = vmul.f32 %v3715_v1, %v3715_v1  ;;  %v1268_v11 = vsub.f32 %v3646_v48, %v3715_v1  ;;  %v1269_v42 = vsub.f32 %v3652_v8, %v3715_v1 }
 0x535   :  { %v1270_v4 = vsub.f32 %v3656_v50, %v3715_v1  ;;  %v1271_v41 = vsub.f32 %v3668_v61, %v3715_v1  ;;  %v1272_v12 = vsub.f32 %v3678_v20, %v3715_v1  ;;  %v1273_v19 = vsub.f32 %v3688_v14, %v3715_v1 }
 0x536   :  { %v1266_v54 = vsub.f32 %v1264_v3, %v1265_v45  ;;  %v1274_v48 = vsub.f32 %v3706_v0, %v3715_v1  ;;  %v3767_v8 = vadd.f32 %v1356_v43, %v3745_v2  ;;  %v3769_v50 = vperm.slane %v1316_v16, 7 }
 0x537   :  { %v3773_v61 = vperm.slane %v1317_v44, 1  ;;  %v3777_v20 = vperm.slane %v1317_v44, 3  ;;  %v3782_v0 = vperm.slane %v1317_v44, 4  ;;  %v1267_v15 = vsub.f32 %v3649_v49, %v3715_v1 }
 0x538   :  { %v1275_v26 = vadd.f32 1e-05, %v1266_v54  ;;  %v3780_v14 = vmul.f32 0.0, %v3769_v50  ;;  %v3798_v31 = vadd.f32 %v1371_v13, %v3767_v8 }
 0x539   :  { %v3789_v32 = vmul.f32 0.0, %v3773_v61  ;;  %v3795_v21 = vmul.f32 0.0, %v3777_v20  ;;  %v3801_v52 = vmul.f32 0.0, %v3782_v0 }
 0x53a   :  { %2827 = vrsqrt.f32 %v1275_v26  ;;  %vm1282_vm15 = vweird.f32 %v1275_v26 }
 0x540   :  { %v2828_v59 = vpop.eup %2827 }
 0x541   :  { %v1277_v10 = vmul.f32 %v2828_v59, %v1275_v26  ;;  %vm1283_vm14 = vweird.f32 %v2828_v59 }
 0x542   :  { %vm1284_vm1 = vmor %vm1282_vm15, %vm1283_vm14 }
 0x543   :  { %v1278_v6 = vmul.f32 %v2828_v59, %v1277_v10 }
 0x545   :  { %v1279_v46 = vmul.f32 0.5, %v1278_v6 }
 0x547   :  { %v1280_v38 = vsub.f32 1.5, %v1279_v46 }
 0x549   :  { %v1281_v28 = vmul.f32 %v2828_v59, %v1280_v38 }
 0x54b   :  { %v1285_v51 = vsel %vm1284_vm1, %v2828_v59, %v1281_v28 }
 0x54c   :  { %v1287_v58 = vmul.f32 %v1285_v51, %v1268_v11  ;;  %v1288_v33 = vmul.f32 %v1285_v51, %v1269_v42  ;;  %v1289_v37 = vmul.f32 %v1285_v51, %v1270_v4  ;;  %v1290_v53 = vmul.f32 %v1285_v51, %v1271_v41 }
 0x54d   :  { %v1291_v16 = vmul.f32 %v1285_v51, %v1272_v12  ;;  %v1292_v55 = vmul.f32 %v1285_v51, %v1273_v19  ;;  %v1293_v3 = vmul.f32 %v1285_v51, %v1274_v48  ;;  %v1286_v45 = vmul.f32 %v1285_v51, %v1267_v15 }
 0x54e   :  { %v1298_v54 = vmul.f32 %v2755_v40, %v1287_v58  ;;  %v1299_v7 = vmul.f32 %v2755_v40, %v1288_v33  ;;  %v1300_v26 = vmul.f32 %v2755_v40, %v1289_v37  ;;  %v1301_v24 = vmul.f32 %v2755_v40, %v1290_v53 }
 0x54f   :  { %v1304_v29 = vmul.f32 %v2755_v40, %v1293_v3  ;;  %v1297_v59 = vmul.f32 %v2755_v40, %v1286_v45  ;;  %v1302_v10 = vmul.f32 %v2755_v40, %v1291_v16  ;;  %v1303_v6 = vmul.f32 %v2755_v40, %v1292_v55 }
 0x550   :  { %v3806_v43 = vadd.f32 %v2756_v39, %v1298_v54  ;;  %v3808_v49 = vadd.f32 %v2756_v39, %v1299_v7  ;;  %v3810_v1 = vadd.f32 %v2756_v39, %v1300_v26  ;;  %v3812_v13 = vadd.f32 %v2756_v39, %v1301_v24 }
 0x551   :  { %v3814_v11 = vadd.f32 %v2756_v39, %v1304_v29  ;;  %v3816_v42 = vadd.f32 %v2756_v39, %v1297_v59  ;;  %v3818_v4 = vadd.f32 %v2756_v39, %v1302_v10  ;;  %v3820_v46 = vadd.f32 %v2756_v39, %v1303_v6 }
 0x552   :  { %v1321_v44 = vmul.f32 %v3717_v62, %v3806_v43  ;;  %v1325_v41 = vmul.f32 %v3719_v34, %v3806_v43  ;;  %v1326_v12 = vmul.f32 %v3719_v34, %v3808_v49  ;;  %v1334_v19 = vmul.f32 %v3728_v9, %v3806_v43 }
 0x553   :  { %v1320_v48 = vmul.f32 %v3717_v62, %v3816_v42  ;;  %v1324_v38 = vmul.f32 %v3719_v34, %v3816_v42  ;;  %v1333_v28 = vmul.f32 %v3728_v9, %v3816_v42  ;;  %v1335_v40 = vmul.f32 %v3728_v9, %v3808_v49 }
 0x554   :  { %v1330_v51 = vadd.f32 %v1326_v12, %v1321_v44  ;;  %v1336_v15 = vmul.f32 %v3728_v9, %v3810_v1  ;;  %v1344_v58 = vmul.f32 %v3734_v36, %v3816_v42  ;;  %v1345_v33 = vmul.f32 %v3734_v36, %v3806_v43 }
 0x555   :  { %v1328_v62 = vadd.f32 %v1324_v38, %v3725_v17  ;;  %v1329_v37 = vadd.f32 %v1325_v41, %v1320_v48  ;;  %v1338_v34 = vadd.f32 %v1333_v28, %v3731_v22  ;;  %v1346_v53 = vmul.f32 %v3734_v36, %v3808_v49 }
 0x556   :  { %v1341_v39 = vadd.f32 %v1336_v15, %v1330_v51  ;;  %v1347_v16 = vmul.f32 %v3734_v36, %v3810_v1  ;;  %v1348_v9 = vmul.f32 %v3734_v36, %v3812_v13  ;;  %v1350_v55 = vadd.f32 %v1344_v58, %v3737_v30 }
 0x557   :  { %v1339_v3 = vadd.f32 %v1334_v19, %v1328_v62  ;;  %v1340_v45 = vadd.f32 %v1335_v40, %v1329_v37  ;;  %v1351_v54 = vadd.f32 %v1345_v33, %v1338_v34  ;;  %v1357_v17 = vmul.f32 %v3740_v25, %v3816_v42 }
 0x558   :  { %v1354_v7 = vadd.f32 %v1348_v9, %v1341_v39  ;;  %v1358_v22 = vmul.f32 %v3740_v25, %v3806_v43  ;;  %v1359_v26 = vmul.f32 %v3740_v25, %v3808_v49  ;;  %v1360_v24 = vmul.f32 %v3740_v25, %v3810_v1 }
 0x559   :  { %v1352_v29 = vadd.f32 %v1346_v53, %v1339_v3  ;;  %v1353_v36 = vadd.f32 %v1347_v16, %v1340_v45  ;;  %v1361_v30 = vmul.f32 %v3740_v25, %v3812_v13  ;;  %v1362_v59 = vmul.f32 %v3740_v25, %v3818_v4 }
 0x55a   :  { %v1364_v10 = vadd.f32 %v1357_v17, %v3745_v2  ;;  %v1365_v6 = vadd.f32 %v1358_v22, %v1350_v55  ;;  %v1366_v44 = vadd.f32 %v1359_v26, %v1351_v54  ;;  %v1372_v41 = vmul.f32 %v3742_v27, %v3816_v42 }
 0x55b   :  { %v1367_v12 = vadd.f32 %v1360_v24, %v1352_v29  ;;  %v1368_v19 = vadd.f32 %v1361_v30, %v1353_v36  ;;  %v1369_v48 = vadd.f32 %v1362_v59, %v1354_v7  ;;  %v1373_v38 = vmul.f32 %v3742_v27, %v3806_v43 }
 0x55c   :  { %v1374_v28 = vmul.f32 %v3742_v27, %v3808_v49  ;;  %v1375_v40 = vmul.f32 %v3742_v27, %v3810_v1  ;;  %v1376_v25 = vmul.f32 %v3742_v27, %v3812_v13  ;;  %v1377_v2 = vmul.f32 %v3742_v27, %v3818_v4 }
 0x55d   :  { %v1378_v51 = vmul.f32 %v3742_v27, %v3820_v46  ;;  %v1380_v15 = vadd.f32 %v1372_v41, %v3767_v8  ;;  %v1381_v58 = vadd.f32 %v1373_v38, %v1364_v10  ;;  %v1388_v33 = vmul.f32 %v3749_v57, %v3816_v42 }
 0x55e   :  { %v1382_v62 = vadd.f32 %v1374_v28, %v1365_v6  ;;  %v1383_v37 = vadd.f32 %v1375_v40, %v1366_v44  ;;  %v1384_v34 = vadd.f32 %v1376_v25, %v1367_v12  ;;  %v1385_v53 = vadd.f32 %v1377_v2, %v1368_v19 }
 0x55f   :  { %v1386_v39 = vadd.f32 %v1378_v51, %v1369_v48  ;;  %v1389_v16 = vmul.f32 %v3749_v57, %v3806_v43  ;;  %v1390_v9 = vmul.f32 %v3749_v57, %v3808_v49  ;;  %v1391_v27 = vmul.f32 %v3749_v57, %v3810_v1 }
 0x560   :  { %v1392_v8 = vmul.f32 %v3749_v57, %v3812_v13  ;;  %v1393_v55 = vmul.f32 %v3749_v57, %v3818_v4  ;;  %v1394_v3 = vmul.f32 %v3749_v57, %v3820_v46  ;;  %v1395_v45 = vmul.f32 %v3749_v57, %v3814_v11 }
 0x561   :  { %v1396_v54 = vadd.f32 %v1388_v33, %v3798_v31  ;;  %v1397_v17 = vadd.f32 %v1389_v16, %v1380_v15  ;;  %v1398_v7 = vadd.f32 %v1390_v9, %v1381_v58  ;;  %v1399_v22 = vadd.f32 %v1391_v27, %v1382_v62 }
 0x562   :  { %v1400_v26 = vadd.f32 %v1392_v8, %v1383_v37  ;;  %v1401_v24 = vadd.f32 %v1393_v55, %v1384_v34  ;;  %v1402_v29 = vadd.f32 %v1394_v3, %v1385_v53  ;;  %v1403_v36 = vadd.f32 %v1395_v45, %v1386_v39 }
 0x563   :  { %v1405_v30 = vmul.f32 %v3769_v50, %v3806_v43  ;;  %v1406_v59 = vmul.f32 %v3769_v50, %v3808_v49  ;;  %v1407_v10 = vmul.f32 %v3769_v50, %v3810_v1  ;;  %v1408_v57 = vmul.f32 %v3769_v50, %v3812_v13 }
 0x564   :  { %v1409_v31 = vmul.f32 %v3769_v50, %v3818_v4  ;;  %v1410_v6 = vmul.f32 %v3769_v50, %v3820_v46  ;;  %v1411_v44 = vmul.f32 %v3769_v50, %v3814_v11  ;;  %v1420_v41 = vadd.f32 %v3780_v14, %v1403_v36 }
 0x565   :  { %v1413_v12 = vadd.f32 %v1405_v30, %v1396_v54  ;;  %v1414_v19 = vadd.f32 %v1406_v59, %v1397_v17  ;;  %v1415_v48 = vadd.f32 %v1407_v10, %v1398_v7  ;;  %v1416_v38 = vadd.f32 %v1408_v57, %v1399_v22 }
 0x566   :  { %v1417_v28 = vadd.f32 %v1409_v31, %v1400_v26  ;;  %v1418_v40 = vadd.f32 %v1410_v6, %v1401_v24  ;;  %v1419_v25 = vadd.f32 %v1411_v44, %v1402_v29  ;;  %v1422_v2 = vmul.f32 %v3771_v56, %v3808_v49 }
 0x567   :  { %v1423_v51 = vmul.f32 %v3771_v56, %v3810_v1  ;;  %v1424_v15 = vmul.f32 %v3771_v56, %v3812_v13  ;;  %v1425_v50 = vmul.f32 %v3771_v56, %v3818_v4  ;;  %v1426_v14 = vmul.f32 %v3771_v56, %v3820_v46 }
 0x568   :  { %v1427_v58 = vmul.f32 %v3771_v56, %v3814_v11  ;;  %v1429_v33 = vadd.f32 %v1422_v2, %v1413_v12  ;;  %v1435_v62 = vadd.f32 %v3786_v23, %v1419_v25  ;;  %v1436_v37 = vadd.f32 %v3786_v23, %v1420_v41 }
 0x569   :  { %v1430_v34 = vadd.f32 %v1423_v51, %v1414_v19  ;;  %v1431_v53 = vadd.f32 %v1424_v15, %v1415_v48  ;;  %v1432_v39 = vadd.f32 %v1425_v50, %v1416_v38  ;;  %v1433_v16 = vadd.f32 %v1426_v14, %v1417_v28  ;;  %v2757_v51 = vld [vmem:[%s4414_s11] ss:$0 sm:$0xff] }
 0x56a   :  { %v1434_v9 = vadd.f32 %v1427_v58, %v1418_v40  ;;  %v1438_v27 = vmul.f32 %v3773_v61, %v3810_v1  ;;  %v1439_v8 = vmul.f32 %v3773_v61, %v3812_v13  ;;  %v1440_v55 = vmul.f32 %v3773_v61, %v3818_v4 }
 0x56b   :  { %v1441_v56 = vmul.f32 %v3773_v61, %v3820_v46  ;;  %v1442_v23 = vmul.f32 %v3773_v61, %v3814_v11  ;;  %v1450_v3 = vadd.f32 %v3789_v32, %v1435_v62  ;;  %v1451_v45 = vadd.f32 %v3789_v32, %v1436_v37 }
 0x56c   :  { %v1444_v54 = vadd.f32 %v1438_v27, %v1429_v33  ;;  %v1445_v17 = vadd.f32 %v1439_v8, %v1430_v34  ;;  %v1446_v7 = vadd.f32 %v1440_v55, %v1431_v53  ;;  %v1449_v22 = vadd.f32 %v3789_v32, %v1434_v9 }
 0x56d   :  { %v1447_v26 = vadd.f32 %v1441_v56, %v1432_v39  ;;  %v1448_v24 = vadd.f32 %v1442_v23, %v1433_v16  ;;  %v1453_v29 = vmul.f32 %v3775_v47, %v3812_v13  ;;  %v1454_v36 = vmul.f32 %v3775_v47, %v3818_v4 }
 0x56e   :  { %v1455_v61 = vmul.f32 %v3775_v47, %v3820_v46  ;;  %v1456_v30 = vmul.f32 %v3775_v47, %v3814_v11  ;;  %v1463_v59 = vadd.f32 %v3792_v5, %v1449_v22  ;;  %v1464_v10 = vadd.f32 %v3792_v5, %v1450_v3 }
 0x56f   :  { %v1458_v57 = vadd.f32 %v1453_v29, %v1444_v54  ;;  %v1459_v32 = vadd.f32 %v1454_v36, %v1445_v17  ;;  %v1462_v31 = vadd.f32 %v3792_v5, %v1448_v24  ;;  %v1465_v6 = vadd.f32 %v3792_v5, %v1451_v45 }
 0x570   :  { %v1460_v44 = vadd.f32 %v1455_v61, %v1446_v7  ;;  %v1461_v41 = vadd.f32 %v1456_v30, %v1447_v26  ;;  %v1467_v12 = vmul.f32 %v3777_v20, %v3818_v4  ;;  %v1468_v19 = vmul.f32 %v3777_v20, %v3820_v46 }
 0x571   :  { %v1469_v47 = vmul.f32 %v3777_v20, %v3814_v11  ;;  %v1475_v48 = vadd.f32 %v3795_v21, %v1462_v31  ;;  %v1476_v38 = vadd.f32 %v3795_v21, %v1463_v59  ;;  %v1477_v28 = vadd.f32 %v3795_v21, %v1464_v10 }
 0x572   :  { %v1471_v40 = vadd.f32 %v1467_v12, %v1458_v57  ;;  %v1472_v25 = vadd.f32 %v1468_v19, %v1459_v32  ;;  %v1474_v5 = vadd.f32 %v3795_v21, %v1461_v41  ;;  %v1478_v2 = vadd.f32 %v3795_v21, %v1465_v6 }
 0x573   :  { %v1473_v15 = vadd.f32 %v1469_v47, %v1460_v44  ;;  %v1480_v50 = vmul.f32 %v3782_v0, %v3820_v46  ;;  %v1481_v20 = vmul.f32 %v3782_v0, %v3814_v11  ;;  %v1487_v14 = vadd.f32 %v3801_v52, %v1475_v48 }
 0x574   :  { %v1486_v58 = vadd.f32 %v3801_v52, %v1474_v5  ;;  %v1488_v33 = vadd.f32 %v3801_v52, %v1476_v38  ;;  %v1489_v62 = vadd.f32 %v3801_v52, %v1477_v28  ;;  %v1490_v37 = vadd.f32 %v3801_v52, %v1478_v2 }
 0x575   :  { %v1483_v34 = vadd.f32 %v1480_v50, %v1471_v40  ;;  %v1484_v21 = vadd.f32 %v1481_v20, %v1472_v25  ;;  %v1485_v53 = vadd.f32 %v3801_v52, %v1473_v15  ;;  %v3976_v16 = vadd.f32 %v2757_v51, %v1487_v14 }
 0x576   :  { %v3974_v39 = vadd.f32 %v2757_v51, %v1486_v58  ;;  %v3978_v9 = vadd.f32 %v2757_v51, %v1488_v33  ;;  %v3980_v55 = vadd.f32 %v2757_v51, %v1489_v62  ;;  %v3982_v56 = vadd.f32 %v2757_v51, %v1490_v37 }
 0x577   :  { %v1495_v0 = vadd.f32 %v2757_v51, %v1483_v34  ;;  %v1496_v27 = vadd.f32 %v2757_v51, %v1484_v21  ;;  %v1497_v8 = vadd.f32 %v2757_v51, %v1485_v53  ;;  %v1516_v52 = vmul.f32 0.044715, %v3976_v16 }
 0x578   :  { %v1515_v54 = vmul.f32 0.044715, %v3974_v39  ;;  %v1517_v17 = vmul.f32 0.044715, %v3978_v9  ;;  %v1518_v7 = vmul.f32 0.044715, %v3980_v55 }
 0x579   :  { %v1512_v23 = vmul.f32 0.044715, %v1495_v0  ;;  %v1513_v3 = vmul.f32 0.044715, %v1496_v27  ;;  %v1514_v45 = vmul.f32 0.044715, %v1497_v8  ;;  %v1524_v61 = vmul.f32 %v1516_v52, %v3976_v16 }
 0x57a   :  { %v1519_v26 = vmul.f32 0.044715, %v3982_v56  ;;  %v1523_v36 = vmul.f32 %v1515_v54, %v3974_v39  ;;  %v1525_v30 = vmul.f32 %v1517_v17, %v3978_v9  ;;  %v1526_v59 = vmul.f32 %v1518_v7, %v3980_v55 }
 0x57b   :  { %v1520_v22 = vmul.f32 %v1512_v23, %v1495_v0  ;;  %v1521_v24 = vmul.f32 %v1513_v3, %v1496_v27  ;;  %v1522_v29 = vmul.f32 %v1514_v45, %v1497_v8  ;;  %v1532_v44 = vmul.f32 %v1524_v61, %v3976_v16  ;;  %v1580_v3 = vpop.permute.xlu0 %1579 }
 0x57c   :  { %v1527_v57 = vmul.f32 %v1519_v26, %v3982_v56  ;;  %v1531_v6 = vmul.f32 %v1523_v36, %v3974_v39  ;;  %v1533_v41 = vmul.f32 %v1525_v30, %v3978_v9  ;;  %v1534_v12 = vmul.f32 %v1526_v59, %v3980_v55 }
 0x57d   :  { %v1528_v10 = vmul.f32 %v1520_v22, %v1495_v0  ;;  %v1529_v32 = vmul.f32 %v1521_v24, %v1496_v27  ;;  %v1530_v31 = vmul.f32 %v1522_v29, %v1497_v8  ;;  %v1540_v40 = vadd.f32 %v1532_v44, %v3976_v16 }
 0x57e   :  { %v1535_v47 = vmul.f32 %v1527_v57, %v3982_v56  ;;  %v1539_v28 = vadd.f32 %v1531_v6, %v3974_v39  ;;  %v1541_v25 = vadd.f32 %v1533_v41, %v3978_v9  ;;  %v1542_v5 = vadd.f32 %v1534_v12, %v3980_v55 }
 0x57f   :  { %v1536_v19 = vadd.f32 %v1528_v10, %v1495_v0  ;;  %v1537_v48 = vadd.f32 %v1529_v32, %v1496_v27  ;;  %v1538_v38 = vadd.f32 %v1530_v31, %v1497_v8  ;;  %v1548_v14 = vmul.f32 0.7978846, %v1540_v40 }
 0x580   :  { %v1543_v51 = vadd.f32 %v1535_v47, %v3982_v56  ;;  %v1547_v20 = vmul.f32 0.7978846, %v1539_v28  ;;  %v1549_v58 = vmul.f32 0.7978846, %v1541_v25  ;;  %v1550_v33 = vmul.f32 0.7978846, %v1542_v5 }
 0x581   :  { %v1544_v2 = vmul.f32 0.7978846, %v1536_v19  ;;  %v1545_v15 = vmul.f32 0.7978846, %v1537_v48  ;;  %v1546_v50 = vmul.f32 0.7978846, %v1538_v38 }
 0x582   :  { %v1551_v62 = vmul.f32 0.7978846, %v1543_v51  ;;  %v1504_v21 = vmul.f32 0.5, %v1495_v0  ;;  %v1505_v45 = vmul.f32 0.5, %v1496_v27  ;;  %v1506_v17 = vmul.f32 0.5, %v1497_v8 }
 0x583   :  { %2829 = vtanh.f32 %v1544_v2  ;;  %v1508_v7 = vmul.f32 0.5, %v3976_v16  ;;  %v1507_v29 = vmul.f32 0.5, %v3974_v39  ;;  %v1509_v36 = vmul.f32 0.5, %v3978_v9 }
 0x584   :  { %2831 = vtanh.f32 %v1545_v15  ;;  %v1510_v59 = vmul.f32 0.5, %v3980_v55  ;;  %v1511_v8 = vmul.f32 0.5, %v3982_v56 }
 0x585   :  { %2833 = vtanh.f32 %v1546_v50 }
 0x586   :  { %2835 = vtanh.f32 %v1547_v20 }
 0x587   :  { %2837 = vtanh.f32 %v1548_v14 }
 0x588   :  { %2839 = vtanh.f32 %v1549_v58 }
 0x589   :  { %v2830_v37 = vpop.eup %2829  ;;  %2841 = vtanh.f32 %v1550_v33 }
 0x58a   :  { %v2832_v34 = vpop.eup %2831  ;;  %2843 = vtanh.f32 %v1551_v62  ;;  %v1560_v53 = vadd.f32 1.0, %v2830_v37 }
 0x58b   :  { %v2834_v23 = vpop.eup %2833  ;;  %v1561_v54 = vadd.f32 1.0, %v2832_v34 }
 0x58c   :  { %v2836_v52 = vpop.eup %2835  ;;  %v1562_v22 = vadd.f32 1.0, %v2834_v23  ;;  %v1568_v26 = vmul.f32 %v1560_v53, %v1504_v21 }
 0x58d   :  { %v2838_v24 = vpop.eup %2837  ;;  %v1563_v61 = vadd.f32 1.0, %v2836_v52  ;;  %v1569_v30 = vmul.f32 %v1561_v54, %v1505_v45 }
 0x58e   :  { %v2840_v0 = vpop.eup %2839  ;;  %v1564_v10 = vadd.f32 1.0, %v2838_v24  ;;  %v1570_v57 = vmul.f32 %v1562_v22, %v1506_v17  ;;  %v1582_v27 = vmul.f32 %v1580_v3, %v1568_v26 }
 0x58f   :  { %v2842_v32 = vpop.eup %2841  ;;  %v1565_v31 = vadd.f32 1.0, %v2840_v0  ;;  %v1571_v16 = vmul.f32 %v1563_v61, %v1507_v29  ;;  %v1583_v6 = vmul.f32 %v1580_v3, %v1569_v30 }
 0x590   :  { %v2844_v44 = vpop.eup %2843  ;;  %v1566_v41 = vadd.f32 1.0, %v2842_v32  ;;  %v1572_v12 = vmul.f32 %v1564_v10, %v1508_v7  ;;  %v1584_v39 = vmul.f32 %v1580_v3, %v1570_v57  ;;  %v4010_v9 = vadd.f32 %v1582_v27, %v3816_v42  ;;  %v2682_v32 = vld [vmem:[%s4415_s16 + $0x8] sm:$0xff]  }
 0x591   :  { %v1567_v19 = vadd.f32 1.0, %v2844_v44  ;;  %v1573_v47 = vmul.f32 %v1565_v31, %v1509_v36  ;;  %v1585_v48 = vmul.f32 %v1580_v3, %v1571_v16  ;;  %v4013_v55 = vadd.f32 %v1583_v6, %v3806_v43 }
 0x592   :  { %v1574_v38 = vmul.f32 %v1566_v41, %v1510_v59  ;;  %v1586_v28 = vmul.f32 %v1580_v3, %v1572_v12  ;;  %v4016_v56 = vadd.f32 %v1584_v39, %v3808_v49  ;;  %v1600_v40 = vsel %vm174_vm0, %v4010_v9, 0.0 }
 0x593   :  { %v1575_v25 = vmul.f32 %v1567_v19, %v1511_v8  ;;  %v1587_v5 = vmul.f32 %v1580_v3, %v1573_v47  ;;  %v4021_v2 = vadd.f32 %v1585_v48, %v3810_v1  ;;  %v1601_v42 = vsel %vm174_vm0, %v4013_v55, 0.0  ;;  %v2655_v8 = vld [vmem:[%s4415_s16] sm:$0xff]  }
 0x594   :  { %v4026_v51 = vadd.f32 %v1586_v28, %v3812_v13  ;;  %v1602_v43 = vadd.f32 %v1601_v42, %v1600_v40  ;;  %v1603_v15 = vsel %vm174_vm0, %v4016_v56, 0.0  ;;  %v1588_v49 = vmul.f32 %v1580_v3, %v1574_v38 }
 0x595   :  { %v4031_v50 = vadd.f32 %v1587_v5, %v3818_v4  ;;  %v1605_v20 = vsel %vm174_vm0, %v4021_v2, 0.0  ;;  %v1622_v1 = vmul.f32 %v4010_v9, %v4010_v9  ;;  %v1623_v58 = vmul.f32 %v4013_v55, %v4013_v55 }
 0x596   :  { %v1604_v14 = vadd.f32 %v1603_v15, %v1602_v43  ;;  %v1589_v13 = vmul.f32 %v1580_v3, %v1575_v25  ;;  %v1607_v33 = vsel %vm174_vm0, %v4026_v51, 0.0  ;;  %v1624_v62 = vmul.f32 %v4016_v56, %v4016_v56 }
 0x597   :  { %v1625_v4 = vmul.f32 %v4021_v2, %v4021_v2  ;;  %v4046_v34 = vadd.f32 %v1588_v49, %v3820_v46  ;;  %v1609_v21 = vsel %vm174_vm0, %v4031_v50, 0.0  ;;  %v1626_v53 = vmul.f32 %v4026_v51, %v4026_v51 }
 0x598   :  { %v1606_v37 = vadd.f32 %v1605_v20, %v1604_v14  ;;  %v1630_v3 = vsel %vm174_vm0, %v1622_v1, 0.0  ;;  %v1631_v45 = vsel %vm174_vm0, %v1623_v58, 0.0  ;;  %v1633_v54 = vsel %vm174_vm0, %v1624_v62, 0.0 }
 0x599   :  { %v4056_v52 = vadd.f32 %v1589_v13, %v3814_v11  ;;  %v1632_v17 = vadd.f32 %v1631_v45, %v1630_v3  ;;  %v1627_v7 = vmul.f32 %v4031_v50, %v4031_v50  ;;  %v1635_v22 = vsel %vm174_vm0, %v1625_v4, 0.0 }
 0x59a   :  { %v1608_v23 = vadd.f32 %v1607_v33, %v1606_v37  ;;  %v1611_v26 = vsel %vm174_vm0, %v4046_v34, 0.0  ;;  %v1637_v36 = vsel %vm174_vm0, %v1626_v53, 0.0  ;;  %v1628_v0 = vmul.f32 %v4046_v34, %v4046_v34 }
 0x59b   :  { %v1634_v24 = vadd.f32 %v1633_v54, %v1632_v17  ;;  %v1613_v11 = vsel %vm174_vm0, %v4056_v52, 0.0  ;;  %v1639_v59 = vsel %vm174_vm0, %v1627_v7, 0.0  ;;  %v1629_v27 = vmul.f32 %v4056_v52, %v4056_v52  ;;  %v2758_v54 = vld [vmem:[%s4416_s20] ss:$0 sm:$0xff] }
 0x59c   :  { %v1610_v46 = vadd.f32 %v1609_v21, %v1608_v23  ;;  %v2661_v16 = vunpack.c.h.bf16 %v2682_v32  ;;  %v2660_v6 = vunpack.c.l.bf16 %v2682_v32  ;;  %v1641_v41 = vsel %vm174_vm0, %v1628_v0, 0.0 }
 0x59d   :  { %v1636_v61 = vadd.f32 %v1635_v22, %v1634_v24  ;;  %v2657_v39 = vunpack.c.h.bf16 %v2655_v8  ;;  %v1643_v47 = vsel %vm174_vm0, %v1629_v27, 0.0  ;;  %v2656_v38 = vunpack.c.l.bf16 %v2655_v8 }
 0x59e   :  { %v1612_v29 = vadd.f32 %v1611_v26, %v1610_v46  ;;  %1767 = vmatpush.msra.mxu3 %v2661_v16  ;;  %v2759_v46 = vld [vmem:[%s4417_s22] ss:$0 sm:$0xff] }
 0x59f   :  { %v1638_v10 = vadd.f32 %v1637_v36, %v1636_v61 }
 0x5a0   :  { %v1614_v30 = vadd.f32 %v1613_v11, %v1612_v29  ;;  %1768 = vmatpush.msra.mxu3 %v2660_v6 }
 0x5a1   :  { %v1640_v31 = vadd.f32 %v1639_v59, %v1638_v10 }
 0x5a2   :  { %v1615_v57 = vrot.slane %v1614_v30, 4  ;;  %1769 = vmatpush.msra.mxu3 %v2657_v39 }
 0x5a3   :  { %v1642_v12 = vadd.f32 %v1641_v41, %v1640_v31 }
 0x5a4   :  { %v1616_v44 = vadd.f32 %v1615_v57, %v1614_v30  ;;  %1770 = vmatpush.msra.mxu3 %v2656_v38 }
 0x5a5   :  { %v1644_v48 = vadd.f32 %v1643_v47, %v1642_v12 }
 0x5a6   :  { %v1617_v19 = vrot.slane %v1616_v44, 2 }
 0x5a7   :  { %v1645_v40 = vrot.slane %v1644_v48, 4 }
 0x5a8   :  { %v1618_v28 = vadd.f32 %v1617_v19, %v1616_v44 }
 0x5a9   :  { %v1646_v5 = vadd.f32 %v1645_v40, %v1644_v48  ;;  %v2760_v48 = vld [vmem:[%s4418_s23] ss:$0 sm:$0xff] }
 0x5aa   :  { %v1619_v25 = vrot.slane %v1618_v28, 1 }
 0x5ab   :  { %v1647_v43 = vrot.slane %v1646_v5, 2 }
 0x5ac   :  { %v1620_v42 = vadd.f32 %v1619_v25, %v1618_v28 }
 0x5ad   :  { %v1648_v49 = vadd.f32 %v1647_v43, %v1646_v5 }
 0x5ae   :  { %v1621_v15 = vmul.f32 %v1620_v42, %v3487_v18 }
 0x5af   :  { %v1649_v20 = vrot.slane %v1648_v49, 1 }
 0x5b0   :  { %v1660_v14 = vsub.f32 %v4046_v34, %v1621_v15  ;;  %v1661_v1 = vsub.f32 %v4056_v52, %v1621_v15  ;;  %v1652_v13 = vmul.f32 %v1621_v15, %v1621_v15  ;;  %v1654_v34 = vsub.f32 %v4010_v9, %v1621_v15 }
 0x5b1   :  { %v1650_v58 = vadd.f32 %v1649_v20, %v1648_v49  ;;  %v1655_v22 = vsub.f32 %v4013_v55, %v1621_v15  ;;  %v1656_v36 = vsub.f32 %v4016_v56, %v1621_v15  ;;  %v1657_v30 = vsub.f32 %v4021_v2, %v1621_v15 }
 0x5b2   :  { %v1658_v10 = vsub.f32 %v4026_v51, %v1621_v15  ;;  %v1659_v32 = vsub.f32 %v4031_v50, %v1621_v15 }
 0x5b3   :  { %v1651_v33 = vmul.f32 %v1650_v58, %v3487_v18 }
 0x5b5   :  { %v1653_v62 = vsub.f32 %v1651_v33, %v1652_v13 }
 0x5b7   :  { %v1662_v37 = vadd.f32 1e-05, %v1653_v62 }
 0x5b9   :  { %2845 = vrsqrt.f32 %v1662_v37  ;;  %vm1669_vm3 = vweird.f32 %v1662_v37 }
 0x5bf   :  { %v2846_v4 = vpop.eup %2845 }
 0x5c0   :  { %v1664_v21 = vmul.f32 %v2846_v4, %v1662_v37  ;;  %vm1670_vm2 = vweird.f32 %v2846_v4 }
 0x5c1   :  { %vm1671_vm4 = vmor %vm1669_vm3, %vm1670_vm2 }
 0x5c2   :  { %v1665_v53 = vmul.f32 %v2846_v4, %v1664_v21 }
 0x5c4   :  { %v1666_v23 = vmul.f32 0.5, %v1665_v53 }
 0x5c6   :  { %v1667_v3 = vsub.f32 1.5, %v1666_v23 }
 0x5c8   :  { %v1668_v45 = vmul.f32 %v2846_v4, %v1667_v3 }
 0x5ca   :  { %v1672_v52 = vsel %vm1671_vm4, %v2846_v4, %v1668_v45 }
 0x5cb   :  { %v1673_v17 = vmul.f32 %v1672_v52, %v1654_v34  ;;  %v1674_v24 = vmul.f32 %v1672_v52, %v1655_v22  ;;  %v1675_v9 = vmul.f32 %v1672_v52, %v1656_v36  ;;  %v1676_v55 = vmul.f32 %v1672_v52, %v1657_v30 }
 0x5cc   :  { %v1677_v56 = vmul.f32 %v1672_v52, %v1658_v10  ;;  %v1678_v2 = vmul.f32 %v1672_v52, %v1659_v32  ;;  %v1679_v51 = vmul.f32 %v1672_v52, %v1660_v14  ;;  %v1680_v41 = vmul.f32 %v1672_v52, %v1661_v1 }
 0x5cd   :  { %v1684_v7 = vmul.f32 %v2758_v54, %v1673_v17  ;;  %v1685_v29 = vmul.f32 %v2758_v54, %v1674_v24  ;;  %v1686_v61 = vmul.f32 %v2758_v54, %v1675_v9  ;;  %v1687_v59 = vmul.f32 %v2758_v54, %v1676_v55 }
 0x5ce   :  { %v1688_v27 = vmul.f32 %v2758_v54, %v1677_v56  ;;  %v1689_v31 = vmul.f32 %v2758_v54, %v1678_v2  ;;  %v1690_v6 = vmul.f32 %v2758_v54, %v1679_v51  ;;  %v1691_v50 = vmul.f32 %v2758_v54, %v1680_v41 }
 0x5cf   :  { %v4083_v26 = vadd.f32 %v2759_v46, %v1684_v7  ;;  %v4088_v11 = vadd.f32 %v2759_v46, %v1685_v29  ;;  %v4093_v0 = vadd.f32 %v2759_v46, %v1686_v61  ;;  %v4098_v57 = vadd.f32 %v2759_v46, %v1687_v59 }
 0x5d0   :  { %v4103_v8 = vadd.f32 %v2759_v46, %v1688_v27  ;;  %v4107_v16 = vadd.f32 %v2759_v46, %v1689_v31  ;;  %v4111_v44 = vadd.f32 %v2759_v46, %v1690_v6  ;;  %v4115_v12 = vadd.f32 %v2759_v46, %v1691_v50 }
 0x5d1   :  { %2578 = vmatmul.msk.f32.vlgmr.msra.gmra.mxu3 %vm174_vm0, %v4083_v26 }
 0x5d9   :  { %2579 = vmatmul.msk.f32.gmra.mxu3 %vm174_vm0, %v4088_v11 }
 0x5e1   :  { %2580 = vmatmul.msk.f32.gmra.mxu3 %vm174_vm0, %v4093_v0 }
 0x5e9   :  { %2581 = vmatmul.msk.f32.gmra.mxu3 %vm174_vm0, %v4098_v57 }
 0x5f1   :  { %2582 = vmatmul.msk.f32.gmra.mxu3 %vm174_vm0, %v4103_v8 }
 0x5f9   :  { %2583 = vmatmul.msk.f32.gmra.mxu3 %vm174_vm0, %v4107_v16 }
 0x601   :  { %2584 = vmatmul.msk.f32.gmra.mxu3 %vm174_vm0, %v4111_v44 }
 0x609   :  { %2585 = vmatmul.msk.f32.gmra.mxu3 %vm174_vm0, %v4115_v12 }
 0x654   :  { %v1772_v39 = vpop.f32.mrf.mxu3 }
 0x655   :  { %v1773_v28 = vadd.f32 %v2760_v48, %v1772_v39 }
 0x657   :  { %v1804_v43 = vmul.f32 0.044715, %v1773_v28 }
 0x659   :  { %v1812_v14 = vmul.f32 %v1804_v43, %v1773_v28 }
 0x65b   :  { %v1820_v4 = vmul.f32 %v1812_v14, %v1773_v28 }
 0x65c   :  { %v1775_v19 = vpop.f32.mrf.mxu3 }
 0x65d   :  { %v1776_v38 = vadd.f32 %v2760_v48, %v1775_v19  ;;  %v1828_v45 = vadd.f32 %v1820_v4, %v1773_v28 }
 0x65f   :  { %v1805_v5 = vmul.f32 0.044715, %v1776_v38  ;;  %v1836_v24 = vmul.f32 0.7978846, %v1828_v45 }
 0x661   :  { %v1813_v49 = vmul.f32 %v1805_v5, %v1776_v38 }
 0x663   :  { %v1821_v33 = vmul.f32 %v1813_v49, %v1776_v38 }
 0x664   :  { %v1778_v47 = vpop.f32.mrf.mxu3 }
 0x665   :  { %v4120_v25 = vadd.f32 %v2760_v48, %v1778_v47  ;;  %v1829_v23 = vadd.f32 %v1821_v33, %v1776_v38 }
 0x667   :  { %v1806_v15 = vmul.f32 0.044715, %v4120_v25  ;;  %v1837_v46 = vmul.f32 0.7978846, %v1829_v23 }
 0x669   :  { %v1814_v58 = vmul.f32 %v1806_v15, %v4120_v25  ;;  %2847 = vtanh.f32 %v1837_v46  ;;  %v1796_v15 = vmul.f32 0.5, %v1773_v28 }
 0x66a   :  { %2849 = vtanh.f32 %v1836_v24 }
 0x66b   :  { %v1822_v21 = vmul.f32 %v1814_v58, %v4120_v25 }
 0x66c   :  { %v1781_v40 = vpop.f32.mrf.mxu3 }
 0x66d   :  { %v4122_v42 = vadd.f32 %v2760_v48, %v1781_v40  ;;  %v1830_v54 = vadd.f32 %v1822_v21, %v4120_v25  ;;  %v1797_v40 = vmul.f32 0.5, %v1776_v38 }
 0x66f   :  { %v1807_v20 = vmul.f32 0.044715, %v4122_v42  ;;  %v1838_v29 = vmul.f32 0.7978846, %v1830_v54  ;;  %v2848_v2 = vpop.eup %2847  ;;  %v1799_v21 = vmul.f32 0.5, %v4122_v42 }
 0x670   :  { %v2850_v51 = vpop.eup %2849  ;;  %v1853_v41 = vadd.f32 1.0, %v2848_v2 }
 0x671   :  { %v1815_v62 = vmul.f32 %v1807_v20, %v4122_v42  ;;  %2851 = vtanh.f32 %v1838_v29  ;;  %v1852_v47 = vadd.f32 1.0, %v2850_v51 }
 0x672   :  { %v4138_v14 = vmul.f32 %v1853_v41, %v1797_v40  ;;  %v2684_v41 = vld [vmem:[%s4419_s28 + $0x10] sm:$0xff]  }
 0x673   :  { %v1823_v3 = vmul.f32 %v1815_v62, %v4122_v42  ;;  %v1798_v62 = vmul.f32 0.5, %v4120_v25  ;;  %v4141_v4 = vmul.f32 %v1852_v47, %v1796_v15 }
 0x674   :  { %v1784_v1 = vpop.f32.mrf.mxu3  ;;  %v1893_v28 = vmul.f32 %v4138_v14, %v4138_v14 }
 0x675   :  { %v4127_v13 = vadd.f32 %v2760_v48, %v1784_v1  ;;  %v1831_v7 = vadd.f32 %v1823_v3, %v4122_v42  ;;  %v1892_v25 = vmul.f32 %v4141_v4, %v4141_v4  ;;  %v1871_v42 = vsel %vm943_vm10, %v4138_v14, 0.0 }
 0x676   :  { %v1870_v24 = vsel %vm943_vm10, %v4141_v4, 0.0 }
 0x677   :  { %v1808_v37 = vmul.f32 0.044715, %v4127_v13  ;;  %v1839_v61 = vmul.f32 0.7978846, %v1831_v7  ;;  %v2852_v6 = vpop.eup %2851  ;;  %v1800_v45 = vmul.f32 0.5, %v4127_v13 }
 0x678   :  { %v1854_v49 = vadd.f32 1.0, %v2852_v6 }
 0x679   :  { %v1816_v53 = vmul.f32 %v1808_v37, %v4127_v13  ;;  %2853 = vtanh.f32 %v1839_v61 }
 0x67a   :  { %v4144_v38 = vmul.f32 %v1854_v49, %v1798_v62 }
 0x67b   :  { %v1824_v52 = vmul.f32 %v1816_v53, %v4127_v13 }
 0x67c   :  { %v1787_v34 = vpop.f32.mrf.mxu3 }
 0x67d   :  { %v1788_v17 = vadd.f32 %v2760_v48, %v1787_v34  ;;  %v1832_v36 = vadd.f32 %v1824_v52, %v4127_v13  ;;  %v1894_v52 = vmul.f32 %v4144_v38, %v4144_v38  ;;  %v1901_v13 = vsel %vm943_vm10, %v1893_v28, 0.0 }
 0x67f   :  { %v1809_v22 = vmul.f32 0.044715, %v1788_v17  ;;  %v1840_v59 = vmul.f32 0.7978846, %v1832_v36  ;;  %v2854_v39 = vpop.eup %2853  ;;  %v1801_v7 = vmul.f32 0.5, %v1788_v17 }
 0x680   :  { %v1855_v1 = vadd.f32 1.0, %v2854_v39 }
 0x681   :  { %v1817_v9 = vmul.f32 %v1809_v22, %v1788_v17  ;;  %2855 = vtanh.f32 %v1840_v59  ;;  %v1872_v59 = vadd.f32 %v1871_v42, %v1870_v24 }
 0x682   :  { %v4148_v23 = vmul.f32 %v1855_v1, %v1799_v21  ;;  %v2673_v1 = vunpack.c.h.bf16 %v2684_v41  ;;  %v2683_v21 = vld [vmem:[%s4419_s28 + $0x8] sm:$0xff]  }
 0x683   :  { %v1825_v30 = vmul.f32 %v1817_v9, %v1788_v17  ;;  %v1873_v9 = vsel %vm943_vm10, %v4144_v38, 0.0  ;;  %v2669_v42 = vunpack.c.h.bf16 %v2683_v21 }
 0x684   :  { %v1790_v55 = vpop.f32.mrf.mxu3  ;;  %v1895_v29 = vmul.f32 %v4148_v23, %v4148_v23  ;;  %v1874_v51 = vadd.f32 %v1873_v9, %v1872_v59 }
 0x685   :  { %v1833_v10 = vadd.f32 %v1825_v30, %v1788_v17  ;;  %v1791_v56 = vadd.f32 %v2760_v48, %v1790_v55  ;;  %v1900_v17 = vsel %vm943_vm10, %v1892_v25, 0.0 }
 0x686   :  { %v1905_v6 = vsel %vm943_vm10, %v1895_v29, 0.0 }
 0x687   :  { %v1841_v27 = vmul.f32 0.7978846, %v1833_v10  ;;  %v1810_v32 = vmul.f32 0.044715, %v1791_v56  ;;  %v2856_v20 = vpop.eup %2855  ;;  %v1802_v30 = vmul.f32 0.5, %v1791_v56  ;;  %v1903_v10 = vsel %vm943_vm10, %v1894_v52, 0.0 }
 0x689   :  { %v1818_v31 = vmul.f32 %v1810_v32, %v1791_v56  ;;  %2857 = vtanh.f32 %v1841_v27  ;;  %v1875_v27 = vsel %vm943_vm10, %v4148_v23, 0.0 }
 0x68b   :  { %v1826_v50 = vmul.f32 %v1818_v31, %v1791_v56  ;;  %v1902_v31 = vadd.f32 %v1901_v13, %v1900_v17  ;;  %v2668_v13 = vunpack.c.l.bf16 %v2683_v21 }
 0x68c   :  { %v1793_v19 = vpop.f32.mrf.mxu3 }
 0x68d   :  { %v1834_v5 = vadd.f32 %v1826_v50, %v1791_v56  ;;  %v1794_v43 = vadd.f32 %v2760_v48, %v1793_v19  ;;  %v1856_v48 = vadd.f32 1.0, %v2856_v20  ;;  %v2685_v56 = vld [vmem:[%s4419_s28 + $0x18] sm:$0xff]   ;;  %v1904_v40 = vadd.f32 %v1903_v10, %v1902_v31 }
 0x68e   :  { %v2677_v19 = vunpack.c.h.bf16 %v2685_v56  ;;  %v2676_v47 = vunpack.c.l.bf16 %v2685_v56 }
 0x68f   :  { %v1842_v58 = vmul.f32 0.7978846, %v1834_v5  ;;  %v1811_v33 = vmul.f32 0.044715, %v1794_v43  ;;  %v2858_v37 = vpop.eup %2857  ;;  %v4157_v46 = vmul.f32 %v1856_v48, %v1800_v45  ;;  %v1876_v5 = vadd.f32 %v1875_v27, %v1874_v51 }
 0x690   :  { %v1857_v34 = vadd.f32 1.0, %v2858_v37  ;;  %2009 = vmatpush.msrb.mxu0 %v2677_v19  ;;  %v1803_v37 = vmul.f32 0.5, %v1794_v43 }
 0x691   :  { %2859 = vtanh.f32 %v1842_v58  ;;  %v1819_v53 = vmul.f32 %v1811_v33, %v1794_v43  ;;  %v1896_v32 = vmul.f32 %v4157_v46, %v4157_v46  ;;  %v1877_v50 = vsel %vm943_vm10, %v4157_v46, 0.0 }
 0x692   :  { %v4166_v61 = vmul.f32 %v1857_v34, %v1801_v7  ;;  %v1906_v33 = vadd.f32 %v1905_v6, %v1904_v40  ;;  %v1878_v62 = vadd.f32 %v1877_v50, %v1876_v5  ;;  %2010 = vmatpush.msrb.mxu0 %v2676_v47 }
 0x693   :  { %v1827_v3 = vmul.f32 %v1819_v53, %v1794_v43  ;;  %v1907_v15 = vsel %vm943_vm10, %v1896_v32, 0.0 }
 0x694   :  { %v1897_v39 = vmul.f32 %v4166_v61, %v4166_v61  ;;  %v1879_v49 = vsel %vm943_vm10, %v4166_v61, 0.0  ;;  %v1908_v45 = vadd.f32 %v1907_v15, %v1906_v33  ;;  %2011 = vmatpush.msrb.mxu0 %v2673_v1 }
 0x695   :  { %v1835_v54 = vadd.f32 %v1827_v3, %v1794_v43  ;;  %v2672_v3 = vunpack.c.l.bf16 %v2684_v41  ;;  %v1880_v34 = vadd.f32 %v1879_v49, %v1878_v62  ;;  %v2663_v43 = vld [vmem:[%s4419_s28] sm:$0xff]  }
 0x696   :  { %v1909_v53 = vsel %vm943_vm10, %v1897_v39, 0.0  ;;  %v2664_v59 = vunpack.c.l.bf16 %v2663_v43 }
 0x697   :  { %v2860_v22 = vpop.eup %2859  ;;  %v1843_v36 = vmul.f32 0.7978846, %v1835_v54  ;;  %v1910_v52 = vadd.f32 %v1909_v53, %v1908_v45  ;;  %2012 = vmatpush.msrb.mxu0 %v2672_v3 }
 0x698   :  { %v1858_v55 = vadd.f32 1.0, %v2860_v22 }
 0x699   :  { %2861 = vtanh.f32 %v1843_v36  ;;  %2013 = vmatpush.msrb.mxu0 %v2669_v42 }
 0x69a   :  { %v4174_v2 = vmul.f32 %v1858_v55, %v1802_v30  ;;  %v2665_v30 = vunpack.c.h.bf16 %v2663_v43 }
 0x69b   :  { %2014 = vmatpush.msrb.mxu0 %v2668_v13 }
 0x69c   :  { %v1898_v20 = vmul.f32 %v4174_v2, %v4174_v2  ;;  %v1881_v48 = vsel %vm943_vm10, %v4174_v2, 0.0 }
 0x69d   :  { %v1882_v7 = vadd.f32 %v1881_v48, %v1880_v34  ;;  %2015 = vmatpush.msrb.mxu0 %v2665_v30 }
 0x69e   :  { %v1911_v25 = vsel %vm943_vm10, %v1898_v20, 0.0 }
 0x69f   :  { %v2862_v58 = vpop.eup %2861  ;;  %v1912_v29 = vadd.f32 %v1911_v25, %v1910_v52  ;;  %2016 = vmatpush.msrb.mxu0 %v2664_v59 }
 0x6a0   :  { %v1859_v28 = vadd.f32 1.0, %v2862_v58 }
 0x6a2   :  { %v4193_v54 = vmul.f32 %v1859_v28, %v1803_v37  ;;  %v2761_v28 = vld [vmem:[%s4420_s27] ss:$0 sm:$0xff] }
 0x6a4   :  { %v1883_v22 = vsel %vm943_vm10, %v4193_v54, 0.0  ;;  %v1899_v24 = vmul.f32 %v4193_v54, %v4193_v54 }
 0x6a5   :  { %v1884_v36 = vadd.f32 %v1883_v22, %v1882_v7 }
 0x6a6   :  { %v1913_v9 = vsel %vm943_vm10, %v1899_v24, 0.0 }
 0x6a7   :  { %v1885_v55 = vrot.slane %v1884_v36, 4  ;;  %v1914_v17 = vadd.f32 %v1913_v9, %v1912_v29 }
 0x6a9   :  { %v1886_v10 = vadd.f32 %v1885_v55, %v1884_v36  ;;  %v1915_v27 = vrot.slane %v1914_v17, 4 }
 0x6ab   :  { %v1887_v32 = vrot.slane %v1886_v10, 2  ;;  %v1916_v31 = vadd.f32 %v1915_v27, %v1914_v17 }
 0x6ad   :  { %v1888_v51 = vadd.f32 %v1887_v32, %v1886_v10  ;;  %v1917_v6 = vrot.slane %v1916_v31, 2 }
 0x6af   :  { %v1889_v56 = vrot.slane %v1888_v51, 1  ;;  %v1918_v41 = vadd.f32 %v1917_v6, %v1916_v31 }
 0x6b1   :  { %v1890_v50 = vadd.f32 %v1889_v56, %v1888_v51  ;;  %v1919_v39 = vrot.slane %v1918_v41, 1 }
 0x6b3   :  { %v1891_v19 = vmul.f32 %v1890_v50, %v3487_v18  ;;  %v1920_v47 = vadd.f32 %v1919_v39, %v1918_v41  ;;  %v4222_v41 = vld [vmem:[%s4422_s7] ss:$0 sm:$0xff] }
 0x6b5   :  { %v1921_v40 = vmul.f32 %v1920_v47, %v3487_v18  ;;  %v1922_v5 = vmul.f32 %v1891_v19, %v1891_v19  ;;  %v1930_v49 = vsub.f32 %v4174_v2, %v1891_v19  ;;  %v1931_v20 = vsub.f32 %v4193_v54, %v1891_v19  ;;  %v2762_v2 = vld [vmem:[%s4421_s1] ss:$0 sm:$0xff] }
 0x6b6   :  { %v1924_v48 = vsub.f32 %v4141_v4, %v1891_v19  ;;  %v1925_v25 = vsub.f32 %v4138_v14, %v1891_v19  ;;  %v1926_v7 = vsub.f32 %v4144_v38, %v1891_v19  ;;  %v1927_v24 = vsub.f32 %v4148_v23, %v1891_v19 }
 0x6b7   :  { %v1923_v15 = vsub.f32 %v1921_v40, %v1922_v5  ;;  %v1928_v14 = vsub.f32 %v4157_v46, %v1891_v19  ;;  %v1929_v38 = vsub.f32 %v4166_v61, %v1891_v19 }
 0x6b9   :  { %v1932_v1 = vadd.f32 1e-05, %v1923_v15 }
 0x6bb   :  { %2863 = vrsqrt.f32 %v1932_v1  ;;  %vm1939_vm6 = vweird.f32 %v1932_v1 }
 0x6c1   :  { %v2864_v58 = vpop.eup %2863 }
 0x6c2   :  { %v1934_v33 = vmul.f32 %v2864_v58, %v1932_v1  ;;  %vm1940_vm5 = vweird.f32 %v2864_v58 }
 0x6c3   :  { %vm1941_vm7 = vmor %vm1939_vm6, %vm1940_vm5 }
 0x6c4   :  { %v1935_v62 = vmul.f32 %v2864_v58, %v1934_v33 }
 0x6c6   :  { %v1936_v37 = vmul.f32 0.5, %v1935_v62 }
 0x6c8   :  { %v1937_v21 = vsub.f32 1.5, %v1936_v37 }
 0x6ca   :  { %v1938_v53 = vmul.f32 %v2864_v58, %v1937_v21 }
 0x6cc   :  { %v1942_v3 = vsel %vm1941_vm7, %v2864_v58, %v1938_v53 }
 0x6cd   :  { %v1943_v45 = vmul.f32 %v1942_v3, %v1924_v48  ;;  %v1944_v42 = vmul.f32 %v1942_v3, %v1925_v25  ;;  %v1945_v22 = vmul.f32 %v1942_v3, %v1926_v7  ;;  %v1946_v29 = vmul.f32 %v1942_v3, %v1927_v24 }
 0x6ce   :  { %v1947_v30 = vmul.f32 %v1942_v3, %v1928_v14  ;;  %v1948_v59 = vmul.f32 %v1942_v3, %v1929_v38  ;;  %v1949_v27 = vmul.f32 %v1942_v3, %v1930_v49  ;;  %v1950_v46 = vmul.f32 %v1942_v3, %v1931_v20 }
 0x6cf   :  { %v1954_v34 = vmul.f32 %v2761_v28, %v1943_v45  ;;  %v1955_v52 = vmul.f32 %v2761_v28, %v1944_v42  ;;  %v1956_v4 = vmul.f32 %v2761_v28, %v1945_v22  ;;  %v1957_v36 = vmul.f32 %v2761_v28, %v1946_v29 }
 0x6d0   :  { %v1958_v55 = vmul.f32 %v2761_v28, %v1947_v30  ;;  %v1959_v23 = vmul.f32 %v2761_v28, %v1948_v59  ;;  %v1960_v32 = vmul.f32 %v2761_v28, %v1949_v27  ;;  %v1961_v51 = vmul.f32 %v2761_v28, %v1950_v46 }
 0x6d1   :  { %v1965_v54 = vadd.f32 %v2762_v2, %v1954_v34  ;;  %v1966_v43 = vadd.f32 %v2762_v2, %v1955_v52  ;;  %v1967_v13 = vadd.f32 %v2762_v2, %v1956_v4  ;;  %v1968_v9 = vadd.f32 %v2762_v2, %v1957_v36 }
 0x6d2   :  { %v1969_v17 = vadd.f32 %v2762_v2, %v1958_v55  ;;  %v1970_v10 = vadd.f32 %v2762_v2, %v1959_v23  ;;  %v1971_v31 = vadd.f32 %v2762_v2, %v1960_v32  ;;  %v1972_v6 = vadd.f32 %v2762_v2, %v1961_v51 }
 0x6d3   :  { %2586 = vmatmul.msk.f32.vlgmr.msrb.gmra.mxu0 %vm943_vm10, %v1965_v54 }
 0x6db   :  { %2587 = vmatmul.msk.f32.gmra.mxu0 %vm943_vm10, %v1966_v43 }
 0x6e3   :  { %2588 = vmatmul.msk.f32.gmra.mxu0 %vm943_vm10, %v1967_v13 }
 0x6eb   :  { %2589 = vmatmul.msk.f32.gmra.mxu0 %vm943_vm10, %v1968_v9 }
 0x6f3   :  { %2590 = vmatmul.msk.f32.gmra.mxu0 %vm943_vm10, %v1969_v17 }
 0x6fb   :  { %2591 = vmatmul.msk.f32.gmra.mxu0 %vm943_vm10, %v1970_v10 }
 0x703   :  { %2592 = vmatmul.msk.f32.gmra.mxu0 %vm943_vm10, %v1971_v31 }
 0x70b   :  { %2593 = vmatmul.msk.f32.gmra.mxu0 %vm943_vm10, %v1972_v6 }
 0x750   :  { %v2018_v61 = vpop.f32.mrf.mxu0 }
 0x751   :  { %v2019_v19 = vadd.f32 %v4222_v41, %v2018_v61 }
 0x753   :  { %v2050_v5 = vmul.f32 0.044715, %v2019_v19 }
 0x755   :  { %v2058_v33 = vmul.f32 %v2050_v5, %v2019_v19  ;;  %v2042_v5 = vmul.f32 0.5, %v2019_v19 }
 0x757   :  { %v2066_v53 = vmul.f32 %v2058_v33, %v2019_v19 }
 0x758   :  { %v2021_v56 = vpop.f32.mrf.mxu0 }
 0x759   :  { %v2022_v39 = vadd.f32 %v4222_v41, %v2021_v56  ;;  %v2074_v25 = vadd.f32 %v2066_v53, %v2019_v19 }
 0x75b   :  { %v2051_v40 = vmul.f32 0.044715, %v2022_v39  ;;  %v2082_v22 = vmul.f32 0.7978846, %v2074_v25  ;;  %v2043_v56 = vmul.f32 0.5, %v2022_v39 }
 0x75d   :  { %v2059_v1 = vmul.f32 %v2051_v40, %v2022_v39 }
 0x75f   :  { %v2067_v21 = vmul.f32 %v2059_v1, %v2022_v39 }
 0x760   :  { %v2024_v50 = vpop.f32.mrf.mxu0 }
 0x761   :  { %v2025_v47 = vadd.f32 %v4222_v41, %v2024_v50  ;;  %v2075_v2 = vadd.f32 %v2067_v21, %v2022_v39 }
 0x763   :  { %v2052_v49 = vmul.f32 0.044715, %v2025_v47  ;;  %v2083_v7 = vmul.f32 0.7978846, %v2075_v2  ;;  %v4232_v2 = vpop.permute.xlu1 %2118 }
 0x765   :  { %v2060_v62 = vmul.f32 %v2052_v49, %v2025_v47  ;;  %2865 = vtanh.f32 %v2083_v7 }
 0x766   :  { %2867 = vtanh.f32 %v2082_v22 }
 0x767   :  { %v2068_v28 = vmul.f32 %v2060_v62, %v2025_v47 }
 0x768   :  { %v2027_v15 = vpop.f32.mrf.mxu0 }
 0x769   :  { %v2028_v20 = vadd.f32 %v4222_v41, %v2027_v15  ;;  %v2076_v54 = vadd.f32 %v2068_v28, %v2025_v47 }
 0x76b   :  { %v2053_v58 = vmul.f32 0.044715, %v2028_v20  ;;  %v2084_v24 = vmul.f32 0.7978846, %v2076_v54  ;;  %v2866_v17 = vpop.eup %2865 }
 0x76c   :  { %v2868_v10 = vpop.eup %2867  ;;  %v2099_v51 = vadd.f32 1.0, %v2866_v17 }
 0x76d   :  { %v2061_v37 = vmul.f32 %v2053_v58, %v2028_v20  ;;  %2869 = vtanh.f32 %v2084_v24  ;;  %v2098_v6 = vadd.f32 1.0, %v2868_v10  ;;  %v2044_v58 = vmul.f32 0.5, %v2025_v47 }
 0x76e   :  { %v2107_v1 = vmul.f32 %v2099_v51, %v2043_v56 }
 0x76f   :  { %v2069_v45 = vmul.f32 %v2061_v37, %v2028_v20  ;;  %v2106_v62 = vmul.f32 %v2098_v6, %v2042_v5  ;;  %v2045_v37 = vmul.f32 0.5, %v2028_v20 }
 0x770   :  { %v2030_v48 = vpop.f32.mrf.mxu0  ;;  %v2122_v19 = vmul.f32 %v4232_v2, %v2107_v1  ;;  %v2598_v1 = vld [vmem:[%s4423_s4 + $0x38] sm:$0xff] }
 0x771   :  { %v2031_v3 = vadd.f32 %v4222_v41, %v2030_v48  ;;  %v2077_v52 = vadd.f32 %v2069_v45, %v2028_v20  ;;  %v2121_v47 = vmul.f32 %v4232_v2, %v2106_v62  ;;  %2295 = vmatpush.msrb.mxu3 %v2598_v1  ;;  %v2603_v1 = vld [vmem:[%s4423_s4 + $0x58] sm:$0xff] }
 0x773   :  { %v2054_v34 = vmul.f32 0.044715, %v2031_v3  ;;  %v2085_v36 = vmul.f32 0.7978846, %v2077_v52  ;;  %v2870_v27 = vpop.eup %2869  ;;  %v2046_v54 = vmul.f32 0.5, %v2031_v3 }
 0x774   :  { %v2100_v50 = vadd.f32 1.0, %v2870_v27 }
 0x775   :  { %v2062_v42 = vmul.f32 %v2054_v34, %v2031_v3  ;;  %2871 = vtanh.f32 %v2085_v36 }
 0x776   :  { %v2108_v48 = vmul.f32 %v2100_v50, %v2044_v58  ;;  %v2250_v58 = vld [vmem:[%s4423_s4 + $0x18] sm:$0xff] }
 0x777   :  { %v2070_v43 = vmul.f32 %v2062_v42, %v2031_v3  ;;  %2266 = vmatpush.msrb.mxu1 %v2250_v58  ;;  %v2623_v58 = vld [vmem:[%s4423_s4 + $0xd8] sm:$0xff] }
 0x778   :  { %v2033_v4 = vpop.f32.mrf.mxu0  ;;  %v2123_v20 = vmul.f32 %v4232_v2, %v2108_v48  ;;  %v2597_v48 = vld [vmem:[%s4423_s4 + $0x30] sm:$0xff] }
 0x779   :  { %v2078_v13 = vadd.f32 %v2070_v43, %v2031_v3  ;;  %v2034_v29 = vadd.f32 %v4222_v41, %v2033_v4  ;;  %v4239_v4 = vadd.f32 %v2122_v19, %v4088_v11  ;;  %v2248_v19 = vld [vmem:[%s4423_s4 + $0x8] sm:$0xff]  ;;  %2296 = vmatpush.msrb.mxu3 %v2597_v48 }
 0x77a   :  { %v4245_v36 = vadd.f32 %v2123_v20, %v4093_v0  ;;  %v2611_v48 = vld [vmem:[%s4423_s4 + $0x88] sm:$0xff] }
 0x77b   :  { %v2055_v14 = vmul.f32 0.044715, %v2034_v29  ;;  %v2086_v9 = vmul.f32 0.7978846, %v2078_v13  ;;  %v2872_v46 = vpop.eup %2871  ;;  %v4242_v13 = vadd.f32 %v2121_v47, %v4083_v26  ;;  %v2140_v0 = vsel %vm174_vm0, %v4239_v4, 0.0 }
 0x77c   :  { %v2101_v15 = vadd.f32 1.0, %v2872_v46 }
 0x77d   :  { %v2063_v30 = vmul.f32 %v2055_v14, %v2034_v29  ;;  %2873 = vtanh.f32 %v2086_v9  ;;  %v2161_v26 = vmul.f32 %v4242_v13, %v4242_v13  ;;  %v2139_v27 = vsel %vm174_vm0, %v4242_v13, 0.0 }
 0x77e   :  { %v2109_v34 = vmul.f32 %v2101_v15, %v2045_v37  ;;  %v2141_v6 = vadd.f32 %v2140_v0, %v2139_v27 }
 0x77f   :  { %v2071_v55 = vmul.f32 %v2063_v30, %v2034_v29  ;;  %v2169_v51 = vsel %vm174_vm0, %v2161_v26, 0.0 }
 0x780   :  { %v2036_v38 = vpop.f32.mrf.mxu0  ;;  %v2124_v43 = vmul.f32 %v4232_v2, %v2109_v34 }
 0x781   :  { %v2079_v59 = vadd.f32 %v2071_v55, %v2034_v29  ;;  %v2037_v23 = vadd.f32 %v4222_v41, %v2036_v38  ;;  %v2162_v55 = vmul.f32 %v4239_v4, %v4239_v4 }
 0x782   :  { %v4249_v30 = vadd.f32 %v2124_v43, %v4098_v57  ;;  %v2247_v43 = vld [vmem:[%s4423_s4] sm:$0xff] }
 0x783   :  { %v2087_v32 = vmul.f32 0.7978846, %v2079_v59  ;;  %v2056_v31 = vmul.f32 0.044715, %v2037_v23  ;;  %v2874_v40 = vpop.eup %2873  ;;  %v2048_v38 = vmul.f32 0.5, %v2037_v23  ;;  %v2163_v59 = vmul.f32 %v4245_v36, %v4245_v36 }
 0x784   :  { %v2102_v28 = vadd.f32 1.0, %v2874_v40  ;;  %v2144_v56 = vsel %vm174_vm0, %v4249_v30, 0.0 }
 0x785   :  { %2875 = vtanh.f32 %v2087_v32  ;;  %v2064_v61 = vmul.f32 %v2056_v31, %v2037_v23  ;;  %v2170_v32 = vsel %vm174_vm0, %v2162_v55, 0.0  ;;  %v2142_v31 = vsel %vm174_vm0, %v4245_v36, 0.0 }
 0x786   :  { %v2110_v7 = vmul.f32 %v2102_v28, %v2046_v54  ;;  %v2171_v5 = vadd.f32 %v2170_v32, %v2169_v51  ;;  %v2143_v15 = vadd.f32 %v2142_v31, %v2141_v6  ;;  %v2249_v28 = vld [vmem:[%s4423_s4 + $0x10] sm:$0xff] }
 0x787   :  { %v2072_v49 = vmul.f32 %v2064_v61, %v2037_v23  ;;  %v2172_v61 = vsel %vm174_vm0, %v2163_v59, 0.0  ;;  %2267 = vmatpush.msrb.mxu1 %v2249_v28 }
 0x788   :  { %v2039_v33 = vpop.f32.mrf.mxu0  ;;  %v2125_v14 = vmul.f32 %v4232_v2, %v2110_v7  ;;  %v2173_v34 = vadd.f32 %v2172_v61, %v2171_v5 }
 0x789   :  { %v2080_v21 = vadd.f32 %v2072_v49, %v2037_v23  ;;  %v2040_v53 = vadd.f32 %v4222_v41, %v2039_v33  ;;  %v2047_v41 = vmul.f32 0.5, %v2034_v29  ;;  %v2164_v23 = vmul.f32 %v4249_v30, %v4249_v30  ;;  %v2608_v33 = vld [vmem:[%s4423_s4 + $0x78] sm:$0xff]  ;;  %2268 = vmatpush.msrb.mxu1 %v2248_v19  ;;  %v2620_v19 = vld [vmem:[%s4423_s4 + $0xc0] sm:$0xff] }
 0x78a   :  { %v4261_v57 = vadd.f32 %v2125_v14, %v4103_v8  ;;  %2353 = vmatpush.msrb.mxu2 %v2608_v33  ;;  %v2605_v14 = vld [vmem:[%s4423_s4 + $0x60] sm:$0xff] }
 0x78b   :  { %v2876_v45 = vpop.eup %2875  ;;  %v2088_v39 = vmul.f32 0.7978846, %v2080_v21  ;;  %v2057_v25 = vmul.f32 0.044715, %v2040_v53  ;;  %v2174_v49 = vsel %vm174_vm0, %v2164_v23, 0.0  ;;  %v2049_v21 = vmul.f32 0.5, %v2040_v53  ;;  %2269 = vmatpush.msrb.mxu1 %v2247_v43 }
 0x78c   :  { %v2103_v42 = vadd.f32 1.0, %v2876_v45  ;;  %v2165_v50 = vmul.f32 %v4261_v57, %v4261_v57  ;;  %v2146_v62 = vsel %vm174_vm0, %v4261_v57, 0.0  ;;  %v2607_v45 = vld [vmem:[%s4423_s4 + $0x70] sm:$0xff]  ;;  %v2175_v20 = vadd.f32 %v2174_v49, %v2173_v34  ;;  %v2613_v49 = vld [vmem:[%s4423_s4 + $0x98] sm:$0xff]  ;;  %v2621_v34 = vld [vmem:[%s4423_s4 + $0xc8] sm:$0xff] }
 0x78d   :  { %2877 = vtanh.f32 %v2088_v39  ;;  %v2065_v52 = vmul.f32 %v2057_v25, %v2040_v53  ;;  %v2145_v39 = vadd.f32 %v2144_v56, %v2143_v15  ;;  %v2596_v25 = vld [vmem:[%s4423_s4 + $0x28] sm:$0xff]  ;;  %2354 = vmatpush.msrb.mxu2 %v2607_v45  ;;  %2324 = vmatpush.msra.mxu1 %v2603_v1 }
 0x78e   :  { %v2111_v24 = vmul.f32 %v2103_v42, %v2047_v41  ;;  %v2176_v54 = vsel %vm174_vm0, %v2165_v50, 0.0  ;;  %v2595_v41 = vld [vmem:[%s4423_s4 + $0x20] sm:$0xff]  ;;  %2297 = vmatpush.msrb.mxu3 %v2596_v25  ;;  %v2601_v45 = vld [vmem:[%s4423_s4 + $0x48] sm:$0xff] }
 0x78f   :  { %v2073_v22 = vmul.f32 %v2065_v52, %v2040_v53  ;;  %v2606_v52 = vld [vmem:[%s4423_s4 + $0x68] sm:$0xff]  ;;  %v2147_v7 = vadd.f32 %v2146_v62, %v2145_v39  ;;  %v2610_v39 = vld [vmem:[%s4423_s4 + $0x80] sm:$0xff] }
 0x790   :  { %v2126_v11 = vmul.f32 %v4232_v2, %v2111_v24  ;;  %2355 = vmatpush.msrb.mxu2 %v2606_v52  ;;  %2298 = vmatpush.msrb.mxu3 %v2595_v41  ;;  %v2600_v25 = vld [vmem:[%s4423_s4 + $0x40] sm:$0xff] }
 0x791   :  { %v2081_v3 = vadd.f32 %v2073_v22, %v2040_v53  ;;  %v2764_v41 = vld [vmem:[%s4424_s10] ss:$0 sm:$0xff] }
 0x792   :  { %v4271_v46 = vadd.f32 %v2126_v11, %v4107_v16  ;;  %2356 = vmatpush.msrb.mxu2 %v2605_v14  ;;  %2382 = vmatpush.msra.mxu3 %v2613_v49  ;;  %v2765_v14 = vld [vmem:[%s4425_s15] ss:$0 sm:$0xff] }
 0x793   :  { %v2878_v9 = vpop.eup %2877  ;;  %v2089_v29 = vmul.f32 0.7978846, %v2081_v3 }
 0x794   :  { %v2104_v17 = vadd.f32 1.0, %v2878_v9  ;;  %v2166_v37 = vmul.f32 %v4271_v46, %v4271_v46  ;;  %v2148_v42 = vsel %vm174_vm0, %v4271_v46, 0.0  ;;  %v2177_v9 = vadd.f32 %v2176_v54, %v2175_v20  ;;  %2440 = vmatpush.msra.mxu2 %v2623_v58 }
 0x795   :  { %2879 = vtanh.f32 %v2089_v29  ;;  %v2149_v29 = vadd.f32 %v2148_v42, %v2147_v7 }
 0x796   :  { %v2112_v10 = vmul.f32 %v2104_v17, %v2048_v38  ;;  %v2178_v22 = vsel %vm174_vm0, %v2166_v37, 0.0  ;;  %v2612_v37 = vld [vmem:[%s4423_s4 + $0x90] sm:$0xff] }
 0x797   :  { %v2179_v38 = vadd.f32 %v2178_v22, %v2177_v9  ;;  %2383 = vmatpush.msra.mxu3 %v2612_v37  ;;  %v2766_v37 = vld [vmem:[%s4426_s25] ss:$0 sm:$0xff] }
 0x798   :  { %v2127_v8 = vmul.f32 %v4232_v2, %v2112_v10 }
 0x799   :  { %2384 = vmatpush.msra.mxu3 %v2611_v48 }
 0x79a   :  { %v4281_v40 = vadd.f32 %v2127_v8, %v4111_v44 }
 0x79b   :  { %v2880_v16 = vpop.eup %2879  ;;  %2385 = vmatpush.msra.mxu3 %v2610_v39 }
 0x79c   :  { %v2105_v44 = vadd.f32 1.0, %v2880_v16  ;;  %v2167_v53 = vmul.f32 %v4281_v40, %v4281_v40  ;;  %v2150_v24 = vsel %vm174_vm0, %v4281_v40, 0.0 }
 0x79d   :  { %v2151_v17 = vadd.f32 %v2150_v24, %v2149_v29 }
 0x79e   :  { %v2113_v47 = vmul.f32 %v2105_v44, %v2049_v21  ;;  %v2180_v55 = vsel %vm174_vm0, %v2167_v53, 0.0  ;;  %v2602_v21 = vld [vmem:[%s4423_s4 + $0x50] sm:$0xff] }
 0x79f   :  { %v2181_v0 = vadd.f32 %v2180_v55, %v2179_v38  ;;  %v2622_v44 = vld [vmem:[%s4423_s4 + $0xd0] sm:$0xff]  ;;  %2325 = vmatpush.msra.mxu1 %v2602_v21 }
 0x7a0   :  { %v2128_v3 = vmul.f32 %v4232_v2, %v2113_v47  ;;  %2441 = vmatpush.msra.mxu2 %v2622_v44 }
 0x7a1   :  { %2326 = vmatpush.msra.mxu1 %v2601_v45 }
 0x7a2   :  { %v4311_v11 = vadd.f32 %v2128_v3, %v4115_v12  ;;  %2442 = vmatpush.msra.mxu2 %v2621_v34 }
 0x7a3   :  { %2327 = vmatpush.msra.mxu1 %v2600_v25 }
 0x7a4   :  { %v2152_v26 = vsel %vm174_vm0, %v4311_v11, 0.0  ;;  %v2168_v2 = vmul.f32 %v4311_v11, %v4311_v11  ;;  %2443 = vmatpush.msra.mxu2 %v2620_v19 }
 0x7a5   :  { %v2153_v59 = vadd.f32 %v2152_v26, %v2151_v17 }
 0x7a6   :  { %v2182_v10 = vsel %vm174_vm0, %v2168_v2, 0.0 }
 0x7a7   :  { %v2154_v27 = vrot.slane %v2153_v59, 4  ;;  %v2183_v12 = vadd.f32 %v2182_v10, %v2181_v0 }
 0x7a9   :  { %v2155_v23 = vadd.f32 %v2154_v27, %v2153_v59  ;;  %v2184_v32 = vrot.slane %v2183_v12, 4  ;;  %v2628_v27 = vld [vmem:[%s4423_s4 + $0xf8] sm:$0xff] }
 0x7ab   :  { %v2156_v31 = vrot.slane %v2155_v23, 2  ;;  %v2185_v8 = vadd.f32 %v2184_v32, %v2183_v12  ;;  %v2618_v12 = vld [vmem:[%s4423_s4 + $0xb8] sm:$0xff] }
 0x7ad   :  { %v2157_v51 = vadd.f32 %v2156_v31, %v2155_v23  ;;  %v2186_v6 = vrot.slane %v2185_v8, 2  ;;  %v2627_v23 = vld [vmem:[%s4423_s4 + $0xf0] sm:$0xff]  ;;  %v2626_v31 = vld [vmem:[%s4423_s4 + $0xe8] sm:$0xff] }
 0x7af   :  { %v2158_v61 = vrot.slane %v2157_v51, 1  ;;  %v2187_v56 = vadd.f32 %v2186_v6, %v2185_v8  ;;  %v2625_v6 = vld [vmem:[%s4423_s4 + $0xe0] sm:$0xff] }
 0x7b1   :  { %v2159_v50 = vadd.f32 %v2158_v61, %v2157_v51  ;;  %v2188_v16 = vrot.slane %v2187_v56, 1  ;;  %v2616_v51 = vld [vmem:[%s4423_s4 + $0xa8] sm:$0xff] }
 0x7b3   :  { %v4319_v5 = vmul.f32 %v2159_v50, %v3487_v18  ;;  %v2189_v15 = vadd.f32 %v2188_v16, %v2187_v56 }
 0x7b5   :  { %v2190_v33 = vmul.f32 %v2189_v15, %v3487_v18  ;;  %v2191_v62 = vmul.f32 %v4319_v5, %v4319_v5  ;;  %v2193_v7 = vsub.f32 %v4242_v13, %v4319_v5  ;;  %v2194_v43 = vsub.f32 %v4239_v4, %v4319_v5  ;;  %v2615_v15 = vld [vmem:[%s4423_s4 + $0xa0] sm:$0xff] }
 0x7b6   :  { %v2196_v22 = vsub.f32 %v4249_v30, %v4319_v5  ;;  %v2195_v55 = vsub.f32 %v4245_v36, %v4319_v5  ;;  %v2197_v4 = vsub.f32 %v4261_v57, %v4319_v5  ;;  %v2199_v30 = vsub.f32 %v4281_v40, %v4319_v5  ;;  %v2617_v57 = vld [vmem:[%s4423_s4 + $0xb0] sm:$0xff] }
 0x7b7   :  { %v2192_v28 = vsub.f32 %v2190_v33, %v2191_v62  ;;  %v2198_v61 = vsub.f32 %v4271_v46, %v4319_v5  ;;  %v2200_v56 = vsub.f32 %v4311_v11, %v4319_v5 }
 0x7b9   :  { %v2201_v18 = vadd.f32 1e-05, %v2192_v28 }
 0x7bb   :  { %2881 = vrsqrt.f32 %v2201_v18  ;;  %vm2208_vm9 = vweird.f32 %v2201_v18 }
 0x7c1   :  { %v2882_v54 = vpop.eup %2881 }
 0x7c2   :  { %v2203_v42 = vmul.f32 %v2882_v54, %v2201_v18  ;;  %vm2209_vm8 = vweird.f32 %v2882_v54 }
 0x7c3   :  { %vm2210_vm10 = vmor %vm2208_vm9, %vm2209_vm8 }
 0x7c4   :  { %v2204_v53 = vmul.f32 %v2882_v54, %v2203_v42 }
 0x7c6   :  { %v2205_v47 = vmul.f32 0.5, %v2204_v53 }
 0x7c8   :  { %v2206_v52 = vsub.f32 1.5, %v2205_v47 }
 0x7ca   :  { %v2207_v20 = vmul.f32 %v2882_v54, %v2206_v52 }
 0x7cc   :  { %v2211_v24 = vsel %vm2210_vm10, %v2882_v54, %v2207_v20 }
 0x7cd   :  { %v2212_v3 = vmul.f32 %v2211_v24, %v2193_v7  ;;  %v2213_v9 = vmul.f32 %v2211_v24, %v2194_v43  ;;  %v2215_v29 = vmul.f32 %v2211_v24, %v2196_v22  ;;  %v2214_v26 = vmul.f32 %v2211_v24, %v2195_v55  ;;  %v2483_v7 = vpop.permute.xlu2 %2482 }
 0x7ce   :  { %v2216_v10 = vmul.f32 %v2211_v24, %v2197_v4  ;;  %v2218_v36 = vmul.f32 %v2211_v24, %v2199_v30  ;;  %v2217_v49 = vmul.f32 %v2211_v24, %v2198_v61  ;;  %v2219_v1 = vmul.f32 %v2211_v24, %v2200_v56 }
 0x7cf   :  { %v2223_v13 = vmul.f32 %v2764_v41, %v2212_v3  ;;  %v2224_v38 = vmul.f32 %v2764_v41, %v2213_v9  ;;  %v2226_v17 = vmul.f32 %v2764_v41, %v2215_v29  ;;  %v2225_v40 = vmul.f32 %v2764_v41, %v2214_v26 }
 0x7d0   :  { %v2227_v32 = vmul.f32 %v2764_v41, %v2216_v10  ;;  %v2229_v8 = vmul.f32 %v2764_v41, %v2218_v36  ;;  %v2228_v46 = vmul.f32 %v2764_v41, %v2217_v49  ;;  %v2230_v33 = vmul.f32 %v2764_v41, %v2219_v1 }
 0x7d1   :  { %v2234_v2 = vadd.f32 %v2765_v14, %v2223_v13  ;;  %v2235_v0 = vadd.f32 %v2765_v14, %v2224_v38  ;;  %v2237_v59 = vadd.f32 %v2765_v14, %v2226_v17  ;;  %v2236_v50 = vadd.f32 %v2765_v14, %v2225_v40 }
 0x7d2   :  { %v2238_v16 = vadd.f32 %v2765_v14, %v2227_v32  ;;  %v2240_v58 = vadd.f32 %v2765_v14, %v2229_v8  ;;  %v2239_v11 = vadd.f32 %v2765_v14, %v2228_v46  ;;  %v2241_v5 = vadd.f32 %v2765_v14, %v2230_v33 }
 0x7d3   :  { %2594 = vmatmul.msk.f32.vlgmr.msrb.gmra.mxu1 %vm174_vm0, %v2234_v2  ;;  %2599 = vmatmul.msk.f32.vlgmr.msrb.gmra.mxu3 %vm174_vm0, %v2235_v0 }
 0x7d4   :  { %2609 = vmatmul.msk.f32.vlgmr.msrb.gmra.mxu2 %vm174_vm0, %v2237_v59  ;;  %2469 = vmatpush.msrb.mxu3 %v2628_v27 }
 0x7d5   :  { %2411 = vmatpush.msrb.mxu1 %v2618_v12 }
 0x7d6   :  { %2470 = vmatpush.msrb.mxu3 %v2627_v23 }
 0x7d7   :  { %2412 = vmatpush.msrb.mxu1 %v2617_v57 }
 0x7d8   :  { %2471 = vmatpush.msrb.mxu3 %v2626_v31 }
 0x7d9   :  { %2413 = vmatpush.msrb.mxu1 %v2616_v51 }
 0x7da   :  { %2472 = vmatpush.msrb.mxu3 %v2625_v6 }
 0x7db   :  { %2604 = vmatmul.msk.f32.vlgmr.msra.gmra.mxu1 %vm174_vm0, %v2236_v50  ;;  %2614 = vmatmul.msk.f32.vlgmr.msra.gmra.mxu3 %vm174_vm0, %v2238_v16 }
 0x7dc   :  { %2624 = vmatmul.msk.f32.vlgmr.msra.gmra.mxu2 %vm174_vm0, %v2240_v58  ;;  %2414 = vmatpush.msrb.mxu1 %v2615_v15 }
 0x7e3   :  { %2619 = vmatmul.msk.f32.vlgmr.msrb.gmra.mxu1 %vm174_vm0, %v2239_v11  ;;  %2629 = vmatmul.msk.f32.vlgmr.msrb.gmra.mxu3 %vm174_vm0, %v2241_v5  ;;  %vm2488_vm0 = vcmask 130048  }
 0x850   :  { %v2271_v62 = vpop.f32.mrf.mxu1 }
 0x851   :  { %v2274_v21 = vadd.f32 %v2766_v37, %v2271_v62 }
 0x856   :  { %v2300_v44 = vpop.f32.mrf.mxu3 }
 0x857   :  { %v2303_v48 = vadd.f32 %v2300_v44, %v2274_v21  ;;  %v2358_v34 = vpop.f32.mrf.mxu2 }
 0x858   :  { %v2329_v28 = vpop.f32.mrf.mxu1 }
 0x859   :  { %v2332_v45 = vadd.f32 %v2329_v28, %v2303_v48 }
 0x85b   :  { %v2361_v39 = vadd.f32 %v2358_v34, %v2332_v45 }
 0x85e   :  { %v2387_v18 = vpop.f32.mrf.mxu3 }
 0x85f   :  { %v2390_v25 = vadd.f32 %v2387_v18, %v2361_v39  ;;  %v2445_v42 = vpop.f32.mrf.mxu2 }
 0x860   :  { %v2416_v19 = vpop.f32.mrf.mxu1 }
 0x861   :  { %v2419_v54 = vadd.f32 %v2416_v19, %v2390_v25 }
 0x863   :  { %v2448_v53 = vadd.f32 %v2445_v42, %v2419_v54 }
 0x866   :  { %v2474_v47 = vpop.f32.mrf.mxu3 }
 0x867   :  { %v2477_v52 = vadd.f32 %v2474_v47, %v2448_v53 }
 0x869   :  { %v2478_v20 = vsub.f32 %v2477_v52, %v3185_v63 }
 0x86b   :  { %v2485_v41 = vmul.f32 %v2483_v7, %v2478_v20 }
 0x86d   :  { %v2486_v43 = vmul.f32 %v2485_v41, %v3183_v60 }
 0x86f   :  { %v2487_v22 = vadd.f32 %v2486_v43, %v3172_v35 }
 0x871   :  { %v2489_v24 = vsel %vm2488_vm0, %v2487_v22, 0.0 }
 0x872   :  { %2490 = vst [vmem:[#allocation7] sm:$0xff] %v2489_v24 }
 0x873   :  { %2906 = shalt.err (!%p2903_p4)
}
 0x874   :  { %2501 = dma.vmem_to_hbm [thread:$0]  %s2497_s5, 128, %s2499_s9, [#allocation8]  }
 0x875   :  { %2907 = dma.done.wait [#allocation8], 128  }
 0x876   :  { %2908 = vsyncadd [#allocation8], 4294967168 }
 0x877   :  { %2506 = vsyncpa [#allocation8], 1 }

</bundles_post_ra>
